<compile_context>
chip_gen: v6e
topology: v6e:2x2x1
jax: 0.10.0
libtpu: 0.0.40
codegen_flags: <defaults>
</compile_context>

<pallas_src>
import functools

import jax
import jax.numpy as jnp
from jax.experimental import pallas as pl
from jax.experimental.pallas import tpu as pltpu

# OGBG atom feature vocabulary sizes (from the PyTorch module).
VOCAB_SIZES = [119, 4, 12, 12, 10, 6, 6, 2, 2]
NUM_FEATURES = len(VOCAB_SIZES)

HALF = 128                      # lane width of each packed-table half
V_PACK = 2 * HALF               # rows of one table term: [feature 0 | features 1..8]
NUM_SPLIT = 3                   # bf16 terms whose sum reproduces the f32 table
V_TOTAL = NUM_SPLIT * V_PACK    # 768 rows of the stacked bf16 table

# Per-feature shift applied to the raw indices (in the wrapper) so the kernel
# can compare both table halves against the same 0..127 iota:
#   feature 0 -> rows [0, 119)            of the low  half (rows [0,128))
#   feature i -> rows [off_i, off_i+d_i)  of the high half (rows [128,256))
_HI_OFFSETS = [0]
for _d in VOCAB_SIZES[1:-1]:
    _HI_OFFSETS.append(_HI_OFFSETS[-1] + _d)
SHIFTS = [0] + _HI_OFFSETS                       # length 9, local offsets
HI_TOTAL = sum(VOCAB_SIZES[1:])                  # 54
assert VOCAB_SIZES[0] <= HALF and HI_TOTAL <= HALF

_VMEM_TARGET = 30 << 20         # tile-sizing budget (fits v7x's 32 MiB scoped default)
_VMEM_LIMIT = 48 << 20          # < 64 MiB physical on v7x; ample on v5e/v6e
_MAX_TILE = 2048
_TILE_GRAN = 256                # multiple of 8 sublanes / MXU M-dim


def _round_up(x, m):
    return (x + m - 1) // m * m


def _out_width(hidden):
    """Column count of the table / kernel output.

    hidden <= 128: write at the exact width (masked vst; no padded HBM bytes,
    no post-kernel column slice).  Wider hidden: lane-dense multiple of 128.
    """
    return hidden if hidden <= 128 else _round_up(hidden, 128)


def _pick_tile(h_out, n):
    """Largest row tile that keeps buffers inside the VMEM budget."""
    # Rough per-row VMEM bytes: f32 out double-buffer (+result temp), int32 x
    # block double-buffer (lane-padded to 128), bf16 counts3 (V_TOTAL lanes),
    # and a few (tile,128) int32 compare/iota temporaries.
    per_row = 3 * h_out * 4 + 2 * 128 * 4 + V_TOTAL * 2 + 4 * 128 * 4
    tile = _VMEM_TARGET // per_row
    tile = max(_TILE_GRAN, min(_MAX_TILE, (tile // _TILE_GRAN) * _TILE_GRAN))
    return min(tile, _round_up(n, _TILE_GRAN))


def _atom_encoder_kernel(x_ref, table_ref, out_ref, *, tile_n):
    # x_ref:     (tile_n, 9)        int32, indices already shifted per feature
    # table_ref: (V_TOTAL, h_out)   bf16, three stacked bf16 terms of the table
    # out_ref:   (tile_n, h_out)    f32
    idx = x_ref[...]                                            # (tile_n, 9)
    iota = jax.lax.broadcasted_iota(jnp.int32, (tile_n, HALF), 1)

    # Low half: feature 0 only -> exact one-hot (exact in bf16).
    counts_lo = (iota == idx[:, 0:1]).astype(jnp.bfloat16)      # (tile_n, 128)

    # High half: features 1..8 live in disjoint local ranges.  Accumulate the
    # 8 boolean compares in int32 (single chain) and convert to bf16 once
    # (values are small integers -> exact in bf16).
    hi = (iota == idx[:, 1:2]).astype(jnp.int32)
    for i in range(2, NUM_FEATURES):
        hi = hi + (iota == idx[:, i : i + 1]).astype(jnp.int32)
    counts_hi = hi.astype(jnp.bfloat16)

    counts = jnp.concatenate([counts_lo, counts_hi], axis=-1)   # (tile_n, 256)
    # Replicate the counts along K so a SINGLE bf16 matmul contracts all three
    # bf16 table terms; the MXU accumulates in f32 (no vector adds, one weight
    # push / result pop per tile).
    counts3 = jnp.concatenate([counts] * NUM_SPLIT, axis=-1)    # (tile_n, 768)

    out_ref[...] = jnp.dot(
        counts3, table_ref[...], preferred_element_type=jnp.float32
    )


def atom_encoder_forward(x, packed_table, hidden_channels):
    """x: [N, 9] int, packed_table: [768, h_out] bf16 -> [N, hidden] f32."""
    n, f = x.shape
    assert f == NUM_FEATURES
    v_tot, h_out = packed_table.shape
    assert v_tot == V_TOTAL
    assert h_out == _out_width(hidden_channels)
    assert packed_table.dtype == jnp.bfloat16

    # Fold the per-feature table offsets into the indices once, outside the
    # kernel (removes 9 scalar-broadcast adds per tile).
    # TODO(synk): out-of-vocab raw indices silently alias another feature's
    # rows here, whereas nn.Embedding would raise an index error.
    x_shifted = x.astype(jnp.int32) + jnp.asarray(SHIFTS, dtype=jnp.int32)

    tile = _pick_tile(h_out, n)
    n_pad = _round_up(n, tile)
    if n_pad != n:
        # Padded rows use index 0 (valid table rows); their outputs are
        # garbage and are always sliced off below — never returned unsliced.
        x_shifted = jnp.pad(x_shifted, ((0, n_pad - n), (0, 0)))

    kernel = functools.partial(_atom_encoder_kernel, tile_n=tile)
    out = pl.pallas_call(
        kernel,
        out_shape=jax.ShapeDtypeStruct((n_pad, h_out), jnp.float32),
        grid_spec=pltpu.PrefetchScalarGridSpec(
            num_scalar_prefetch=0,
            grid=(n_pad // tile,),
            in_specs=[
                pl.BlockSpec((tile, NUM_FEATURES), lambda i: (i, 0)),
                # Small constant table: keep the whole array resident in VMEM
                # (loaded once, no per-step pipelining / double buffering).
                pl.BlockSpec(memory_space=pltpu.MemorySpace.VMEM),
            ],
            out_specs=pl.BlockSpec((tile, h_out), lambda i: (i, 0)),
        ),
        compiler_params=pltpu.CompilerParams(
            dimension_semantics=("parallel",),   # shards across v7x's 2 TCs
            vmem_limit_bytes=_VMEM_LIMIT,
        ),
    )(x_shifted, packed_table)

    if n_pad != n:
        out = out[:n]
    if h_out != hidden_channels:
        out = out[:, :hidden_channels]
    return out


def init_atom_encoder_tables(key, hidden_channels):
    """One table per feature, N(0,1) init (matches nn.Embedding.reset_parameters)."""
    return [
        jax.random.normal(
            jax.random.fold_in(key, i), (dim, hidden_channels), jnp.float32
        )
        for i, dim in enumerate(VOCAB_SIZES)
    ]


def pack_tables(tables):
    """Pack the 9 f32 tables into a (768, h_out) bf16 table.

    Each 256-row term uses the layout: rows [0,119) feature 0, rows [128,182)
    features 1..8 concatenated; all padding rows/cols are exactly zero.  The
    f32 values are split into NUM_SPLIT bf16 terms (t0 + t1 + t2 reproduces
    the f32 table to ~2^-24 relative error) stacked along the contraction dim,
    so the kernel's single bf16 matmul recovers full f32 precision.
    """
    hidden = tables[0].shape[1]
    h_out = _out_width(hidden)
    lo = tables[0]
    hi = jnp.concatenate(tables[1:], axis=0)
    base = jnp.zeros((V_PACK, h_out), jnp.float32)
    base = base.at[: lo.shape[0], :hidden].set(lo)
    base = base.at[HALF : HALF + hi.shape[0], :hidden].set(hi)

    terms, resid = [], base
    for _ in range(NUM_SPLIT):
        t = resid.astype(jnp.bfloat16)
        terms.append(t)
        resid = resid - t.astype(jnp.float32)
    return jnp.concatenate(terms, axis=0)            # (768, h_out) bf16


def atom_encoder_reference(x, tables):
    """Plain-JAX reference: sum of per-feature embedding lookups."""
    out = jnp.zeros((x.shape[0], tables[0].shape[1]), jnp.float32)
    for i in range(NUM_FEATURES):
        out = out + tables[i][x[:, i]]
    return out


if __name__ == "__main__":
    key = jax.random.PRNGKey(0)
    hidden = 32
    n_nodes = 64

    tables = init_atom_encoder_tables(key, hidden)
    packed = pack_tables(tables)

    # Build integer atom features: column i sampled uniformly in [0, dim_i).
    idx_cols = []
    for i, dim in enumerate(VOCAB_SIZES):
        k = jax.random.fold_in(key, 1000 + i)
        idx_cols.append(
            jax.random.randint(k, (n_nodes, 1), 0, dim, dtype=jnp.int32)
        )
    x = jnp.concatenate(idx_cols, axis=1)  # (64, 9) int32

    out = atom_encoder_forward(x, packed, hidden)
    out = jax.block_until_ready(out)

    ref = atom_encoder_reference(x, tables)
    assert out.shape == (n_nodes, hidden)
    assert jnp.allclose(out, ref, atol=1e-5, rtol=1e-5), float(
        jnp.max(jnp.abs(out - ref))
    )

    print("KERNEL_OK")
</pallas_src>

<mosaic_0001>
module attributes {stable_mosaic.version = 11 : i64} {
  func.func @_atom_encoder_kernel(%arg0: i32, %arg1: memref<256x9xi32, #tpu.memory_space<vmem>>, %arg2: memref<768x32xbf16, #tpu.memory_space<vmem>>, %arg3: memref<256x32xf32, #tpu.memory_space<vmem>>) attributes {dimension_semantics = [#tpu.dimension_semantics<parallel>], iteration_bounds = array<i64: 1>, scalar_prefetch = 0 : i64, scratch_operands = 0 : i64, tpu.core_type = #tpu.core_type<tc>, window_params = [{transform_indices = @transform_0, window_bounds = array<i64: 256, 9>}, {pipeline_mode = #tpu.pipeline_mode<synchronous>, transform_indices = @transform_1, window_bounds = array<i64: 768, 32>}, {transform_indices = @transform_2, window_bounds = array<i64: 256, 32>}]} {
    %c0 = arith.constant 0 : index
    %c0_0 = arith.constant 0 : index
    %0 = vector.load %arg1[%c0, %c0_0] : memref<256x9xi32, #tpu.memory_space<vmem>>, vector<256x9xi32>
    %1 = tpu.iota {dimensions = array<i32: 1>} : vector<256x128xi32>
    %2 = vector.extract_strided_slice %0 {offsets = [0, 0], sizes = [256, 1], strides = [1, 1]} : vector<256x9xi32> to vector<256x1xi32>
    %3 = vector.broadcast %2 : vector<256x1xi32> to vector<256x128xi32>
    %4 = arith.cmpi eq, %1, %3 : vector<256x128xi32>
    %5 = arith.extui %4 : vector<256x128xi1> to vector<256x128xi32>
    %6 = arith.sitofp %5 : vector<256x128xi32> to vector<256x128xf32>
    %7 = arith.truncf %6 : vector<256x128xf32> to vector<256x128xbf16>
    %8 = vector.extract_strided_slice %0 {offsets = [0, 1], sizes = [256, 1], strides = [1, 1]} : vector<256x9xi32> to vector<256x1xi32>
    %9 = vector.broadcast %8 : vector<256x1xi32> to vector<256x128xi32>
    %10 = arith.cmpi eq, %1, %9 : vector<256x128xi32>
    %11 = arith.extui %10 : vector<256x128xi1> to vector<256x128xi32>
    %12 = vector.extract_strided_slice %0 {offsets = [0, 2], sizes = [256, 1], strides = [1, 1]} : vector<256x9xi32> to vector<256x1xi32>
    %13 = vector.broadcast %12 : vector<256x1xi32> to vector<256x128xi32>
    %14 = arith.cmpi eq, %1, %13 : vector<256x128xi32>
    %15 = arith.extui %14 : vector<256x128xi1> to vector<256x128xi32>
    %16 = arith.addi %11, %15 : vector<256x128xi32>
    %17 = vector.extract_strided_slice %0 {offsets = [0, 3], sizes = [256, 1], strides = [1, 1]} : vector<256x9xi32> to vector<256x1xi32>
    %18 = vector.broadcast %17 : vector<256x1xi32> to vector<256x128xi32>
    %19 = arith.cmpi eq, %1, %18 : vector<256x128xi32>
    %20 = arith.extui %19 : vector<256x128xi1> to vector<256x128xi32>
    %21 = arith.addi %16, %20 : vector<256x128xi32>
    %22 = vector.extract_strided_slice %0 {offsets = [0, 4], sizes = [256, 1], strides = [1, 1]} : vector<256x9xi32> to vector<256x1xi32>
    %23 = vector.broadcast %22 : vector<256x1xi32> to vector<256x128xi32>
    %24 = arith.cmpi eq, %1, %23 : vector<256x128xi32>
    %25 = arith.extui %24 : vector<256x128xi1> to vector<256x128xi32>
    %26 = arith.addi %21, %25 : vector<256x128xi32>
    %27 = vector.extract_strided_slice %0 {offsets = [0, 5], sizes = [256, 1], strides = [1, 1]} : vector<256x9xi32> to vector<256x1xi32>
    %28 = vector.broadcast %27 : vector<256x1xi32> to vector<256x128xi32>
    %29 = arith.cmpi eq, %1, %28 : vector<256x128xi32>
    %30 = arith.extui %29 : vector<256x128xi1> to vector<256x128xi32>
    %31 = arith.addi %26, %30 : vector<256x128xi32>
    %32 = vector.extract_strided_slice %0 {offsets = [0, 6], sizes = [256, 1], strides = [1, 1]} : vector<256x9xi32> to vector<256x1xi32>
    %33 = vector.broadcast %32 : vector<256x1xi32> to vector<256x128xi32>
    %34 = arith.cmpi eq, %1, %33 : vector<256x128xi32>
    %35 = arith.extui %34 : vector<256x128xi1> to vector<256x128xi32>
    %36 = arith.addi %31, %35 : vector<256x128xi32>
    %37 = vector.extract_strided_slice %0 {offsets = [0, 7], sizes = [256, 1], strides = [1, 1]} : vector<256x9xi32> to vector<256x1xi32>
    %38 = vector.broadcast %37 : vector<256x1xi32> to vector<256x128xi32>
    %39 = arith.cmpi eq, %1, %38 : vector<256x128xi32>
    %40 = arith.extui %39 : vector<256x128xi1> to vector<256x128xi32>
    %41 = arith.addi %36, %40 : vector<256x128xi32>
    %42 = vector.extract_strided_slice %0 {offsets = [0, 8], sizes = [256, 1], strides = [1, 1]} : vector<256x9xi32> to vector<256x1xi32>
    %43 = vector.broadcast %42 : vector<256x1xi32> to vector<256x128xi32>
    %44 = arith.cmpi eq, %1, %43 : vector<256x128xi32>
    %45 = arith.extui %44 : vector<256x128xi1> to vector<256x128xi32>
    %46 = arith.addi %41, %45 : vector<256x128xi32>
    %47 = arith.sitofp %46 : vector<256x128xi32> to vector<256x128xbf16>
    %48 = tpu.concatenate %7, %47 in 1 : vector<256x128xbf16>, vector<256x128xbf16> -> vector<256x256xbf16>
    %49 = tpu.concatenate %48, %48, %48 in 1 : vector<256x256xbf16>, vector<256x256xbf16>, vector<256x256xbf16> -> vector<256x768xbf16>
    %c0_1 = arith.constant 0 : index
    %c0_2 = arith.constant 0 : index
    %50 = vector.load %arg2[%c0_1, %c0_2] : memref<768x32xbf16, #tpu.memory_space<vmem>>, vector<768x32xbf16>
    %cst = arith.constant dense<0.000000e+00> : vector<256x32xf32>
    %51 = tpu.matmul %49, %50, %cst {dimension_numbers = #tpu.dot_dimension_numbers<[1], [0], [0], [1], [0, 0, 1, 1], [], []>} : vector<256x768xbf16>, vector<768x32xbf16>, vector<256x32xf32> -> vector<256x32xf32>
    %c0_3 = arith.constant 0 : index
    %c0_4 = arith.constant 0 : index
    %52 = vector.load %arg3[%c0_3, %c0_4] : memref<256x32xf32, #tpu.memory_space<vmem>>, vector<256x32xf32>
    tpu.vector_store %arg3[%c0_3, %c0_4], %51 {strides = array<i32>} : memref<256x32xf32, #tpu.memory_space<vmem>>, vector<256x32xf32>,
    return
  }
  func.func @transform_0(%arg0: i32) -> (i32, i32) {
    %c0_i32 = arith.constant 0 : i32
    %c0_i32_0 = arith.constant 0 : i32
    return %arg0, %c0_i32 : i32, i32
  }
  func.func @transform_1(%arg0: i32) -> (i32, i32) {
    %c0_i32 = arith.constant 0 : i32
    %c0_i32_0 = arith.constant 0 : i32
    %c0_i32_1 = arith.constant 0 : i32
    return %c0_i32, %c0_i32_0 : i32, i32
  }
  func.func @transform_2(%arg0: i32) -> (i32, i32) {
    %c0_i32 = arith.constant 0 : i32
    %c0_i32_0 = arith.constant 0 : i32
    return %arg0, %c0_i32 : i32, i32
  }
}

</mosaic_0001>

<bundles_post_ra>
// kernel: tpu_custom_call.1
= control target key start
LH: loop header
LB: loop body
LE: loop exit
PB: predicated region body
PF: predicated region fallthrough
CT: control target
= control target key end

     0   :  { %v6164_v0 = vmov 0   ;;  %v3389_v33 = vmov 1   ;;  %v3390_v38 = vmov 2   ;;  %s6161_s0 = inlined_call_operand.vmem [shape: s32[256,9], index: 0, kind: input, shape index: {}]   ;;  %s6162_s1 = inlined_call_operand.vmem [shape: bf16[768,32], index: 1, kind: input, shape index: {}]   ;;  %s6163_s2 = inlined_call_operand.vmem [shape: f32[256,32], index: 2, kind: output, shape index: {}]  }
   0x1   :  { %3249 = vset.pattern.permute.xlu1 %v6164_v0  ;;  %3248 = vset.pattern.permute.xlu0 %v6164_v0  ;;  %v3418_v1 = vld [vmem:[%s6161_s0 + $0x10] sm:$0xff]  ;;  %v3423_v2 = vld [vmem:[%s6161_s0] sm:$0xff]  ;;  %v3430_v3 = vld [vmem:[%s6161_s0 + $0x18] sm:$0xff] }
   0x2   :  { %53 = vperm.xlu1 %3249, %v3418_v1   ;;  %47 = vperm.xlu0 %3248, %v3423_v2   ;;  %v3435_v4 = vld [vmem:[%s6161_s0 + $0x8] sm:$0xff]  ;;  %v3447_v6 = vld [vmem:[%s6161_s0 + $0x20] sm:$0xff]  ;;  %v3454_v7 = vld [vmem:[%s6161_s0 + $0x38] sm:$0xff] }
   0x3   :  { %v3442_v5 = vld [vmem:[%s6161_s0 + $0x28] sm:$0xff]  ;;  %v3459_v8 = vld [vmem:[%s6161_s0 + $0x30] sm:$0xff]  ;;  %v3471_v10 = vld [vmem:[%s6161_s0 + $0x40] sm:$0xff] }
   0x4   :  { %v3466_v9 = vld [vmem:[%s6161_s0 + $0x48] sm:$0xff]  ;;  %v3478_v11 = vld [vmem:[%s6161_s0 + $0x58] sm:$0xff]  ;;  %v3483_v12 = vld [vmem:[%s6161_s0 + $0x50] sm:$0xff] }
   0x5   :  { %v3490_v13 = vld [vmem:[%s6161_s0 + $0x68] sm:$0xff]  ;;  %v3495_v14 = vld [vmem:[%s6161_s0 + $0x60] sm:$0xff]  ;;  %v3502_v15 = vld [vmem:[%s6161_s0 + $0x78] sm:$0xff] }
   0x6   :  { %56 = vperm.xlu1 %3249, %v3430_v3   ;;  %50 = vperm.xlu0 %3248, %v3435_v4   ;;  %v3507_v16 = vld [vmem:[%s6161_s0 + $0x70] sm:$0xff]  ;;  %v3514_v17 = vld [vmem:[%s6161_s0 + $0x88] sm:$0xff]  ;;  %v3519_v18 = vld [vmem:[%s6161_s0 + $0x80] sm:$0xff] }
   0x7   :  { %v3526_v19 = vld [vmem:[%s6161_s0 + $0x98] sm:$0xff]  ;;  %v3531_v20 = vld [vmem:[%s6161_s0 + $0x90] sm:$0xff]  ;;  %v3538_v21 = vld [vmem:[%s6161_s0 + $0xa8] sm:$0xff] }
   0x8   :  { %v3543_v22 = vld [vmem:[%s6161_s0 + $0xa0] sm:$0xff]  ;;  %v3550_v23 = vld [vmem:[%s6161_s0 + $0xb8] sm:$0xff]  ;;  %v3555_v24 = vld [vmem:[%s6161_s0 + $0xb0] sm:$0xff] }
   0x9   :  { %v3562_v25 = vld [vmem:[%s6161_s0 + $0xc8] sm:$0xff]  ;;  %v3567_v26 = vld [vmem:[%s6161_s0 + $0xc0] sm:$0xff]  ;;  %v3574_v27 = vld [vmem:[%s6161_s0 + $0xd8] sm:$0xff] }
   0xa   :  { %62 = vperm.xlu1 %3249, %v3442_v5   ;;  %59 = vperm.xlu0 %3248, %v3447_v6   ;;  %v3579_v28 = vld [vmem:[%s6161_s0 + $0xd0] sm:$0xff]  ;;  %v3586_v29 = vld [vmem:[%s6161_s0 + $0xe8] sm:$0xff]  ;;  %v3591_v30 = vld [vmem:[%s6161_s0 + $0xe0] sm:$0xff] }
   0xb   :  { %v3598_v31 = vld [vmem:[%s6161_s0 + $0xf8] sm:$0xff]  ;;  %v3603_v32 = vld [vmem:[%s6161_s0 + $0xf0] sm:$0xff] }
   0xe   :  { %68 = vperm.xlu1 %3249, %v3454_v7   ;;  %65 = vperm.xlu0 %3248, %v3459_v8  }
  0x12   :  { %74 = vperm.xlu1 %3249, %v3466_v9   ;;  %71 = vperm.xlu0 %3248, %v3471_v10  }
  0x16   :  { %80 = vperm.xlu1 %3249, %v3478_v11   ;;  %77 = vperm.xlu0 %3248, %v3483_v12  }
  0x1a   :  { %86 = vperm.xlu1 %3249, %v3490_v13   ;;  %83 = vperm.xlu0 %3248, %v3495_v14  }
  0x1e   :  { %92 = vperm.xlu1 %3249, %v3502_v15   ;;  %89 = vperm.xlu0 %3248, %v3507_v16  }
  0x22   :  { %98 = vperm.xlu1 %3249, %v3514_v17   ;;  %95 = vperm.xlu0 %3248, %v3519_v18  }
  0x26   :  { %104 = vperm.xlu1 %3249, %v3526_v19   ;;  %101 = vperm.xlu0 %3248, %v3531_v20  }
  0x2a   :  { %110 = vperm.xlu1 %3249, %v3538_v21   ;;  %107 = vperm.xlu0 %3248, %v3543_v22  }
  0x2e   :  { %116 = vperm.xlu1 %3249, %v3550_v23   ;;  %113 = vperm.xlu0 %3248, %v3555_v24  }
  0x32   :  { %122 = vperm.xlu1 %3249, %v3562_v25   ;;  %119 = vperm.xlu0 %3248, %v3567_v26  }
  0x36   :  { %128 = vperm.xlu1 %3249, %v3574_v27   ;;  %125 = vperm.xlu0 %3248, %v3579_v28  }
  0x3a   :  { %134 = vperm.xlu1 %3249, %v3586_v29   ;;  %131 = vperm.xlu0 %3248, %v3591_v30  }
  0x3e   :  { %140 = vperm.xlu1 %3249, %v3598_v31   ;;  %137 = vperm.xlu0 %3248, %v3603_v32  }
  0x42   :  { %3251 = vset.pattern.permute.xlu1 %v3389_v33  ;;  %3250 = vset.pattern.permute.xlu0 %v3389_v33 }
  0x43   :  { %258 = vperm.xlu1 %3251, %v3435_v4   ;;  %255 = vperm.xlu0 %3250, %v3423_v2  }
  0x47   :  { %261 = vperm.xlu1 %3251, %v3418_v1   ;;  %264 = vperm.xlu0 %3250, %v3430_v3  }
  0x4b   :  { %267 = vperm.xlu1 %3251, %v3447_v6   ;;  %270 = vperm.xlu0 %3250, %v3442_v5  }
  0x4f   :  { %273 = vperm.xlu1 %3251, %v3459_v8   ;;  %276 = vperm.xlu0 %3250, %v3454_v7  }
  0x53   :  { %279 = vperm.xlu1 %3251, %v3471_v10   ;;  %282 = vperm.xlu0 %3250, %v3466_v9  }
  0x57   :  { %285 = vperm.xlu1 %3251, %v3483_v12   ;;  %288 = vperm.xlu0 %3250, %v3478_v11  }
  0x5b   :  { %291 = vperm.xlu1 %3251, %v3495_v14   ;;  %294 = vperm.xlu0 %3250, %v3490_v13  }
  0x5f   :  { %297 = vperm.xlu1 %3251, %v3507_v16   ;;  %300 = vperm.xlu0 %3250, %v3502_v15  }
  0x63   :  { %303 = vperm.xlu1 %3251, %v3519_v18   ;;  %306 = vperm.xlu0 %3250, %v3514_v17  }
  0x67   :  { %309 = vperm.xlu1 %3251, %v3531_v20   ;;  %312 = vperm.xlu0 %3250, %v3526_v19  }
  0x6b   :  { %315 = vperm.xlu1 %3251, %v3543_v22   ;;  %318 = vperm.xlu0 %3250, %v3538_v21  }
  0x6f   :  { %321 = vperm.xlu1 %3251, %v3555_v24   ;;  %324 = vperm.xlu0 %3250, %v3550_v23  }
  0x73   :  { %327 = vperm.xlu1 %3251, %v3567_v26   ;;  %330 = vperm.xlu0 %3250, %v3562_v25  }
  0x77   :  { %333 = vperm.xlu1 %3251, %v3579_v28   ;;  %336 = vperm.xlu0 %3250, %v3574_v27  }
  0x7b   :  { %339 = vperm.xlu1 %3251, %v3591_v30   ;;  %342 = vperm.xlu0 %3250, %v3586_v29  }
  0x7d   :  { %v3637_v34 = vpop.permute.xlu1 %53  ;;  %v3639_v35 = vpop.permute.xlu0 %47 }
  0x7e   :  { %6242 = vst [vmem:[#allocation2_spill] sm:$0xff] %v3637_v34  ;;  %v4260_v34 = vld [vmem:[%s6161_s0 + $0x58] sm:$0xff] }
  0x7f   :  { %345 = vperm.xlu1 %3251, %v3603_v32   ;;  %348 = vperm.xlu0 %3250, %v3598_v31   ;;  %6381 = vst [vmem:[#allocation137_spill] sm:$0xff] %v4260_v34 }
  0x81   :  { %v3643_v36 = vpop.permute.xlu1 %56  ;;  %v3645_v37 = vpop.permute.xlu0 %50 }
  0x82   :  { %6243 = vst [vmem:[#allocation3_spill] sm:$0xff] %v3643_v36 }
  0x83   :  { %3252 = vset.pattern.permute.xlu1 %v3390_v38  ;;  %3253 = vset.pattern.permute.xlu0 %v3390_v38 }
  0x84   :  { %415 = vperm.xlu1 %3252, %v3423_v2   ;;  %418 = vperm.xlu0 %3253, %v3435_v4  }
  0x85   :  { %v3649_v39 = vpop.permute.xlu1 %62  ;;  %v3651_v40 = vpop.permute.xlu0 %59 }
  0x86   :  { %6244 = vst [vmem:[#allocation4_spill] sm:$0xff] %v3649_v39  ;;  %6245 = vst [vmem:[#allocation5_spill] sm:$0xff] %v3651_v40 }
  0x88   :  { %421 = vperm.xlu1 %3252, %v3418_v1   ;;  %427 = vperm.xlu0 %3253, %v3447_v6  }
  0x89   :  { %v3655_v41 = vpop.permute.xlu1 %68  ;;  %v3657_v42 = vpop.permute.xlu0 %65 }
  0x8a   :  { %6246 = vst [vmem:[#allocation6_spill] sm:$0xff] %v3655_v41  ;;  %6247 = vst [vmem:[#allocation7_spill] sm:$0xff] %v3657_v42 }
  0x8c   :  { %424 = vperm.xlu1 %3252, %v3430_v3   ;;  %433 = vperm.xlu0 %3253, %v3459_v8  }
  0x8d   :  { %v3661_v43 = vpop.permute.xlu1 %74  ;;  %v3663_v44 = vpop.permute.xlu0 %71 }
  0x8e   :  { %6248 = vst [vmem:[#allocation8_spill] sm:$0xff] %v3661_v43  ;;  %6249 = vst [vmem:[#allocation9_spill] sm:$0xff] %v3663_v44 }
  0x90   :  { %430 = vperm.xlu1 %3252, %v3442_v5   ;;  %439 = vperm.xlu0 %3253, %v3471_v10  }
  0x91   :  { %v3667_v45 = vpop.permute.xlu1 %80  ;;  %v3669_v46 = vpop.permute.xlu0 %77 }
  0x92   :  { %6250 = vst [vmem:[#allocation10_spill] sm:$0xff] %v3667_v45  ;;  %6251 = vst [vmem:[#allocation11_spill] sm:$0xff] %v3669_v46 }
  0x94   :  { %436 = vperm.xlu1 %3252, %v3454_v7   ;;  %445 = vperm.xlu0 %3253, %v3483_v12  }
  0x95   :  { %v3673_v47 = vpop.permute.xlu1 %86  ;;  %v3675_v48 = vpop.permute.xlu0 %83 }
  0x96   :  { %6252 = vst [vmem:[#allocation12_spill] sm:$0xff] %v3673_v47  ;;  %6253 = vst [vmem:[#allocation13_spill] sm:$0xff] %v3675_v48  ;;  %v3391_v48 = vmov 3  }
  0x98   :  { %442 = vperm.xlu1 %3252, %v3466_v9   ;;  %451 = vperm.xlu0 %3253, %v3495_v14  }
  0x99   :  { %v3679_v49 = vpop.permute.xlu1 %92  ;;  %v3681_v50 = vpop.permute.xlu0 %89 }
  0x9a   :  { %6254 = vst [vmem:[#allocation14_spill] sm:$0xff] %v3679_v49  ;;  %6255 = vst [vmem:[#allocation15_spill] sm:$0xff] %v3681_v50 }
  0x9c   :  { %448 = vperm.xlu1 %3252, %v3478_v11   ;;  %457 = vperm.xlu0 %3253, %v3507_v16  }
  0x9d   :  { %v3685_v51 = vpop.permute.xlu1 %98  ;;  %v3687_v52 = vpop.permute.xlu0 %95 }
  0x9e   :  { %6256 = vst [vmem:[#allocation16_spill] sm:$0xff] %v3685_v51  ;;  %6257 = vst [vmem:[#allocation17_spill] sm:$0xff] %v3687_v52 }
  0xa0   :  { %454 = vperm.xlu1 %3252, %v3490_v13   ;;  %463 = vperm.xlu0 %3253, %v3519_v18  }
  0xa1   :  { %v3691_v53 = vpop.permute.xlu1 %104  ;;  %v3693_v54 = vpop.permute.xlu0 %101 }
  0xa2   :  { %6258 = vst [vmem:[#allocation18_spill] sm:$0xff] %v3691_v53  ;;  %6259 = vst [vmem:[#allocation19_spill] sm:$0xff] %v3693_v54  ;;  %v4227_v53 = vld [vmem:[%s6161_s0 + $0xc0] sm:$0xff] }
  0xa4   :  { %460 = vperm.xlu1 %3252, %v3502_v15   ;;  %469 = vperm.xlu0 %3253, %v3531_v20  }
  0xa5   :  { %v3697_v55 = vpop.permute.xlu1 %110  ;;  %v3699_v56 = vpop.permute.xlu0 %107 }
  0xa6   :  { %6260 = vst [vmem:[#allocation20_spill] sm:$0xff] %v3697_v55  ;;  %6261 = vst [vmem:[#allocation21_spill] sm:$0xff] %v3699_v56 }
  0xa8   :  { %466 = vperm.xlu1 %3252, %v3514_v17   ;;  %475 = vperm.xlu0 %3253, %v3543_v22  }
  0xa9   :  { %v3703_v57 = vpop.permute.xlu1 %116  ;;  %v3705_v58 = vpop.permute.xlu0 %113 }
  0xaa   :  { %6262 = vst [vmem:[#allocation22_spill] sm:$0xff] %v3703_v57  ;;  %6263 = vst [vmem:[#allocation23_spill] sm:$0xff] %v3705_v58 }
  0xac   :  { %472 = vperm.xlu1 %3252, %v3526_v19   ;;  %481 = vperm.xlu0 %3253, %v3555_v24  }
  0xad   :  { %v3709_v59 = vpop.permute.xlu1 %122  ;;  %v3711_v60 = vpop.permute.xlu0 %119 }
  0xae   :  { %6264 = vst [vmem:[#allocation24_spill] sm:$0xff] %v3709_v59  ;;  %6265 = vst [vmem:[#allocation25_spill] sm:$0xff] %v3711_v60 }
  0xb0   :  { %478 = vperm.xlu1 %3252, %v3538_v21   ;;  %487 = vperm.xlu0 %3253, %v3567_v26  }
  0xb1   :  { %v3715_v61 = vpop.permute.xlu1 %128  ;;  %v3717_v62 = vpop.permute.xlu0 %125 }
  0xb2   :  { %6266 = vst [vmem:[#allocation26_spill] sm:$0xff] %v3715_v61  ;;  %6267 = vst [vmem:[#allocation27_spill] sm:$0xff] %v3717_v62 }
  0xb4   :  { %484 = vperm.xlu1 %3252, %v3550_v23   ;;  %493 = vperm.xlu0 %3253, %v3579_v28  }
  0xb5   :  { %v3721_v63 = vpop.permute.xlu1 %134  ;;  %v3723_v33 = vpop.permute.xlu0 %131 }
  0xb6   :  { %6268 = vst [vmem:[#allocation28_spill] sm:$0xff] %v3721_v63  ;;  %6269 = vst [vmem:[#allocation29_spill] sm:$0xff] %v3723_v33 }
  0xb8   :  { %490 = vperm.xlu1 %3252, %v3562_v25   ;;  %499 = vperm.xlu0 %3253, %v3591_v30  }
  0xb9   :  { %v3727_v38 = vpop.permute.xlu1 %140  ;;  %v3729_v0 = vpop.permute.xlu0 %137 }
  0xba   :  { %6270 = vst [vmem:[#allocation30_spill] sm:$0xff] %v3727_v38  ;;  %6271 = vst [vmem:[#allocation31_spill] sm:$0xff] %v3729_v0 }
  0xbc   :  { %496 = vperm.xlu1 %3252, %v3574_v27   ;;  %505 = vperm.xlu0 %3253, %v3603_v32  }
  0xbe   :  { %v3733_v50 = vpop.permute.xlu1 %258  ;;  %v3735_v49 = vpop.permute.xlu0 %255 }
  0xc0   :  { %502 = vperm.xlu1 %3252, %v3586_v29   ;;  %3254 = vset.pattern.permute.xlu0 %v3391_v48 }
  0xc1   :  { %607 = vperm.xlu0 %3254, %v3423_v2  }
  0xc2   :  { %v3739_v47 = vpop.permute.xlu1 %261  ;;  %v3741_v33 = vpop.permute.xlu0 %264 }
  0xc4   :  { %508 = vperm.xlu1 %3252, %v3598_v31  }
  0xc5   :  { %616 = vperm.xlu0 %3254, %v3430_v3  }
  0xc6   :  { %v3745_v0 = vpop.permute.xlu1 %267  ;;  %v3747_v38 = vpop.permute.xlu0 %270 }
  0xc7   :  { %6272 = vst [vmem:[#allocation32_spill] sm:$0xff] %v3745_v0  ;;  %6273 = vst [vmem:[#allocation33_spill] sm:$0xff] %v3747_v38  ;;  %v6184_v0 = vmov 5  }
  0xc8   :  { %3255 = vset.pattern.permute.xlu1 %v3391_v48 }
  0xc9   :  { %610 = vperm.xlu1 %3255, %v3435_v4   ;;  %622 = vperm.xlu0 %3254, %v3442_v5  }
  0xca   :  { %v3751_v63 = vpop.permute.xlu1 %273  ;;  %v3753_v46 = vpop.permute.xlu0 %276 }
  0xcb   :  { %6274 = vst [vmem:[#allocation34_spill] sm:$0xff] %v3751_v63  ;;  %6275 = vst [vmem:[#allocation35_spill] sm:$0xff] %v3753_v46 }
  0xcd   :  { %613 = vperm.xlu1 %3255, %v3418_v1   ;;  %628 = vperm.xlu0 %3254, %v3454_v7  }
  0xce   :  { %v3757_v45 = vpop.permute.xlu1 %279  ;;  %v3759_v62 = vpop.permute.xlu0 %282 }
  0xcf   :  { %6276 = vst [vmem:[#allocation36_spill] sm:$0xff] %v3757_v45  ;;  %6277 = vst [vmem:[#allocation37_spill] sm:$0xff] %v3759_v62 }
  0xd1   :  { %619 = vperm.xlu1 %3255, %v3447_v6   ;;  %634 = vperm.xlu0 %3254, %v3466_v9  }
  0xd2   :  { %v3763_v48 = vpop.permute.xlu1 %285  ;;  %v3765_v61 = vpop.permute.xlu0 %288 }
  0xd3   :  { %6278 = vst [vmem:[#allocation38_spill] sm:$0xff] %v3763_v48  ;;  %6279 = vst [vmem:[#allocation39_spill] sm:$0xff] %v3765_v61 }
  0xd5   :  { %625 = vperm.xlu1 %3255, %v3459_v8   ;;  %640 = vperm.xlu0 %3254, %v3478_v11  }
  0xd6   :  { %v3769_v44 = vpop.permute.xlu1 %291  ;;  %v3771_v43 = vpop.permute.xlu0 %294 }
  0xd7   :  { %6280 = vst [vmem:[#allocation40_spill] sm:$0xff] %v3769_v44  ;;  %6281 = vst [vmem:[#allocation41_spill] sm:$0xff] %v3771_v43 }
  0xd9   :  { %631 = vperm.xlu1 %3255, %v3471_v10   ;;  %646 = vperm.xlu0 %3254, %v3490_v13  }
  0xda   :  { %v3775_v60 = vpop.permute.xlu1 %297  ;;  %v3777_v59 = vpop.permute.xlu0 %300 }
  0xdb   :  { %6282 = vst [vmem:[#allocation42_spill] sm:$0xff] %v3775_v60  ;;  %6283 = vst [vmem:[#allocation43_spill] sm:$0xff] %v3777_v59 }
  0xdd   :  { %637 = vperm.xlu1 %3255, %v3483_v12   ;;  %652 = vperm.xlu0 %3254, %v3502_v15  }
  0xde   :  { %v3781_v61 = vpop.permute.xlu1 %303  ;;  %v3783_v48 = vpop.permute.xlu0 %306 }
  0xe1   :  { %643 = vperm.xlu1 %3255, %v3495_v14   ;;  %658 = vperm.xlu0 %3254, %v3514_v17  }
  0xe2   :  { %v3787_v44 = vpop.permute.xlu1 %309  ;;  %v3789_v43 = vpop.permute.xlu0 %312 }
  0xe5   :  { %649 = vperm.xlu1 %3255, %v3507_v16   ;;  %664 = vperm.xlu0 %3254, %v3526_v19  }
  0xe6   :  { %v3793_v60 = vpop.permute.xlu1 %315  ;;  %v3795_v59 = vpop.permute.xlu0 %318 }
  0xe7   :  { %6284 = vst [vmem:[#allocation44_spill] sm:$0xff] %v3793_v60  ;;  %6285 = vst [vmem:[#allocation45_spill] sm:$0xff] %v3795_v59  ;;  %v44_v59 = vlaneseq }
  0xe9   :  { %655 = vperm.xlu1 %3255, %v3519_v18   ;;  %670 = vperm.xlu0 %3254, %v3538_v21   ;;  %v4308_v51 = vand.u32 127, %v44_v59 }
  0xea   :  { %v3799_v62 = vpop.permute.xlu1 %321  ;;  %v3801_v45 = vpop.permute.xlu0 %324 }
  0xeb   :  { %6286 = vst [vmem:[#allocation46_spill] sm:$0xff] %v3799_v62  ;;  %6287 = vst [vmem:[#allocation47_spill] sm:$0xff] %v3801_v45  ;;  %vm350_vm0 = vcmp.eq.s32.totalorder %v4308_v51, %v3735_v49  ;;  %vm351_vm6 = vcmp.eq.s32.totalorder %v4308_v51, %v3733_v50 }
  0xed   :  { %661 = vperm.xlu1 %3255, %v3531_v20   ;;  %676 = vperm.xlu0 %3254, %v3550_v23  }
  0xee   :  { %v3805_v42 = vpop.permute.xlu1 %327  ;;  %v3807_v41 = vpop.permute.xlu0 %330 }
  0xef   :  { %6288 = vst [vmem:[#allocation48_spill] sm:$0xff] %v3805_v42  ;;  %6289 = vst [vmem:[#allocation49_spill] sm:$0xff] %v3807_v41 }
  0xf1   :  { %667 = vperm.xlu1 %3255, %v3543_v22   ;;  %682 = vperm.xlu0 %3254, %v3562_v25  }
  0xf2   :  { %v3811_v58 = vpop.permute.xlu1 %333  ;;  %v3813_v57 = vpop.permute.xlu0 %336 }
  0xf3   :  { %6290 = vst [vmem:[#allocation50_spill] sm:$0xff] %v3811_v58  ;;  %6291 = vst [vmem:[#allocation51_spill] sm:$0xff] %v3813_v57 }
  0xf5   :  { %673 = vperm.xlu1 %3255, %v3555_v24   ;;  %688 = vperm.xlu0 %3254, %v3574_v27  }
  0xf6   :  { %v3817_v46 = vpop.permute.xlu1 %339  ;;  %v3819_v63 = vpop.permute.xlu0 %342 }
  0xf7   :  { %6292 = vst [vmem:[#allocation52_spill] sm:$0xff] %v3817_v46  ;;  %6293 = vst [vmem:[#allocation53_spill] sm:$0xff] %v3819_v63  ;;  %v3392_v46 = vmov 4  }
  0xf9   :  { %679 = vperm.xlu1 %3255, %v3567_v26   ;;  %694 = vperm.xlu0 %3254, %v3586_v29  }
  0xfa   :  { %v3823_v42 = vpop.permute.xlu1 %345  ;;  %v3825_v41 = vpop.permute.xlu0 %348 }
  0xfb   :  { %6294 = vst [vmem:[#allocation54_spill] sm:$0xff] %v3823_v42  ;;  %6295 = vst [vmem:[#allocation55_spill] sm:$0xff] %v3825_v41 }
  0xfd   :  { %685 = vperm.xlu1 %3255, %v3579_v28   ;;  %700 = vperm.xlu0 %3254, %v3598_v31  }
  0xff   :  { %v3829_v57 = vpop.permute.xlu1 %415  ;;  %v3831_v58 = vpop.permute.xlu0 %418 }
 0x100   :  { %vm510_vm1 = vcmp.eq.s32.totalorder %v4308_v51, %v3829_v57  ;;  %vm511_vm4 = vcmp.eq.s32.totalorder %v4308_v51, %v3831_v58 }
 0x101   :  { %691 = vperm.xlu1 %3255, %v3591_v30   ;;  %3257 = vset.pattern.permute.xlu0 %v3392_v46 }
 0x102   :  { %802 = vperm.xlu0 %3257, %v3435_v4  }
 0x103   :  { %v3835_v63 = vpop.permute.xlu1 %421  ;;  %v3837_v62 = vpop.permute.xlu0 %427 }
 0x104   :  { %6296 = vst [vmem:[#allocation56_spill] sm:$0xff] %v3837_v62 }
 0x105   :  { %697 = vperm.xlu1 %3255, %v3603_v32  }
 0x106   :  { %811 = vperm.xlu0 %3257, %v3447_v6  }
 0x107   :  { %v3841_v41 = vpop.permute.xlu1 %424  ;;  %v3843_v42 = vpop.permute.xlu0 %433 }
 0x108   :  { %6297 = vst [vmem:[#allocation57_spill] sm:$0xff] %v3843_v42 }
 0x109   :  { %3256 = vset.pattern.permute.xlu1 %v3392_v46 }
 0x10a   :  { %799 = vperm.xlu1 %3256, %v3423_v2   ;;  %817 = vperm.xlu0 %3257, %v3459_v8  }
 0x10b   :  { %v3847_v40 = vpop.permute.xlu1 %430  ;;  %v3849_v39 = vpop.permute.xlu0 %439 }
 0x10c   :  { %6298 = vst [vmem:[#allocation58_spill] sm:$0xff] %v3847_v40  ;;  %6299 = vst [vmem:[#allocation59_spill] sm:$0xff] %v3849_v39 }
 0x10e   :  { %805 = vperm.xlu1 %3256, %v3418_v1   ;;  %823 = vperm.xlu0 %3257, %v3471_v10  }
 0x10f   :  { %v3853_v45 = vpop.permute.xlu1 %436  ;;  %v3855_v56 = vpop.permute.xlu0 %445 }
 0x110   :  { %6300 = vst [vmem:[#allocation60_spill] sm:$0xff] %v3853_v45  ;;  %6301 = vst [vmem:[#allocation61_spill] sm:$0xff] %v3855_v56 }
 0x112   :  { %808 = vperm.xlu1 %3256, %v3430_v3   ;;  %829 = vperm.xlu0 %3257, %v3483_v12  }
 0x113   :  { %v3859_v46 = vpop.permute.xlu1 %442  ;;  %v3861_v42 = vpop.permute.xlu0 %451 }
 0x114   :  { %6302 = vst [vmem:[#allocation62_spill] sm:$0xff] %v3859_v46  ;;  %6303 = vst [vmem:[#allocation63_spill] sm:$0xff] %v3861_v42 }
 0x116   :  { %814 = vperm.xlu1 %3256, %v3442_v5   ;;  %835 = vperm.xlu0 %3257, %v3495_v14  }
 0x117   :  { %v3865_v39 = vpop.permute.xlu1 %448  ;;  %v3867_v55 = vpop.permute.xlu0 %457 }
 0x118   :  { %6304 = vst [vmem:[#allocation64_spill] sm:$0xff] %v3865_v39  ;;  %6305 = vst [vmem:[#allocation65_spill] sm:$0xff] %v3867_v55 }
 0x11a   :  { %820 = vperm.xlu1 %3256, %v3454_v7   ;;  %841 = vperm.xlu0 %3257, %v3507_v16  }
 0x11b   :  { %v3871_v56 = vpop.permute.xlu1 %454  ;;  %v3873_v45 = vpop.permute.xlu0 %463 }
 0x11c   :  { %6306 = vst [vmem:[#allocation66_spill] sm:$0xff] %v3871_v56 }
 0x11e   :  { %826 = vperm.xlu1 %3256, %v3466_v9   ;;  %847 = vperm.xlu0 %3257, %v3519_v18  }
 0x11f   :  { %v3877_v42 = vpop.permute.xlu1 %460  ;;  %v3879_v46 = vpop.permute.xlu0 %469 }
 0x120   :  { %6307 = vst [vmem:[#allocation67_spill] sm:$0xff] %v3877_v42 }
 0x122   :  { %832 = vperm.xlu1 %3256, %v3478_v11   ;;  %853 = vperm.xlu0 %3257, %v3531_v20  }
 0x123   :  { %v3883_v14 = vpop.permute.xlu1 %466  ;;  %v3885_v55 = vpop.permute.xlu0 %475 }
 0x124   :  { %6308 = vst [vmem:[#allocation68_spill] sm:$0xff] %v3885_v55 }
 0x126   :  { %838 = vperm.xlu1 %3256, %v3490_v13   ;;  %859 = vperm.xlu0 %3257, %v3543_v22  }
 0x127   :  { %v3889_v16 = vpop.permute.xlu1 %472  ;;  %v3891_v56 = vpop.permute.xlu0 %481 }
 0x128   :  { %6309 = vst [vmem:[#allocation69_spill] sm:$0xff] %v3891_v56 }
 0x12a   :  { %844 = vperm.xlu1 %3256, %v3502_v15   ;;  %865 = vperm.xlu0 %3257, %v3555_v24  }
 0x12b   :  { %v3895_v42 = vpop.permute.xlu1 %478  ;;  %v3897_v39 = vpop.permute.xlu0 %487 }
 0x12c   :  { %6310 = vst [vmem:[#allocation70_spill] sm:$0xff] %v3895_v42  ;;  %6311 = vst [vmem:[#allocation71_spill] sm:$0xff] %v3897_v39 }
 0x12e   :  { %850 = vperm.xlu1 %3256, %v3514_v17   ;;  %871 = vperm.xlu0 %3257, %v3567_v26  }
 0x12f   :  { %v3901_v40 = vpop.permute.xlu1 %484  ;;  %v3903_v13 = vpop.permute.xlu0 %493 }
 0x130   :  { %6312 = vst [vmem:[#allocation72_spill] sm:$0xff] %v3901_v40  ;;  %6313 = vst [vmem:[#allocation73_spill] sm:$0xff] %v3903_v13 }
 0x132   :  { %856 = vperm.xlu1 %3256, %v3526_v19   ;;  %877 = vperm.xlu0 %3257, %v3579_v28  }
 0x133   :  { %v3907_v56 = vpop.permute.xlu1 %490  ;;  %v3909_v15 = vpop.permute.xlu0 %499 }
 0x134   :  { %6314 = vst [vmem:[#allocation74_spill] sm:$0xff] %v3907_v56  ;;  %6315 = vst [vmem:[#allocation75_spill] sm:$0xff] %v3909_v15  ;;  %v6182_v56 = vmov 7  }
 0x136   :  { %862 = vperm.xlu1 %3256, %v3538_v21   ;;  %883 = vperm.xlu0 %3257, %v3591_v30  }
 0x137   :  { %v3913_v39 = vpop.permute.xlu1 %496  ;;  %v3915_v62 = vpop.permute.xlu0 %505 }
 0x138   :  { %6316 = vst [vmem:[#allocation76_spill] sm:$0xff] %v3913_v39  ;;  %6317 = vst [vmem:[#allocation77_spill] sm:$0xff] %v3915_v62 }
 0x13a   :  { %868 = vperm.xlu1 %3256, %v3550_v23   ;;  %889 = vperm.xlu0 %3257, %v3603_v32  }
 0x13b   :  { %v3919_v13 = vpop.permute.xlu1 %502 }
 0x13c   :  { %6318 = vst [vmem:[#allocation78_spill] sm:$0xff] %v3919_v13  ;;  %v3921_v40 = vpop.permute.xlu0 %607 }
 0x13d   :  { %vm702_vm2 = vcmp.eq.s32.totalorder %v4308_v51, %v3921_v40 }
 0x13e   :  { %874 = vperm.xlu1 %3256, %v3562_v25   ;;  %3260 = vset.pattern.permute.xlu0 %v6182_v56 }
 0x13f   :  { %v3925_v15 = vpop.permute.xlu1 %508  ;;  %1423 = vperm.xlu0 %3260, %v3519_v18  }
 0x140   :  { %6319 = vst [vmem:[#allocation79_spill] sm:$0xff] %v3925_v15  ;;  %v3928_v39 = vpop.permute.xlu0 %616 }
 0x142   :  { %880 = vperm.xlu1 %3256, %v3574_v27  }
 0x143   :  { %1378 = vperm.xlu0 %3260, %v3435_v4  }
 0x144   :  { %v3932_v32 = vpop.permute.xlu1 %610  ;;  %v3934_v62 = vpop.permute.xlu0 %622 }
 0x145   :  { %6320 = vst [vmem:[#allocation80_spill] sm:$0xff] %v3934_v62  ;;  %vm703_vm7 = vcmp.eq.s32.totalorder %v4308_v51, %v3932_v32 }
 0x146   :  { %886 = vperm.xlu1 %3256, %v3586_v29  }
 0x147   :  { %1432 = vperm.xlu0 %3260, %v3526_v19  }
 0x148   :  { %v3938_v13 = vpop.permute.xlu1 %613  ;;  %v3940_v56 = vpop.permute.xlu0 %628 }
 0x149   :  { %6321 = vst [vmem:[#allocation81_spill] sm:$0xff] %v3940_v56 }
 0x14a   :  { %892 = vperm.xlu1 %3256, %v3598_v31  }
 0x14b   :  { %1438 = vperm.xlu0 %3260, %v3538_v21  }
 0x14c   :  { %v3944_v15 = vpop.permute.xlu1 %619  ;;  %v3946_v38 = vpop.permute.xlu0 %634 }
 0x14d   :  { %6322 = vst [vmem:[#allocation82_spill] sm:$0xff] %v3944_v15  ;;  %6323 = vst [vmem:[#allocation83_spill] sm:$0xff] %v3946_v38  ;;  %v6186_v38 = vmov 8  }
 0x14e   :  { %3258 = vset.pattern.permute.xlu1 %v6184_v0 }
 0x14f   :  { %994 = vperm.xlu1 %3258, %v3435_v4   ;;  %1444 = vperm.xlu0 %3260, %v3550_v23  }
 0x150   :  { %v3951_v62 = vpop.permute.xlu1 %625  ;;  %v3953_v54 = vpop.permute.xlu0 %640 }
 0x151   :  { %6324 = vst [vmem:[#allocation84_spill] sm:$0xff] %v3951_v62  ;;  %6325 = vst [vmem:[#allocation85_spill] sm:$0xff] %v3953_v54 }
 0x153   :  { %997 = vperm.xlu1 %3258, %v3418_v1   ;;  %1450 = vperm.xlu0 %3260, %v3562_v25  }
 0x154   :  { %v3957_v56 = vpop.permute.xlu1 %631  ;;  %v3959_v15 = vpop.permute.xlu0 %646 }
 0x155   :  { %6326 = vst [vmem:[#allocation86_spill] sm:$0xff] %v3957_v56  ;;  %6327 = vst [vmem:[#allocation87_spill] sm:$0xff] %v3959_v15  ;;  %v3306_v56 = vld [vmem:[%s6162_s1 + $0x38] sm:$0xff]  }
 0x157   :  { %1003 = vperm.xlu1 %3258, %v3447_v6   ;;  %3282 = vset.pattern.permute.xlu0 %v6186_v38 }
 0x158   :  { %v3963_v0 = vpop.permute.xlu1 %637  ;;  %1618 = vperm.xlu0 %3282, %v3514_v17   ;;  %v3966_v62 = vpop.permute.xlu0 %652 }
 0x159   :  { %6328 = vst [vmem:[#allocation88_spill] sm:$0xff] %v3963_v0  ;;  %6329 = vst [vmem:[#allocation89_spill] sm:$0xff] %v3966_v62 }
 0x15b   :  { %1009 = vperm.xlu1 %3258, %v3459_v8  }
 0x15c   :  { %v3969_v1 = vpop.permute.xlu1 %643  ;;  %1567 = vperm.xlu0 %3282, %v3423_v2   ;;  %v3972_v54 = vpop.permute.xlu0 %658 }
 0x15d   :  { %6330 = vst [vmem:[#allocation90_spill] sm:$0xff] %v3969_v1 }
 0x15f   :  { %1015 = vperm.xlu1 %3258, %v3471_v10  }
 0x160   :  { %v3975_v6 = vpop.permute.xlu1 %649  ;;  %1621 = vperm.xlu0 %3282, %v3531_v20   ;;  %v3978_v38 = vpop.permute.xlu0 %664 }
 0x161   :  { %6331 = vst [vmem:[#allocation91_spill] sm:$0xff] %v3975_v6  ;;  %v6189_v6 = vmov 6  }
 0x163   :  { %1021 = vperm.xlu1 %3258, %v3483_v12  }
 0x164   :  { %v3981_v15 = vpop.permute.xlu1 %655  ;;  %1627 = vperm.xlu0 %3282, %v3543_v22   ;;  %v3984_v8 = vpop.permute.xlu0 %670 }
 0x165   :  { %6332 = vst [vmem:[#allocation92_spill] sm:$0xff] %v3984_v8  ;;  %v4270_v8 = vld [vmem:[%s6161_s0 + $0xe0] sm:$0xff] }
 0x166   :  { %6383 = vst [vmem:[#allocation139_spill] sm:$0xff] %v4270_v8 }
 0x167   :  { %1039 = vperm.xlu1 %3258, %v3519_v18  }
 0x168   :  { %v3987_v62 = vpop.permute.xlu1 %661  ;;  %1633 = vperm.xlu0 %3282, %v3555_v24   ;;  %v3990_v10 = vpop.permute.xlu0 %676 }
 0x169   :  { %6333 = vst [vmem:[#allocation93_spill] sm:$0xff] %v3990_v10  ;;  %v3364_v10 = vld [vmem:[%s6161_s0 + $0xb0] sm:$0xff] }
 0x16b   :  { %3259 = vset.pattern.permute.xlu1 %v6189_v6  ;;  %v3305_v6 = vld [vmem:[%s6162_s1 + $0x78] sm:$0xff]  }
 0x16c   :  { %1231 = vperm.xlu1 %3259, %v3519_v18   ;;  %v3994_v12 = vpop.permute.xlu1 %667  ;;  %1639 = vperm.xlu0 %3282, %v3567_v26   ;;  %v3997_v22 = vpop.permute.xlu0 %682 }
 0x16d   :  { %6334 = vst [vmem:[#allocation94_spill] sm:$0xff] %v3994_v12  ;;  %6335 = vst [vmem:[#allocation95_spill] sm:$0xff] %v3997_v22  ;;  %2886 = vmatprep.subr.bf16.mxu0 %v3305_v6  ;;  %3222 = vmatprep.subr.bf16.mxu1 %v3305_v6 }
 0x16e   :  { %2887 = vmatpush3.bf16.msra.mxu0 %v3306_v56  ;;  %3230 = vmatpush3.bf16.msra.mxu1 %v3306_v56  ;;  %v3309_v56 = vld [vmem:[%s6162_s1 + $0x68] sm:$0xff]  }
 0x170   :  { %1183 = vperm.xlu1 %3259, %v3423_v2   ;;  %v4000_v1 = vpop.permute.xlu1 %673  ;;  %1645 = vperm.xlu0 %3282, %v3579_v28   ;;  %v4003_v24 = vpop.permute.xlu0 %688  ;;  %v3307_v28 = vld [vmem:[%s6162_s1 + $0x70] sm:$0xff]  }
 0x171   :  { %6336 = vst [vmem:[#allocation96_spill] sm:$0xff] %v4000_v1  ;;  %6337 = vst [vmem:[#allocation97_spill] sm:$0xff] %v4003_v24  ;;  %v6340_v24 = vmov 7   ;;  %2888 = vmatprep.subr.bf16.mxu0 %v3307_v28  ;;  %3223 = vmatprep.subr.bf16.mxu1 %v3307_v28  ;;  %v3311_v28 = vld [vmem:[%s6162_s1 + $0x60] sm:$0xff]   ;;  %v6346_v1 = vmov 8  }
 0x174   :  { %1186 = vperm.xlu1 %3259, %v3435_v4   ;;  %v4009_v0 = vpop.permute.xlu1 %679  ;;  %1651 = vperm.xlu0 %3282, %v3591_v30   ;;  %v4012_v26 = vpop.permute.xlu0 %694 }
 0x175   :  { %6338 = vst [vmem:[#allocation98_spill] sm:$0xff] %v4009_v0  ;;  %6339 = vst [vmem:[#allocation99_spill] sm:$0xff] %v4012_v26  ;;  %v6342_v0 = vmov 5   ;;  %v3308_v26 = vld [vmem:[%s6162_s1 + $0x30] sm:$0xff]  }
 0x176   :  { %2889 = vmatpush3.bf16.msra.mxu0 %v3308_v26  ;;  %3231 = vmatpush3.bf16.msra.mxu1 %v3308_v26 }
 0x177   :  { %2890 = vmatprep.subr.bf16.mxu0 %v3309_v56  ;;  %3224 = vmatprep.subr.bf16.mxu1 %v3309_v56 }
 0x178   :  { %3261 = vset.pattern.permute.xlu1 %v6340_v24  ;;  %v4021_v22 = vpop.permute.xlu1 %685  ;;  %3294 = vset.pattern.permute.xlu0 %v6342_v0  ;;  %v4024_v30 = vpop.permute.xlu0 %700 }
 0x179   :  { %6341 = vst [vmem:[#allocation100_spill] sm:$0xff] %v4021_v22  ;;  %6343 = vst [vmem:[#allocation101_spill] sm:$0xff] %v4024_v30  ;;  %1426 = vperm.xlu1 %3261, %v3514_v17   ;;  %991 = vperm.xlu0 %3294, %v3423_v2   ;;  %v3310_v30 = vld [vmem:[%s6162_s1 + $0x28] sm:$0xff]  }
 0x17a   :  { %2891 = vmatpush3.bf16.msra.mxu0 %v3310_v30  ;;  %3232 = vmatpush3.bf16.msra.mxu1 %v3310_v30  ;;  %v3314_v30 = vld [vmem:[%s6162_s1 + $0x18] sm:$0xff]  }
 0x17b   :  { %2892 = vmatprep.subr.bf16.mxu0 %v3311_v28  ;;  %3225 = vmatprep.subr.bf16.mxu1 %v3311_v28 }
 0x17c   :  { %v4034_v6 = vpop.permute.xlu1 %691 }
 0x17d   :  { %6344 = vst [vmem:[#allocation102_spill] sm:$0xff] %v4034_v6  ;;  %1375 = vperm.xlu1 %3261, %v3423_v2   ;;  %1000 = vperm.xlu0 %3294, %v3430_v3   ;;  %v4041_v22 = vpop.permute.xlu0 %802  ;;  %v3312_v6 = vld [vmem:[%s6162_s1 + $0x20] sm:$0xff]   ;;  %v3313_v3 = vld [vmem:[%s6162_s1 + $0x58] sm:$0xff]  }
 0x17e   :  { %2893 = vmatpush3.bf16.msra.mxu0 %v3312_v6  ;;  %3233 = vmatpush3.bf16.msra.mxu1 %v3312_v6  ;;  %v3316_v6 = vld [vmem:[%s6162_s1 + $0x10] sm:$0xff]   ;;  %vm895_vm8 = vcmp.eq.s32.totalorder %v4308_v51, %v4041_v22 }
 0x17f   :  { %2894 = vmatprep.subr.bf16.mxu0 %v3313_v3  ;;  %3226 = vmatprep.subr.bf16.mxu1 %v3313_v3  ;;  %v3318_v3 = vld [vmem:[%s6162_s1 + $0x8] sm:$0xff]  }
 0x180   :  { %v4046_v26 = vpop.permute.xlu1 %697 }
 0x181   :  { %6345 = vst [vmem:[#allocation103_spill] sm:$0xff] %v4046_v26  ;;  %3262 = vset.pattern.permute.xlu1 %v6346_v1  ;;  %1006 = vperm.xlu0 %3294, %v3442_v5   ;;  %v4053_v2 = vpop.permute.xlu0 %811 }
 0x182   :  { %6347 = vst [vmem:[#allocation104_spill] sm:$0xff] %v4053_v2  ;;  %1615 = vperm.xlu1 %3262, %v3519_v18   ;;  %2895 = vmatpush3.bf16.msra.mxu0 %v3314_v30  ;;  %v3315_v18 = vld [vmem:[%s6162_s1 + $0x50] sm:$0xff]   ;;  %v4217_v2 = vld [vmem:[%s6161_s0 + $0x38] sm:$0xff] }
 0x183   :  { %3234 = vmatpush3.bf16.msra.mxu1 %v3314_v30  ;;  %2896 = vmatprep.subr.bf16.mxu0 %v3315_v18 }
 0x184   :  { %3227 = vmatprep.subr.bf16.mxu1 %v3315_v18  ;;  %v3319_v18 = vld [vmem:[%s6162_s1 + $0x40] sm:$0xff]  }
 0x185   :  { %v4062_v56 = vpop.permute.xlu1 %799  ;;  %1012 = vperm.xlu0 %3294, %v3454_v7   ;;  %v4065_v5 = vpop.permute.xlu0 %817 }
 0x186   :  { %6348 = vst [vmem:[#allocation105_spill] sm:$0xff] %v4065_v5  ;;  %3263 = vset.pattern.permute.xlu1 %v6342_v0  ;;  %2897 = vmatpush3.bf16.msra.mxu0 %v3316_v6  ;;  %v3360_v5 = vld [vmem:[%s6161_s0 + $0x88] sm:$0xff]  ;;  %vm894_vm3 = vcmp.eq.s32.totalorder %v4308_v51, %v4062_v56 }
 0x187   :  { %1045 = vperm.xlu1 %3263, %v3531_v20   ;;  %v3317_v20 = vld [vmem:[%s6162_s1 + $0x48] sm:$0xff]   ;;  %3235 = vmatpush3.bf16.msra.mxu1 %v3316_v6  ;;  %v3320_v6 = vld [vmem:[%s6162_s1] sm:$0xff]  }
 0x188   :  { %2898 = vmatprep.subr.bf16.mxu0 %v3317_v20  ;;  %3228 = vmatprep.subr.bf16.mxu1 %v3317_v20  ;;  %v6353_v20 = vmov 6  }
 0x189   :  { %v4075_v28 = vpop.permute.xlu1 %805  ;;  %1018 = vperm.xlu0 %3294, %v3466_v9   ;;  %v4078_v7 = vpop.permute.xlu0 %823 }
 0x18a   :  { %6349 = vst [vmem:[#allocation106_spill] sm:$0xff] %v4078_v7  ;;  %2899 = vmatpush3.bf16.msra.mxu0 %v3318_v3 }
 0x18b   :  { %1048 = vperm.xlu1 %3263, %v3526_v19   ;;  %3236 = vmatpush3.bf16.msra.mxu1 %v3318_v3 }
 0x18c   :  { %2900 = vmatprep.subr.bf16.mxu0 %v3319_v18  ;;  %3229 = vmatprep.subr.bf16.mxu1 %v3319_v18 }
 0x18d   :  { %v4087_v30 = vpop.permute.xlu1 %808  ;;  %1024 = vperm.xlu0 %3294, %v3478_v11   ;;  %v4090_v9 = vpop.permute.xlu0 %829 }
 0x18e   :  { %6350 = vst [vmem:[#allocation107_spill] sm:$0xff] %v4090_v9  ;;  %2901 = vmatpush3.bf16.msra.mxu0 %v3320_v6 }
 0x18f   :  { %3264 = vset.pattern.permute.xlu1 %v6346_v1  ;;  %3237 = vmatpush3.bf16.msra.mxu1 %v3320_v6  ;;  %v3354_v6 = vld [vmem:[%s6161_s0 + $0x90] sm:$0xff] }
 0x190   :  { %1570 = vperm.xlu1 %3264, %v3435_v4  }
 0x191   :  { %v4100_v26 = vpop.permute.xlu1 %814  ;;  %1042 = vperm.xlu0 %3294, %v3514_v17   ;;  %v4103_v11 = vpop.permute.xlu0 %835  ;;  %v3353_v17 = vld [vmem:[%s6161_s0 + $0x10] sm:$0xff] }
 0x192   :  { %6351 = vst [vmem:[#allocation108_spill] sm:$0xff] %v4100_v26  ;;  %6352 = vst [vmem:[#allocation109_spill] sm:$0xff] %v4103_v11 }
 0x194   :  { %3265 = vset.pattern.permute.xlu1 %v6353_v20 }
 0x195   :  { %1240 = vperm.xlu1 %3265, %v3526_v19   ;;  %v4107_v4 = vpop.permute.xlu1 %820  ;;  %1054 = vperm.xlu0 %3294, %v3538_v21   ;;  %v4110_v9 = vpop.permute.xlu0 %841 }
 0x196   :  { %6354 = vst [vmem:[#allocation110_spill] sm:$0xff] %v4107_v4  ;;  %6355 = vst [vmem:[#allocation111_spill] sm:$0xff] %v4110_v9  ;;  %v3359_v4 = vld [vmem:[%s6161_s0 + $0x70] sm:$0xff] }
 0x199   :  { %1189 = vperm.xlu1 %3265, %v3353_v17   ;;  %v4115_v3 = vpop.permute.xlu1 %826  ;;  %1060 = vperm.xlu0 %3294, %v3550_v23   ;;  %v4118_v18 = vpop.permute.xlu0 %847 }
 0x19a   :  { %6356 = vst [vmem:[#allocation112_spill] sm:$0xff] %v4115_v3 }
 0x19d   :  { %3266 = vset.pattern.permute.xlu1 %v6340_v24  ;;  %v4121_v19 = vpop.permute.xlu1 %832  ;;  %1066 = vperm.xlu0 %3294, %v3562_v25   ;;  %v4124_v21 = vpop.permute.xlu0 %853  ;;  %v3355_v25 = vld [vmem:[%s6161_s0 + $0x18] sm:$0xff] }
 0x19e   :  { %6357 = vst [vmem:[#allocation113_spill] sm:$0xff] %v4121_v19  ;;  %1429 = vperm.xlu1 %3266, %v3354_v6  }
 0x1a1   :  { %v4129_v9 = vpop.permute.xlu1 %838  ;;  %1072 = vperm.xlu0 %3294, %v3574_v27   ;;  %v4132_v23 = vpop.permute.xlu0 %859  ;;  %v3356_v27 = vld [vmem:[%s6161_s0 + $0x60] sm:$0xff] }
 0x1a2   :  { %6358 = vst [vmem:[#allocation114_spill] sm:$0xff] %v4129_v9  ;;  %6359 = vst [vmem:[#allocation115_spill] sm:$0xff] %v4132_v23  ;;  %1381 = vperm.xlu1 %3266, %v3353_v17  }
 0x1a5   :  { %v4134_v11 = vpop.permute.xlu1 %844  ;;  %1078 = vperm.xlu0 %3294, %v3586_v29   ;;  %v4137_v19 = vpop.permute.xlu0 %865  ;;  %v3357_v29 = vld [vmem:[%s6161_s0 + $0x98] sm:$0xff] }
 0x1a6   :  { %6360 = vst [vmem:[#allocation116_spill] sm:$0xff] %v4134_v11  ;;  %6361 = vst [vmem:[#allocation117_spill] sm:$0xff] %v4137_v19  ;;  %1384 = vperm.xlu1 %3266, %v3355_v25  }
 0x1a9   :  { %v4142_v3 = vpop.permute.xlu1 %850  ;;  %1027 = vperm.xlu0 %3294, %v3356_v27   ;;  %v4147_v9 = vpop.permute.xlu0 %871  ;;  %v3358_v27 = vld [vmem:[%s6161_s0 + $0xa0] sm:$0xff] }
 0x1aa   :  { %6362 = vst [vmem:[#allocation118_spill] sm:$0xff] %v4147_v9  ;;  %3267 = vset.pattern.permute.xlu1 %v6346_v1 }
 0x1ab   :  { %1624 = vperm.xlu1 %3267, %v3357_v29  }
 0x1ad   :  { %v4153_v11 = vpop.permute.xlu1 %856  ;;  %1084 = vperm.xlu0 %3294, %v3598_v31   ;;  %v4156_v7 = vpop.permute.xlu0 %877 }
 0x1ae   :  { %6363 = vst [vmem:[#allocation119_spill] sm:$0xff] %v4156_v7 }
 0x1af   :  { %3268 = vset.pattern.permute.xlu1 %v6342_v0 }
 0x1b0   :  { %1051 = vperm.xlu1 %3268, %v3358_v27  }
 0x1b1   :  { %v4162_v9 = vpop.permute.xlu1 %862  ;;  %1033 = vperm.xlu0 %3294, %v3359_v4   ;;  %v4167_v29 = vpop.permute.xlu0 %883 }
 0x1b2   :  { %6364 = vst [vmem:[#allocation120_spill] sm:$0xff] %v4162_v9  ;;  %6365 = vst [vmem:[#allocation121_spill] sm:$0xff] %v4167_v29  ;;  %v3361_v29 = vld [vmem:[%s6161_s0 + $0xa8] sm:$0xff] }
 0x1b4   :  { %3269 = vset.pattern.permute.xlu1 %v6346_v1 }
 0x1b5   :  { %1573 = vperm.xlu1 %3269, %v3353_v17   ;;  %v4170_v31 = vpop.permute.xlu1 %868  ;;  %3298 = vset.pattern.permute.xlu0 %v6353_v20  ;;  %v4173_v7 = vpop.permute.xlu0 %889 }
 0x1b6   :  { %6366 = vst [vmem:[#allocation122_spill] sm:$0xff] %v4170_v31  ;;  %6367 = vst [vmem:[#allocation123_spill] sm:$0xff] %v4173_v7  ;;  %1234 = vperm.xlu0 %3298, %v3360_v5   ;;  %v3362_v5 = vld [vmem:[%s6161_s0 + $0x20] sm:$0xff] }
 0x1b9   :  { %1576 = vperm.xlu1 %3269, %v3355_v25   ;;  %v4178_v19 = vpop.permute.xlu1 %874 }
 0x1ba   :  { %6368 = vst [vmem:[#allocation124_spill] sm:$0xff] %v4178_v19  ;;  %1237 = vperm.xlu0 %3298, %v3354_v6   ;;  %v4180_v4 = vpop.permute.xlu0 %1423 }
 0x1bd   :  { %3270 = vset.pattern.permute.xlu1 %v6353_v20  ;;  %v4183_v17 = vpop.permute.xlu1 %880 }
 0x1be   :  { %6369 = vst [vmem:[#allocation125_spill] sm:$0xff] %v4183_v17  ;;  %1246 = vperm.xlu1 %3270, %v3361_v29   ;;  %1192 = vperm.xlu0 %3298, %v3355_v25   ;;  %v4188_v7 = vpop.permute.xlu0 %1378  ;;  %v3363_v25 = vld [vmem:[%s6161_s0 + $0x28] sm:$0xff] }
 0x1bf   :  { %vm1471_vm13 = vcmp.eq.s32.totalorder %v4308_v51, %v4188_v7 }
 0x1c1   :  { %v4190_v31 = vpop.permute.xlu1 %886 }
 0x1c2   :  { %6370 = vst [vmem:[#allocation126_spill] sm:$0xff] %v4190_v31  ;;  %1195 = vperm.xlu1 %3270, %v3362_v5   ;;  %1243 = vperm.xlu0 %3298, %v3358_v27   ;;  %v4195_v6 = vpop.permute.xlu0 %1432 }
 0x1c5   :  { %v4197_v19 = vpop.permute.xlu1 %892 }
 0x1c6   :  { %6371 = vst [vmem:[#allocation127_spill] sm:$0xff] %v4197_v19  ;;  %3271 = vset.pattern.permute.xlu1 %v6340_v24  ;;  %1198 = vperm.xlu0 %3298, %v3363_v25   ;;  %v4203_v17 = vpop.permute.xlu0 %1438 }
 0x1c7   :  { %6372 = vst [vmem:[#allocation128_spill] sm:$0xff] %v4203_v17  ;;  %1435 = vperm.xlu1 %3271, %v3358_v27  }
 0x1ca   :  { %v4205_v31 = vpop.permute.xlu1 %994  ;;  %1249 = vperm.xlu0 %3298, %v3364_v10   ;;  %v4210_v26 = vpop.permute.xlu0 %1444 }
 0x1cb   :  { %6373 = vst [vmem:[#allocation129_spill] sm:$0xff] %v4210_v26  ;;  %1387 = vperm.xlu1 %3271, %v3362_v5   ;;  %vm1087_vm9 = vcmp.eq.s32.totalorder %v4308_v51, %v4205_v31 }
 0x1ce   :  { %v4212_v19 = vpop.permute.xlu1 %997  ;;  %1204 = vperm.xlu0 %3298, %v4217_v2   ;;  %v4220_v27 = vpop.permute.xlu0 %1450 }
 0x1cf   :  { %6374 = vst [vmem:[#allocation130_spill] sm:$0xff] %v4220_v27  ;;  %1390 = vperm.xlu1 %3271, %v3363_v25   ;;  %v4238_v27 = vld [vmem:[%s6161_s0 + $0x48] sm:$0xff] }
 0x1d2   :  { %v4222_v17 = vpop.permute.xlu1 %1003  ;;  %1255 = vperm.xlu0 %3298, %v4227_v53  }
 0x1d3   :  { %6375 = vst [vmem:[#allocation131_spill] sm:$0xff] %v4222_v17  ;;  %3272 = vset.pattern.permute.xlu1 %v6346_v1  ;;  %v4231_v26 = vpop.permute.xlu0 %1618 }
 0x1d4   :  { %6376 = vst [vmem:[#allocation132_spill] sm:$0xff] %v4231_v26  ;;  %1630 = vperm.xlu1 %3272, %v3361_v29   ;;  %v4249_v29 = vld [vmem:[%s6161_s0 + $0xd0] sm:$0xff] }
 0x1d6   :  { %v4233_v9 = vpop.permute.xlu1 %1009  ;;  %1210 = vperm.xlu0 %3298, %v4238_v27  }
 0x1d7   :  { %6377 = vst [vmem:[#allocation133_spill] sm:$0xff] %v4233_v9  ;;  %v4241_v17 = vpop.permute.xlu0 %1567 }
 0x1d8   :  { %3273 = vset.pattern.permute.xlu1 %v6342_v0  ;;  %vm1662_vm14 = vcmp.eq.s32.totalorder %v4308_v51, %v4241_v17 }
 0x1d9   :  { %1057 = vperm.xlu1 %3273, %v3364_v10  }
 0x1da   :  { %v4244_v36 = vpop.permute.xlu1 %1015  ;;  %1261 = vperm.xlu0 %3298, %v4249_v29  }
 0x1db   :  { %6378 = vst [vmem:[#allocation134_spill] sm:$0xff] %v4244_v36  ;;  %v4252_v9 = vpop.permute.xlu0 %1621 }
 0x1dc   :  { %6379 = vst [vmem:[#allocation135_spill] sm:$0xff] %v4252_v9 }
 0x1dd   :  { %3274 = vset.pattern.permute.xlu1 %v6346_v1 }
 0x1de   :  { %1579 = vperm.xlu1 %3274, %v3362_v5   ;;  %v4255_v23 = vpop.permute.xlu1 %1021  ;;  %1216 = vperm.xlu0 %3298, %v4260_v34  }
 0x1df   :  { %6380 = vst [vmem:[#allocation136_spill] sm:$0xff] %v4255_v23  ;;  %v4263_v36 = vpop.permute.xlu0 %1627  ;;  %v4279_v23 = vld [vmem:[%s6161_s0 + $0x68] sm:$0xff] }
 0x1e0   :  { %6382 = vst [vmem:[#allocation138_spill] sm:$0xff] %v4263_v36  ;;  %6385 = vst [vmem:[#allocation141_spill] sm:$0xff] %v4279_v23 }
 0x1e2   :  { %1582 = vperm.xlu1 %3274, %v3363_v25   ;;  %v4265_v12 = vpop.permute.xlu1 %1039  ;;  %1267 = vperm.xlu0 %3298, %v4270_v8   ;;  %v3372_v25 = vld [vmem:[%s6161_s0 + $0xb8] sm:$0xff]  ;;  %v4295_v8 = vld [vmem:[%s6161_s0 + $0x30] sm:$0xff] }
 0x1e3   :  { %v4273_v5 = vpop.permute.xlu0 %1633 }
 0x1e4   :  { %6384 = vst [vmem:[#allocation140_spill] sm:$0xff] %v4273_v5  ;;  %v3373_v5 = vld [vmem:[%s6161_s0 + $0xf0] sm:$0xff] }
 0x1e6   :  { %3275 = vset.pattern.permute.xlu1 %v6353_v20  ;;  %1222 = vperm.xlu0 %3298, %v4279_v23  }
 0x1e7   :  { %1252 = vperm.xlu1 %3275, %v3372_v25   ;;  %v4285_v34 = vpop.permute.xlu1 %1231  ;;  %v4287_v36 = vpop.permute.xlu0 %1639 }
 0x1e8   :  { %6386 = vst [vmem:[#allocation142_spill] sm:$0xff] %v4287_v36  ;;  %v3375_v36 = vld [vmem:[%s6161_s0 + $0x78] sm:$0xff] }
 0x1ea   :  { %1273 = vperm.xlu0 %3298, %v3373_v5  }
 0x1eb   :  { %1201 = vperm.xlu1 %3275, %v4295_v8   ;;  %v4298_v23 = vpop.permute.xlu1 %1183  ;;  %v4300_v42 = vpop.permute.xlu0 %1645 }
 0x1ec   :  { %6387 = vst [vmem:[#allocation143_spill] sm:$0xff] %v4300_v42  ;;  %v4314_v42 = vld [vmem:[%s6161_s0 + $0xd8] sm:$0xff]  ;;  %vm1278_vm10 = vcmp.eq.s32.totalorder %v4308_v51, %v4298_v23 }
 0x1ed   :  { %6389 = vst [vmem:[#allocation145_spill] sm:$0xff] %v4314_v42 }
 0x1ee   :  { %1228 = vperm.xlu0 %3298, %v3375_v36  }
 0x1ef   :  { %3276 = vset.pattern.permute.xlu1 %v6340_v24  ;;  %v1187_v60 = vpop.permute.xlu1 %1186  ;;  %v4306_v52 = vpop.permute.xlu0 %1651 }
 0x1f0   :  { %6388 = vst [vmem:[#allocation144_spill] sm:$0xff] %v4306_v52  ;;  %1441 = vperm.xlu1 %3276, %v3364_v10   ;;  %v6391_v52 = vmov 0   ;;  %vm1279_vm11 = vcmp.eq.s32.totalorder %v4308_v51, %v1187_v60 }
 0x1f1   :  { %v382_v9 = vsel %vm350_vm0, 1, %v6391_v52  ;;  %v542_v55 = vsel %vm510_vm1, 1, %v6391_v52  ;;  %v734_v40 = vsel %vm702_vm2, 1, %v6391_v52  ;;  %v926_v26 = vsel %vm894_vm3, 1, %v6391_v52 }
 0x1f2   :  { %3301 = vset.pattern.permute.xlu0 %v6340_v24  ;;  %v543_v58 = vsel %vm511_vm4, 1, %v6391_v52  ;;  %v383_v50 = vsel %vm351_vm6, 1, %v6391_v52  ;;  %v927_v22 = vsel %vm895_vm8, 1, %v6391_v52  ;;  %v1119_v31 = vsel %vm1087_vm9, 1, %v6391_v52 }
 0x1f3   :  { %1456 = vperm.xlu0 %3301, %v4314_v42   ;;  %v4331_v42 = vld [vmem:[%s6161_s0 + $0xe8] sm:$0xff]  ;;  %v575_v32 = vadd.s32 %v543_v58, %v383_v50  ;;  %v1310_v23 = vsel %vm1278_vm10, 1, %v6391_v52  ;;  %vm142_vm0 = vcmp.eq.s32.totalorder %v4308_v51, %v3639_v35  ;;  %vm143_vm1 = vcmp.eq.s32.totalorder %v4308_v51, %v3645_v37 }
 0x1f4   :  { %1393 = vperm.xlu1 %3276, %v4295_v8   ;;  %v4322_v10 = vpop.permute.xlu1 %1426  ;;  %v992_v59 = vpop.permute.xlu0 %991  ;;  %6392 = vst [vmem:[#allocation147_spill] sm:$0xff] %v4331_v42  ;;  %vm4416_vm2 = vmpackc.low %vm143_vm1, %vm142_vm0  ;;  %v6240_v37 = vmov 1.0|1.0   ;;  %vm352_vm3 = vcmp.eq.s32.totalorder %v4308_v51, %v3739_v47  ;;  %vm353_vm4 = vcmp.eq.s32.totalorder %v4308_v51, %v3741_v33  ;;  %vm366_vm6 = vcmp.eq.s32.totalorder %v4308_v51, %v3781_v61 }
 0x1f5   :  { %6390 = vst [vmem:[#allocation146_spill] sm:$0xff] %v4322_v10  ;;  %v574_v10 = vadd.s32 %v542_v55, %v382_v9  ;;  %vm1086_vm5 = vcmp.eq.s32.totalorder %v4308_v51, %v992_v59  ;;  %vm526_vm8 = vcmp.eq.s32.totalorder %v4308_v51, %v3873_v45  ;;  %v384_v47 = vsel %vm352_vm3, 1, %v6391_v52 }
 0x1f6   :  { %v1118_v9 = vsel %vm1086_vm5, 1, %v6391_v52  ;;  %vm512_vm5 = vcmp.eq.s32.totalorder %v4308_v51, %v3835_v63  ;;  %vm367_vm9 = vcmp.eq.s32.totalorder %v4308_v51, %v3783_v48  ;;  %vm368_vm10 = vcmp.eq.s32.totalorder %v4308_v51, %v3787_v44 }
 0x1f7   :  { %1462 = vperm.xlu0 %3301, %v4331_v42   ;;  %v3378_v42 = vld [vmem:[%s6161_s0 + $0xf8] sm:$0xff]  ;;  %v766_v56 = vadd.s32 %v734_v40, %v574_v10  ;;  %v735_v10 = vsel %vm703_vm7, 1, %v6391_v52  ;;  %vm513_vm7 = vcmp.eq.s32.totalorder %v4308_v51, %v3841_v41  ;;  %v385_v63 = vsel %vm353_vm4, 1, %v6391_v52 }
 0x1f8   :  { %1396 = vperm.xlu1 %3276, %v4217_v2   ;;  %v1376_v49 = vpop.permute.xlu1 %1375  ;;  %v4337_v57 = vpop.permute.xlu0 %1000  ;;  %v544_v41 = vsel %vm512_vm5, 1, %v6391_v52  ;;  %v398_v61 = vsel %vm366_vm6, 1, %v6391_v52  ;;  %v545_v44 = vsel %vm513_vm7, 1, %v6391_v52  ;;  %v558_v33 = vsel %vm526_vm8, 1, %v6391_v52 }
 0x1f9   :  { %vm1470_vm12 = vcmp.eq.s32.totalorder %v4308_v51, %v1376_v49  ;;  %v400_v48 = vsel %vm368_vm10, 1, %v6391_v52  ;;  %vm704_vm0 = vcmp.eq.s32.totalorder %v4308_v51, %v3938_v13  ;;  %vm719_vm1 = vcmp.eq.s32.totalorder %v4308_v51, %v3972_v54 }
 0x1fa   :  { %v1502_v50 = vsel %vm1470_vm12, 1, %v6391_v52  ;;  %vm528_vm12 = vcmp.eq.s32.totalorder %v4308_v51, %v3879_v46  ;;  %vm721_vm3 = vcmp.eq.s32.totalorder %v4308_v51, %v3978_v38  ;;  %vm718_vm4 = vcmp.eq.s32.totalorder %v4308_v51, %v3981_v15 }
 0x1fb   :  { %1468 = vperm.xlu0 %3301, %v3378_v42   ;;  %v958_v42 = vadd.s32 %v926_v26, %v766_v56  ;;  %v767_v26 = vadd.s32 %v735_v10, %v575_v32  ;;  %vm720_vm5 = vcmp.eq.s32.totalorder %v4308_v51, %v3987_v62  ;;  %vm896_vm6 = vcmp.eq.s32.totalorder %v4308_v51, %v4075_v28 }
 0x1fc   :  { %3277 = vset.pattern.permute.xlu1 %v6346_v1  ;;  %v4352_v55 = vpop.permute.xlu0 %1006  ;;  %vm897_vm7 = vcmp.eq.s32.totalorder %v4308_v51, %v4087_v30  ;;  %vm910_vm8 = vcmp.eq.s32.totalorder %v4308_v51, %v4118_v18  ;;  %v750_v62 = vsel %vm718_vm4, 1, %v6391_v52  ;;  %vm1102_vm10 = vcmp.eq.s32.totalorder %v4308_v51, %v4265_v12 }
 0x1fd   :  { %1636 = vperm.xlu1 %3277, %v3372_v25   ;;  %v4356_v59 = vpop.permute.xlu1 %1615  ;;  %v1150_v25 = vadd.s32 %v1118_v9, %v958_v42  ;;  %v959_v58 = vadd.s32 %v927_v22, %v767_v26  ;;  %v1311_v42 = vsel %vm1279_vm11, 1, %v6391_v52  ;;  %v1694_v22 = vsel %vm1662_vm14, 1, %v6391_v52 }
 0x1fe   :  { %vm369_vm11 = vcmp.eq.s32.totalorder %v4308_v51, %v3789_v43  ;;  %v399_v43 = vsel %vm367_vm9, 1, %v6391_v52  ;;  %vm529_vm14 = vcmp.eq.s32.totalorder %v4308_v51, %v3889_v16  ;;  %vm912_vm9 = vcmp.eq.s32.totalorder %v4308_v51, %v4124_v21 }
 0x1ff   :  { %3303 = vset.pattern.permute.xlu0 %v6346_v1  ;;  %v1342_v9 = vadd.s32 %v1310_v23, %v1150_v25  ;;  %v1151_v60 = vadd.s32 %v1119_v31, %v959_v58  ;;  %v1503_v25 = vsel %vm1471_vm13, 1, %v6391_v52  ;;  %vm527_vm13 = vcmp.eq.s32.totalorder %v4308_v51, %v3883_v14 }
 0x200   :  { %v4367_v40 = vpop.permute.xlu0 %1012  ;;  %1657 = vperm.xlu0 %3303, %v3373_v5   ;;  %v401_v46 = vsel %vm369_vm11, 1, %v6391_v52  ;;  %v577_v14 = vadd.s32 %v545_v44, %v385_v63  ;;  %v561_v16 = vsel %vm529_vm14, 1, %v6391_v52  ;;  %v751_v63 = vsel %vm719_vm1, 1, %v6391_v52 }
 0x201   :  { %3278 = vset.pattern.permute.xlu1 %v6342_v0  ;;  %v1343_v10 = vadd.s32 %v1311_v42, %v1151_v60  ;;  %v1534_v32 = vadd.s32 %v1502_v50, %v1342_v9  ;;  %v4403_v9 = vld [vmem:[%s6161_s0 + $0xc8] sm:$0xff]  ;;  %v593_v15 = vadd.s32 %v561_v16, %v401_v46  ;;  %v752_v44 = vsel %vm720_vm5, 1, %v6391_v52 }
 0x202   :  { %1063 = vperm.xlu1 %3278, %v4227_v53   ;;  %v4374_v56 = vpop.permute.xlu1 %1045  ;;  %vm911_vm11 = vcmp.eq.s32.totalorder %v4308_v51, %v4142_v3  ;;  %vm1088_vm14 = vcmp.eq.s32.totalorder %v4308_v51, %v4212_v19  ;;  %v1134_v3 = vsel %vm1102_vm10, 1, %v6391_v52  ;;  %vm1489_vm1 = vcmp.eq.s32.totalorder %v4308_v51, %v4195_v6 }
 0x203   :  { %v1726_v26 = vadd.s32 %v1694_v22, %v1534_v32  ;;  %v1535_v31 = vadd.s32 %v1503_v25, %v1343_v10  ;;  %v4423_v32 = vld [vmem:[%s6161_s0 + $0x40] sm:$0xff] }
 0x204   :  { %v4378_v5 = vpop.permute.xlu0 %1018  ;;  %1612 = vperm.xlu0 %3303, %v3375_v36  }
 0x205   :  { %v1758_v50 = vcvt.s32.f32 %v1726_v26  ;;  %v576_v26 = vadd.s32 %v544_v41, %v384_v47  ;;  %v736_v47 = vsel %vm704_vm0, 1, %v6391_v52 }
 0x206   :  { %3279 = vset.pattern.permute.xlu1 %v6346_v1  ;;  %v4387_v49 = vpop.permute.xlu1 %1048 }
 0x207   :  { %1585 = vperm.xlu1 %3279, %v4295_v8   ;;  %v768_v28 = vadd.s32 %v736_v47, %v576_v26  ;;  %vm1105_vm0 = vcmp.eq.s32.totalorder %v4308_v51, %v4387_v49 }
 0x208   :  { %v4390_v36 = vpop.permute.xlu0 %1024 }
 0x20b   :  { %1588 = vperm.xlu1 %3279, %v4217_v2   ;;  %v1571_v7 = vpop.permute.xlu1 %1570 }
 0x20c   :  { %vm1663_vm15 = vcmp.eq.s32.totalorder %v4308_v51, %v1571_v7  ;;  %v4396_v17 = vpop.permute.xlu0 %1042 }
 0x20d   :  { %v1695_v23 = vsel %vm1663_vm15, 1, %v6391_v52  ;;  %vm705_vm15 = vcmp.eq.s32.totalorder %v4308_v51, %v3928_v39 }
 0x20e   :  { %v1727_v8 = vadd.s32 %v1695_v23, %v1535_v31  ;;  %v560_v31 = vsel %vm528_vm12, 1, %v6391_v52  ;;  %vm913_vm12 = vcmp.eq.s32.totalorder %v4308_v51, %v4153_v11  ;;  %v943_v11 = vsel %vm911_vm11, 1, %v6391_v52 }
 0x20f   :  { %3280 = vset.pattern.permute.xlu1 %v6353_v20  ;;  %v592_v13 = vadd.s32 %v560_v31, %v400_v48  ;;  %v942_v48 = vsel %vm910_vm8, 1, %v6391_v52  ;;  %vm1089_vm11 = vcmp.eq.s32.totalorder %v4308_v51, %v4337_v57 }
 0x210   :  { %v1759_v58 = vcvt.s32.f32 %v1727_v8  ;;  %1258 = vperm.xlu1 %3280, %v4403_v9   ;;  %v4406_v2 = vpop.permute.xlu1 %1240  ;;  %v4408_v42 = vpop.permute.xlu0 %1054  ;;  %v590_v8 = vadd.s32 %v558_v33, %v398_v61  ;;  %v753_v61 = vsel %vm721_vm3, 1, %v6391_v52  ;;  %v928_v33 = vsel %vm896_vm6, 1, %v6391_v52 }
 0x211   :  { %v785_v46 = vadd.s32 %v753_v61, %v593_v15  ;;  %v960_v31 = vadd.s32 %v928_v33, %v768_v28  ;;  %vm1103_vm3 = vcmp.eq.s32.totalorder %v4308_v51, %v4396_v17  ;;  %vm1297_vm5 = vcmp.eq.s32.totalorder %v4308_v51, %v4406_v2  ;;  %v6396_v61 = vld [vmem:[#allocation68_spill] sm:$0xff] }
 0x212   :  { %v4414_v60 = vpack.c.bf16 %v1759_v58, %v1758_v50  ;;  %v559_v58 = vsel %vm527_vm13, 1, %v6391_v52  ;;  %v737_v50 = vsel %vm705_vm15, 1, %v6391_v52  ;;  %v782_v26 = vadd.s32 %v750_v62, %v590_v8 }
 0x213   :  { %v591_v54 = vadd.s32 %v559_v58, %v399_v43  ;;  %v769_v41 = vadd.s32 %v737_v50, %v577_v14  ;;  %v929_v43 = vsel %vm897_vm7, 1, %v6391_v52  ;;  %v944_v14 = vsel %vm912_vm9, 1, %v6391_v52 }
 0x214   :  { %1207 = vperm.xlu1 %3280, %v4423_v32   ;;  %v4426_v25 = vpop.permute.xlu1 %1189  ;;  %2222 = vmatprep.mubr.bf16.mxu0 %v4414_v60  ;;  %v4429_v35 = vpop.permute.xlu0 %1060  ;;  %vm1294_vm13 = vcmp.eq.s32.totalorder %v4308_v51, %v4285_v34  ;;  %v974_v12 = vadd.s32 %v942_v48, %v782_v26  ;;  %v945_v8 = vsel %vm913_vm12, 1, %v6391_v52  ;;  %vm1486_vm15 = vcmp.eq.s32.totalorder %v4308_v51, %v4180_v4 }
 0x215   :  { %2791 = vmatmul.mubr.msk.bf16.vlgmr.msra.gmra.mxu0 %vm4416_vm2, %v6240_v37  ;;  %v783_v18 = vadd.s32 %v751_v63, %v591_v54  ;;  %v4532_v58 = vadd.s32 %v929_v43, %v769_v41  ;;  %v1326_v19 = vsel %vm1294_vm13, 1, %v6391_v52  ;;  %v1120_v4 = vsel %vm1088_vm14, 1, %v6391_v52  ;;  %v6398_v43 = vld [vmem:[#allocation146_spill] sm:$0xff] }
 0x216   :  { %v1166_v49 = vadd.s32 %v1134_v3, %v974_v12  ;;  %v977_v54 = vadd.s32 %v945_v8, %v785_v46  ;;  %v1518_v63 = vsel %vm1486_vm15, 1, %v6391_v52  ;;  %v1137_v15 = vsel %vm1105_vm0, 1, %v6391_v52  ;;  %v6401_v3 = vld [vmem:[#allocation44_spill] sm:$0xff] }
 0x217   :  { %v975_v47 = vadd.s32 %v943_v11, %v783_v18  ;;  %vm1678_vm6 = vcmp.eq.s32.totalorder %v4308_v51, %v4356_v59  ;;  %vm1104_vm7 = vcmp.eq.s32.totalorder %v4308_v51, %v4374_v56  ;;  %v1135_v17 = vsel %vm1103_vm3, 1, %v6391_v52  ;;  %v6397_v18 = vld [vmem:[#allocation135_spill] sm:$0xff]  ;;  %v6402_v56 = vld [vmem:[#allocation45_spill] sm:$0xff] }
 0x218   :  { %3281 = vset.pattern.permute.xlu1 %v6340_v24  ;;  %v4435_v22 = vpop.permute.xlu0 %1066  ;;  %v1358_v41 = vadd.s32 %v1326_v19, %v1166_v49  ;;  %vm530_vm8 = vcmp.eq.s32.totalorder %v4308_v51, %v6396_v61  ;;  %v1521_v2 = vsel %vm1489_vm1, 1, %v6391_v52  ;;  %v1152_v62 = vadd.s32 %v1120_v4, %v960_v31  ;;  %v6400_v31 = vld [vmem:[#allocation17_spill] sm:$0xff]  ;;  %v6406_v61 = vld [vmem:[#allocation94_spill] sm:$0xff] }
 0x219   :  { %1447 = vperm.xlu1 %3281, %v4227_v53   ;;  %v4440_v7 = vpop.permute.xlu1 %1429  ;;  %vm1680_vm9 = vcmp.eq.s32.totalorder %v4308_v51, %v6397_v18  ;;  %vm1487_vm10 = vcmp.eq.s32.totalorder %v4308_v51, %v6398_v43  ;;  %v1169_v48 = vadd.s32 %v1137_v15, %v977_v54  ;;  %v1710_v46 = vsel %vm1678_vm6, 1, %v6391_v52 }
 0x21a   :  { %v1167_v26 = vadd.s32 %v1135_v17, %v975_v47  ;;  %vm158_vm14 = vcmp.eq.s32.totalorder %v4308_v51, %v6400_v31  ;;  %vm1280_vm15 = vcmp.eq.s32.totalorder %v4308_v51, %v4426_v25  ;;  %vm370_vm0 = vcmp.eq.s32.totalorder %v4308_v51, %v6401_v3  ;;  %v6410_v3 = vld [vmem:[#allocation115_spill] sm:$0xff] }
 0x21b   :  { %vm371_vm1 = vcmp.eq.s32.totalorder %v4308_v51, %v6402_v56  ;;  %v1712_v11 = vsel %vm1680_vm9, 1, %v6391_v52  ;;  %v1121_v8 = vsel %vm1089_vm11, 1, %v6391_v52  ;;  %v1519_v4 = vsel %vm1487_vm10, 1, %v6391_v52 }
 0x21c   :  { %v4457_v53 = vpop.permute.xlu0 %1072  ;;  %v1312_v57 = vsel %vm1280_vm15, 1, %v6391_v52  ;;  %v402_v31 = vsel %vm370_vm0, 1, %v6391_v52 }
 0x21d   :  { %1399 = vperm.xlu1 %3281, %v4423_v32   ;;  %v4466_v45 = vpop.permute.xlu1 %1381 }
 0x220   :  { %v4483_v23 = vpop.permute.xlu0 %1078 }
 0x221   :  { %1402 = vperm.xlu1 %3281, %v4238_v27   ;;  %v4489_v39 = vpop.permute.xlu1 %1384 }
 0x222   :  { %vm1473_vm9 = vcmp.eq.s32.totalorder %v4308_v51, %v4489_v39 }
 0x224   :  { %v4507_v38 = vpop.permute.xlu0 %1027 }
 0x225   :  { %3283 = vset.pattern.permute.xlu1 %v6346_v1 }
 0x226   :  { %1642 = vperm.xlu1 %3283, %v4403_v9   ;;  %v4517_v30 = vpop.permute.xlu1 %1624  ;;  %v784_v9 = vadd.s32 %v752_v44, %v592_v13  ;;  %v6395_v13 = vld [vmem:[#allocation132_spill] sm:$0xff]  ;;  %v1329_v44 = vsel %vm1297_vm5, 1, %v6391_v52  ;;  %vm1488_vm5 = vcmp.eq.s32.totalorder %v4308_v51, %v4440_v7  ;;  %v1344_v7 = vadd.s32 %v1312_v57, %v1152_v62  ;;  %v6409_v57 = vld [vmem:[#allocation2_spill] sm:$0xff] }
 0x227   :  { %vm1679_vm4 = vcmp.eq.s32.totalorder %v4308_v51, %v6395_v13  ;;  %v1361_v12 = vadd.s32 %v1329_v44, %v1169_v48  ;;  %vm1681_vm3 = vcmp.eq.s32.totalorder %v4308_v51, %v4517_v30  ;;  %v1520_v44 = vsel %vm1488_vm5, 1, %v6391_v52 }
 0x228   :  { %v4527_v21 = vpop.permute.xlu0 %1084  ;;  %v976_v16 = vadd.s32 %v944_v14, %v784_v9  ;;  %v1711_v28 = vsel %vm1679_vm4, 1, %v6391_v52  ;;  %v6399_v9 = vld [vmem:[#allocation16_spill] sm:$0xff]  ;;  %v1550_v14 = vadd.s32 %v1518_v63, %v1358_v41  ;;  %vm1472_vm4 = vcmp.eq.s32.totalorder %v4308_v51, %v4466_v45 }
 0x229   :  { %vm159_vm13 = vcmp.eq.s32.totalorder %v4308_v51, %v6399_v9  ;;  %v1553_v54 = vadd.s32 %v1521_v2, %v1361_v12  ;;  %v1713_v63 = vsel %vm1681_vm3, 1, %v6391_v52  ;;  %v562_v62 = vsel %vm530_vm8, 1, %v6391_v52 }
 0x22a   :  { %3284 = vset.pattern.permute.xlu1 %v6342_v0  ;;  %v1742_v13 = vadd.s32 %v1710_v46, %v1550_v14  ;;  %vm722_vm8 = vcmp.eq.s32.totalorder %v4308_v51, %v6406_v61  ;;  %vm4671_vm3 = vmpackc.low %vm159_vm13, %vm158_vm14  ;;  %v403_v9 = vsel %vm371_vm1, 1, %v6391_v52  ;;  %vm914_vm13 = vcmp.eq.s32.totalorder %v4308_v51, %v6410_v3  ;;  %v6424_v3 = vld [vmem:[#allocation56_spill] sm:$0xff] }
 0x22b   :  { %1069 = vperm.xlu1 %3284, %v4249_v29   ;;  %v4545_v34 = vpop.permute.xlu1 %1051  ;;  %v1745_v43 = vadd.s32 %v1713_v63, %v1553_v54  ;;  %v6411_v63 = vld [vmem:[#allocation3_spill] sm:$0xff] }
 0x22c   :  { %v4552_v50 = vpop.permute.xlu0 %1033  ;;  %v1774_v17 = vcvt.s32.f32 %v1742_v13  ;;  %vm145_vm14 = vcmp.eq.s32.totalorder %v4308_v51, %v6411_v63  ;;  %vm1106_vm1 = vcmp.eq.s32.totalorder %v4308_v51, %v4545_v34  ;;  %v6426_v63 = vld [vmem:[#allocation82_spill] sm:$0xff] }
 0x22d   :  { %v1777_v39 = vcvt.s32.f32 %v1745_v43  ;;  %v6414_v43 = vld [vmem:[#allocation19_spill] sm:$0xff] }
 0x22f   :  { %3285 = vset.pattern.permute.xlu1 %v6346_v1 }
 0x230   :  { %1591 = vperm.xlu1 %3285, %v4423_v32   ;;  %v1574_v33 = vpop.permute.xlu1 %1573  ;;  %v1136_v32 = vsel %vm1104_vm7, 1, %v6391_v52 }
 0x231   :  { %v1235_v6 = vpop.permute.xlu0 %1234  ;;  %v1168_v49 = vadd.s32 %v1136_v32, %v976_v16  ;;  %v1504_v16 = vsel %vm1472_vm4, 1, %v6391_v52  ;;  %vm1664_vm7 = vcmp.eq.s32.totalorder %v4308_v51, %v1574_v33  ;;  %v1505_v33 = vsel %vm1473_vm9, 1, %v6391_v52 }
 0x232   :  { %vm1295_vm12 = vcmp.eq.s32.totalorder %v4308_v51, %v1235_v6  ;;  %v1696_v46 = vsel %vm1664_vm7, 1, %v6391_v52  ;;  %vm144_vm4 = vcmp.eq.s32.totalorder %v4308_v51, %v6409_v57  ;;  %vm1107_vm7 = vcmp.eq.s32.totalorder %v4308_v51, %v4408_v42 }
 0x233   :  { %v1327_v59 = vsel %vm1295_vm12, 1, %v6391_v52 }
 0x234   :  { %v1359_v25 = vadd.s32 %v1327_v59, %v1167_v26  ;;  %1594 = vperm.xlu1 %3285, %v4238_v27   ;;  %v1577_v19 = vpop.permute.xlu1 %1576  ;;  %v1153_v27 = vadd.s32 %v1121_v8, %v4532_v58  ;;  %v6403_v58 = vld [vmem:[#allocation145_spill] sm:$0xff]  ;;  %v6404_v59 = vld [vmem:[#allocation70_spill] sm:$0xff]  ;;  %v6405_v8 = vld [vmem:[#allocation92_spill] sm:$0xff] }
 0x235   :  { %v1238_v47 = vpop.permute.xlu0 %1237  ;;  %vm1665_vm11 = vcmp.eq.s32.totalorder %v4308_v51, %v1577_v19  ;;  %vm531_vm12 = vcmp.eq.s32.totalorder %v4308_v51, %v6404_v59  ;;  %vm723_vm15 = vcmp.eq.s32.totalorder %v4308_v51, %v6405_v8  ;;  %v594_v19 = vadd.s32 %v562_v62, %v402_v31  ;;  %v6421_v31 = vld [vmem:[#allocation137_spill] sm:$0xff] }
 0x236   :  { %v1551_v30 = vadd.s32 %v1519_v4, %v1359_v25  ;;  %vm1296_vm6 = vcmp.eq.s32.totalorder %v4308_v51, %v1238_v47  ;;  %v4660_v25 = vld [vmem:[%s6161_s0 + $0x50] sm:$0xff]  ;;  %v6407_v4 = vmov 0  ;;  %v1139_v8 = vsel %vm1107_vm7, 1, %v6391_v52 }
 0x237   :  { %v1328_v15 = vsel %vm1296_vm6, 1, %v6391_v52  ;;  %v6408_v4 = vsel %vm4671_vm3, 4294967295, %v6407_v4  ;;  %vm160_vm6 = vcmp.eq.s32.totalorder %v4308_v51, %v6414_v43 }
 0x238   :  { %v1360_v45 = vadd.s32 %v1328_v15, %v1168_v49  ;;  %3286 = vset.pattern.permute.xlu1 %v6353_v20  ;;  %v1743_v41 = vadd.s32 %v1711_v28, %v1551_v30  ;;  %v1536_v28 = vadd.s32 %v1504_v16, %v1344_v7  ;;  %v1697_v30 = vsel %vm1665_vm11, 1, %v6391_v52 }
 0x239   :  { %1264 = vperm.xlu1 %3286, %v6403_v58   ;;  %v4633_v2 = vpop.permute.xlu1 %1246  ;;  %v1193_v18 = vpop.permute.xlu0 %1192  ;;  %v755_v15 = vsel %vm723_vm15, 1, %v6391_v52  ;;  %v754_v16 = vsel %vm722_vm8, 1, %v6391_v52 }
 0x23a   :  { %v1552_v48 = vadd.s32 %v1520_v44, %v1360_v45  ;;  %vm1281_vm10 = vcmp.eq.s32.totalorder %v4308_v51, %v1193_v18  ;;  %v1775_v6 = vcvt.s32.f32 %v1743_v41  ;;  %v1728_v13 = vadd.s32 %v1696_v46, %v1536_v28  ;;  %v6412_v41 = vld [vmem:[#allocation120_spill] sm:$0xff]  ;;  %v6413_v18 = vld [vmem:[#allocation18_spill] sm:$0xff] }
 0x23b   :  { %v1313_v32 = vsel %vm1281_vm10, 1, %v6391_v52  ;;  %vm915_vm0 = vcmp.eq.s32.totalorder %v4308_v51, %v6412_v41  ;;  %vm161_vm5 = vcmp.eq.s32.totalorder %v4308_v51, %v6413_v18  ;;  %v786_v62 = vadd.s32 %v754_v16, %v594_v19  ;;  %vm4736_vm10 = vmpackc.low %vm145_vm14, %vm144_vm4  ;;  %v6427_v18 = vld [vmem:[#allocation80_spill] sm:$0xff] }
 0x23c   :  { %v1345_v26 = vadd.s32 %v1313_v32, %v1153_v27  ;;  %v4645_v14 = vpack.c.bf16 %v1775_v6, %v1774_v17  ;;  %v1744_v12 = vadd.s32 %v1712_v11, %v1552_v48  ;;  %v563_v27 = vsel %vm531_vm12, 1, %v6391_v52  ;;  %vm4748_vm11 = vmpackc.low %vm161_vm5, %vm160_vm6 }
 0x23d   :  { %1213 = vperm.xlu1 %3286, %v4660_v25   ;;  %v4663_v11 = vpop.permute.xlu1 %1195  ;;  %v1244_v45 = vpop.permute.xlu0 %1243  ;;  %v1760_v17 = vcvt.s32.f32 %v1728_v13  ;;  %v595_v48 = vadd.s32 %v563_v27, %v403_v9  ;;  %v946_v6 = vsel %vm914_vm13, 1, %v6391_v52  ;;  %v947_v42 = vsel %vm915_vm0, 1, %v6391_v52  ;;  %v6419_v13 = vld [vmem:[#allocation128_spill] sm:$0xff]  ;;  %v6423_v27 = vld [vmem:[#allocation33_spill] sm:$0xff] }
 0x23e   :  { %v1537_v49 = vadd.s32 %v1505_v33, %v1345_v26  ;;  %2286 = vmatprep.mubr.bf16.mxu1 %v4645_v14  ;;  %v1776_v47 = vcvt.s32.f32 %v1744_v12  ;;  %vm1298_vm9 = vcmp.eq.s32.totalorder %v4308_v51, %v1244_v45  ;;  %v1138_v32 = vsel %vm1106_vm1, 1, %v6391_v52 }
 0x23f   :  { %2807 = vmatmul.mubr.msk.bf16.vlgmr.msra.gmra.mxu1 %vm4671_vm3, %v6240_v37  ;;  %v787_v46 = vadd.s32 %v755_v15, %v595_v48  ;;  %v6417_v26 = vmov 0  ;;  %v978_v12 = vadd.s32 %v946_v6, %v786_v62  ;;  %vm1299_vm12 = vcmp.eq.s32.totalorder %v4308_v51, %v4633_v2  ;;  %v6428_v6 = vld [vmem:[#allocation104_spill] sm:$0xff] }
 0x240   :  { %v4698_v54 = vpack.c.bf16 %v1777_v39, %v1776_v47  ;;  %v1729_v56 = vadd.s32 %v1697_v30, %v1537_v49  ;;  %v6418_v26 = vsel %vm4748_vm11, 4294967295, %v6417_v26  ;;  %v1330_v34 = vsel %vm1298_vm9, 1, %v6391_v52  ;;  %v6420_v49 = vld [vmem:[#allocation138_spill] sm:$0xff]  ;;  %v6422_v30 = vld [vmem:[#allocation32_spill] sm:$0xff] }
 0x241   :  { %3287 = vset.pattern.permute.xlu1 %v6340_v24  ;;  %v979_v2 = vadd.s32 %v947_v42, %v787_v46  ;;  %v1170_v61 = vadd.s32 %v1138_v32, %v978_v12  ;;  %v1331_v33 = vsel %vm1299_vm12, 1, %v6391_v52  ;;  %vm1491_vm8 = vcmp.eq.s32.totalorder %v4308_v51, %v6419_v13  ;;  %v6429_v42 = vld [vmem:[#allocation20_spill] sm:$0xff] }
 0x242   :  { %1453 = vperm.xlu1 %3287, %v4249_v29   ;;  %v1436_v7 = vpop.permute.xlu1 %1435  ;;  %2294 = vmatprep.mubr.bf16.mxu1 %v4698_v54  ;;  %v1761_v44 = vcvt.s32.f32 %v1729_v56  ;;  %vm1682_vm4 = vcmp.eq.s32.totalorder %v4308_v51, %v6420_v49  ;;  %vm354_vm13 = vcmp.eq.s32.totalorder %v4308_v51, %v6422_v30  ;;  %vm355_vm14 = vcmp.eq.s32.totalorder %v4308_v51, %v6423_v27  ;;  %v6425_v56 = vld [vmem:[#allocation58_spill] sm:$0xff]  ;;  %v1199_v49 = vpop.permute.xlu0 %1198 }
 0x243   :  { %vm1490_vm15 = vcmp.eq.s32.totalorder %v4308_v51, %v1436_v7  ;;  %v1171_v47 = vadd.s32 %v1139_v8, %v979_v2  ;;  %v1362_v57 = vadd.s32 %v1330_v34, %v1170_v61  ;;  %vm514_vm0 = vcmp.eq.s32.totalorder %v4308_v51, %v6424_v3  ;;  %v6430_v34 = vld [vmem:[#allocation108_spill] sm:$0xff]  ;;  %v6432_v61 = vld [vmem:[#allocation21_spill] sm:$0xff]  ;;  %v6434_v3 = vld [vmem:[#allocation47_spill] sm:$0xff] }
 0x244   :  { %v4728_v29 = vpack.c.bf16 %v1761_v44, %v1760_v17  ;;  %v1522_v39 = vsel %vm1490_vm15, 1, %v6391_v52  ;;  %vm515_vm1 = vcmp.eq.s32.totalorder %v4308_v51, %v6425_v56  ;;  %vm706_vm5 = vcmp.eq.s32.totalorder %v4308_v51, %v6426_v63 }
 0x245   :  { %v1363_v19 = vadd.s32 %v1331_v33, %v1171_v47  ;;  %v1554_v15 = vadd.s32 %v1522_v39, %v1362_v57  ;;  %v1523_v16 = vsel %vm1491_vm8, 1, %v6391_v52  ;;  %v1714_v45 = vsel %vm1682_vm4, 1, %v6391_v52  ;;  %v6433_v57 = vld [vmem:[#allocation139_spill] sm:$0xff] }
 0x246   :  { %1405 = vperm.xlu1 %3287, %v4660_v25   ;;  %v4756_v59 = vpop.permute.xlu1 %1387  ;;  %2230 = vmatprep.mubr.bf16.mxu0 %v4728_v29  ;;  %v386_v41 = vsel %vm354_vm13, 1, %v6391_v52  ;;  %v546_v17 = vsel %vm514_vm0, 1, %v6391_v52  ;;  %v387_v7 = vsel %vm355_vm14, 1, %v6391_v52  ;;  %v547_v44 = vsel %vm515_vm1, 1, %v6391_v52 }
 0x247   :  { %2793 = vmatmul.mubr.msk.bf16.gmra.mxu0 %vm4736_vm10, %v6240_v37  ;;  %2809 = vmatmul.mubr.msk.bf16.gmra.mxu1 %vm4748_vm11, %v6240_v37  ;;  %vm707_vm6 = vcmp.eq.s32.totalorder %v4308_v51, %v6427_v18  ;;  %v738_v43 = vsel %vm706_vm5, 1, %v6391_v52  ;;  %vm898_vm7 = vcmp.eq.s32.totalorder %v4308_v51, %v6428_v6  ;;  %v1746_v62 = vadd.s32 %v1714_v45, %v1554_v15  ;;  %v6435_v15 = vld [vmem:[#allocation72_spill] sm:$0xff] }
 0x248   :  { %v1555_v46 = vadd.s32 %v1523_v16, %v1363_v19  ;;  %vm163_vm12 = vcmp.eq.s32.totalorder %v4308_v51, %v6429_v42  ;;  %v578_v32 = vadd.s32 %v546_v17, %v386_v41  ;;  %v739_v8 = vsel %vm707_vm6, 1, %v6391_v52 }
 0x249   :  { %vm899_vm15 = vcmp.eq.s32.totalorder %v4308_v51, %v6430_v34  ;;  %vm162_vm4 = vcmp.eq.s32.totalorder %v4308_v51, %v6432_v61  ;;  %v579_v33 = vadd.s32 %v547_v44, %v387_v7  ;;  %v930_v13 = vsel %vm898_vm7, 1, %v6391_v52  ;;  %v6438_v44 = vld [vmem:[#allocation93_spill] sm:$0xff] }
 0x24a   :  { %1408 = vperm.xlu1 %3287, %v6421_v31   ;;  %v4774_v9 = vpop.permute.xlu1 %1390  ;;  %v770_v39 = vadd.s32 %v738_v43, %v578_v32  ;;  %vm1091_vm13 = vcmp.eq.s32.totalorder %v4308_v51, %v4352_v55  ;;  %vm1282_vm14 = vcmp.eq.s32.totalorder %v4308_v51, %v4663_v11  ;;  %v1778_v27 = vcvt.s32.f32 %v1746_v62  ;;  %vm4844_vm7 = vmpackc.low %vm163_vm12, %vm162_vm4 }
 0x24b   :  { %vm373_vm0 = vcmp.eq.s32.totalorder %v4308_v51, %v6434_v3  ;;  %v771_v56 = vadd.s32 %v739_v8, %v579_v33  ;;  %v931_v63 = vsel %vm899_vm15, 1, %v6391_v52  ;;  %vm1283_vm1 = vcmp.eq.s32.totalorder %v4308_v51, %v1199_v49  ;;  %v6440_v3 = vld [vmem:[#allocation4_spill] sm:$0xff] }
 0x24c   :  { %v962_v11 = vadd.s32 %v930_v13, %v770_v39  ;;  %vm1474_vm5 = vcmp.eq.s32.totalorder %v4308_v51, %v4756_v59  ;;  %vm533_vm6 = vcmp.eq.s32.totalorder %v4308_v51, %v6435_v15  ;;  %v1123_v16 = vsel %vm1091_vm13, 1, %v6391_v52  ;;  %v6444_v15 = vld [vmem:[#allocation129_spill] sm:$0xff] }
 0x24d   :  { %v1314_v45 = vsel %vm1282_vm14, 1, %v6391_v52  ;;  %v6436_v41 = vmov 0  ;;  %v963_v59 = vadd.s32 %v931_v63, %v771_v56  ;;  %v405_v7 = vsel %vm373_vm0, 1, %v6391_v52  ;;  %v6442_v63 = vld [vmem:[#allocation141_spill] sm:$0xff] }
 0x24e   :  { %3288 = vset.pattern.permute.xlu1 %v6346_v1  ;;  %v6437_v41 = vsel %vm4844_vm7, 4294967295, %v6436_v41  ;;  %vm725_vm12 = vcmp.eq.s32.totalorder %v4308_v51, %v6438_v44  ;;  %v1315_v18 = vsel %vm1283_vm1, 1, %v6391_v52  ;;  %v1506_v43 = vsel %vm1474_vm5, 1, %v6391_v52 }
 0x24f   :  { %1648 = vperm.xlu1 %3288, %v6403_v58   ;;  %v1631_v48 = vpop.permute.xlu1 %1630  ;;  %v6431_v58 = vld [vmem:[#allocation131_spill] sm:$0xff]  ;;  %v1155_v6 = vadd.s32 %v1123_v16, %v963_v59  ;;  %v757_v32 = vsel %vm725_vm12, 1, %v6391_v52  ;;  %vm1109_vm4 = vcmp.eq.s32.totalorder %v4308_v51, %v4429_v35  ;;  %vm147_vm14 = vcmp.eq.s32.totalorder %v4308_v51, %v6440_v3  ;;  %v6441_v35 = vld [vmem:[#allocation5_spill] sm:$0xff] }
 0x250   :  { %vm1683_vm9 = vcmp.eq.s32.totalorder %v4308_v51, %v1631_v48  ;;  %vm1090_vm8 = vcmp.eq.s32.totalorder %v4308_v51, %v6431_v58  ;;  %v1141_v49 = vsel %vm1109_vm4, 1, %v6391_v52  ;;  %vm146_vm0 = vcmp.eq.s32.totalorder %v4308_v51, %v6441_v35  ;;  %v6452_v35 = vld [vmem:[#allocation57_spill] sm:$0xff] }
 0x251   :  { %v1715_v12 = vsel %vm1683_vm9, 1, %v6391_v52  ;;  %v1122_v55 = vsel %vm1090_vm8, 1, %v6391_v52  ;;  %vm1475_vm9 = vcmp.eq.s32.totalorder %v4308_v51, %v4774_v9  ;;  %v565_v9 = vsel %vm533_vm6, 1, %v6391_v52 }
 0x252   :  { %v1747_v2 = vadd.s32 %v1715_v12, %v1555_v46  ;;  %v1154_v17 = vadd.s32 %v1122_v55, %v962_v11  ;;  %v6439_v46 = vld [vmem:[#allocation122_spill] sm:$0xff]  ;;  %v1507_v42 = vsel %vm1475_vm9, 1, %v6391_v52  ;;  %v1347_v12 = vadd.s32 %v1315_v18, %v1155_v6  ;;  %v6443_v11 = vld [vmem:[#allocation69_spill] sm:$0xff] }
 0x253   :  { %3289 = vset.pattern.permute.xlu1 %v6342_v0  ;;  %vm917_vm8 = vcmp.eq.s32.totalorder %v4308_v51, %v6439_v46  ;;  %v597_v34 = vadd.s32 %v565_v9, %v405_v7  ;;  %vm532_vm1 = vcmp.eq.s32.totalorder %v4308_v51, %v6443_v11  ;;  %vm1493_vm5 = vcmp.eq.s32.totalorder %v4308_v51, %v6444_v15  ;;  %v6446_v7 = vld [vmem:[#allocation96_spill] sm:$0xff]  ;;  %v6449_v6 = vld [vmem:[#allocation117_spill] sm:$0xff] }
 0x254   :  { %v1779_v47 = vcvt.s32.f32 %v1747_v2  ;;  %1075 = vperm.xlu1 %3289, %v6433_v57   ;;  %v4817_v30 = vpop.permute.xlu1 %1057  ;;  %v1346_v62 = vadd.s32 %v1314_v45, %v1154_v17  ;;  %v949_v2 = vsel %vm917_vm8, 1, %v6391_v52  ;;  %v1539_v61 = vadd.s32 %v1507_v42, %v1347_v12  ;;  %v6445_v17 = vld [vmem:[#allocation46_spill] sm:$0xff]  ;;  %v6456_v11 = vld [vmem:[#allocation84_spill] sm:$0xff] }
 0x255   :  { %v789_v39 = vadd.s32 %v757_v32, %v597_v34  ;;  %vm372_vm9 = vcmp.eq.s32.totalorder %v4308_v51, %v6445_v17  ;;  %vm724_vm12 = vcmp.eq.s32.totalorder %v4308_v51, %v6446_v7  ;;  %vm916_vm8 = vcmp.eq.s32.totalorder %v4308_v51, %v6449_v6  ;;  %v4926_v34 = vld [vmem:[%s6161_s0 + $0x60] sm:$0xff] }
 0x256   :  { %v4832_v19 = vpack.c.bf16 %v1779_v47, %v1778_v27  ;;  %v1538_v8 = vadd.s32 %v1506_v43, %v1346_v62  ;;  %v564_v43 = vsel %vm532_vm1, 1, %v6391_v52  ;;  %v6450_v62 = vld [vmem:[#allocation147_spill] sm:$0xff]  ;;  %v404_v42 = vsel %vm372_vm9, 1, %v6391_v52 }
 0x257   :  { %v981_v27 = vadd.s32 %v949_v2, %v789_v39  ;;  %v596_v32 = vadd.s32 %v564_v43, %v404_v42  ;;  %vm1108_vm4 = vcmp.eq.s32.totalorder %v4308_v51, %v4817_v30  ;;  %v948_v12 = vsel %vm916_vm8, 1, %v6391_v52  ;;  %v1250_v2 = vpop.permute.xlu0 %1249 }
 0x258   :  { %3290 = vset.pattern.permute.xlu1 %v6346_v1  ;;  %2302 = vmatprep.mubr.bf16.mxu1 %v4832_v19  ;;  %vm516_vm1 = vcmp.eq.s32.totalorder %v4308_v51, %v6452_v35 }
 0x259   :  { %1597 = vperm.xlu1 %3290, %v4660_v25   ;;  %v1580_v48 = vpop.permute.xlu1 %1579  ;;  %2811 = vmatmul.mubr.msk.bf16.gmra.mxu1 %vm4844_vm7, %v6240_v37  ;;  %v1173_v16 = vadd.s32 %v1141_v49, %v981_v27 }
 0x25a   :  { %vm1666_vm15 = vcmp.eq.s32.totalorder %v4308_v51, %v1580_v48  ;;  %v1525_v48 = vsel %vm1493_vm5, 1, %v6391_v52 }
 0x25b   :  { %v1698_v25 = vsel %vm1666_vm15, 1, %v6391_v52  ;;  %vm4902_vm15 = vmpackc.low %vm147_vm14, %vm146_vm0 }
 0x25c   :  { %v1730_v33 = vadd.s32 %v1698_v25, %v1538_v8  ;;  %v756_v25 = vsel %vm724_vm12, 1, %v6391_v52  ;;  %vm708_vm12 = vcmp.eq.s32.totalorder %v4308_v51, %v6456_v11 }
 0x25d   :  { %1600 = vperm.xlu1 %3290, %v6421_v31   ;;  %v1583_v58 = vpop.permute.xlu1 %1582  ;;  %v788_v8 = vadd.s32 %v756_v25, %v596_v32  ;;  %v740_v6 = vsel %vm708_vm12, 1, %v6391_v52  ;;  %v6459_v25 = vld [vmem:[#allocation22_spill] sm:$0xff] }
 0x25e   :  { %vm1667_vm13 = vcmp.eq.s32.totalorder %v4308_v51, %v1583_v58  ;;  %v1762_v31 = vcvt.s32.f32 %v1730_v33 }
 0x25f   :  { %v1699_v13 = vsel %vm1667_vm13, 1, %v6391_v52  ;;  %v980_v33 = vadd.s32 %v948_v12, %v788_v8  ;;  %vm1300_vm13 = vcmp.eq.s32.totalorder %v4308_v51, %v1250_v2  ;;  %v6460_v2 = vld [vmem:[#allocation110_spill] sm:$0xff] }
 0x260   :  { %v1731_v47 = vadd.s32 %v1699_v13, %v1539_v61  ;;  %v1140_v61 = vsel %vm1108_vm4, 1, %v6391_v52  ;;  %v1332_v13 = vsel %vm1300_vm13, 1, %v6391_v52 }
 0x261   :  { %3291 = vset.pattern.permute.xlu1 %v6342_v0  ;;  %v1172_v39 = vadd.s32 %v1140_v61, %v980_v33  ;;  %v6462_v33 = vld [vmem:[#allocation23_spill] sm:$0xff] }
 0x262   :  { %v1763_v56 = vcvt.s32.f32 %v1731_v47  ;;  %1030 = vperm.xlu1 %3291, %v6442_v63   ;;  %v1253_v55 = vpop.permute.xlu1 %1252  ;;  %v6451_v47 = vld [vmem:[#allocation140_spill] sm:$0xff] }
 0x263   :  { %vm1301_vm6 = vcmp.eq.s32.totalorder %v4308_v51, %v1253_v55  ;;  %vm1684_vm0 = vcmp.eq.s32.totalorder %v4308_v51, %v6451_v47  ;;  %v1364_v27 = vadd.s32 %v1332_v13, %v1172_v39  ;;  %v6455_v55 = vld [vmem:[#allocation60_spill] sm:$0xff]  ;;  %v6463_v39 = vld [vmem:[#allocation49_spill] sm:$0xff]  ;;  %v1205_v47 = vpop.permute.xlu0 %1204 }
 0x264   :  { %v1333_v45 = vsel %vm1301_vm6, 1, %v6391_v52  ;;  %v4893_v59 = vpack.c.bf16 %v1763_v56, %v1762_v31  ;;  %v6453_v31 = vld [vmem:[#allocation34_spill] sm:$0xff]  ;;  %v6454_v56 = vld [vmem:[#allocation35_spill] sm:$0xff]  ;;  %vm517_vm9 = vcmp.eq.s32.totalorder %v4308_v51, %v6455_v55  ;;  %v1716_v15 = vsel %vm1684_vm0, 1, %v6391_v52 }
 0x265   :  { %v1365_v44 = vadd.s32 %v1333_v45, %v1173_v16  ;;  %vm356_vm5 = vcmp.eq.s32.totalorder %v4308_v51, %v6453_v31  ;;  %vm357_vm6 = vcmp.eq.s32.totalorder %v4308_v51, %v6454_v56  ;;  %v548_v16 = vsel %vm516_vm1, 1, %v6391_v52  ;;  %v6457_v45 = vld [vmem:[#allocation81_spill] sm:$0xff] }
 0x266   :  { %3292 = vset.pattern.permute.xlu1 %v6353_v20  ;;  %v4909_v9 = vpop.permute.xlu1 %1201  ;;  %2238 = vmatprep.mubr.bf16.mxu0 %v4893_v59  ;;  %vm709_vm8 = vcmp.eq.s32.totalorder %v4308_v51, %v6457_v45  ;;  %v388_v17 = vsel %vm356_vm5, 1, %v6391_v52  ;;  %v389_v7 = vsel %vm357_vm6, 1, %v6391_v52  ;;  %vm901_vm0 = vcmp.eq.s32.totalorder %v4308_v51, %v6460_v2  ;;  %v3321_v31 = vld [vmem:[%s6162_s1 + $0xf8] sm:$0xff]  }
 0x267   :  { %1270 = vperm.xlu1 %3292, %v6450_v62   ;;  %2795 = vmatmul.mubr.msk.bf16.gmra.mxu0 %vm4902_vm15, %v6240_v37  ;;  %v1557_v46 = vadd.s32 %v1525_v48, %v1365_v44  ;;  %v6458_v44 = vld [vmem:[#allocation105_spill] sm:$0xff]  ;;  %v549_v48 = vsel %vm517_vm9, 1, %v6391_v52  ;;  %v580_v32 = vadd.s32 %v548_v16, %v388_v17  ;;  %v741_v12 = vsel %vm709_vm8, 1, %v6391_v52  ;;  %v6464_v17 = vld [vmem:[#allocation74_spill] sm:$0xff] }
 0x268   :  { %vm900_vm4 = vcmp.eq.s32.totalorder %v4308_v51, %v6458_v44  ;;  %vm164_vm5 = vcmp.eq.s32.totalorder %v4308_v51, %v6462_v33  ;;  %vm375_vm6 = vcmp.eq.s32.totalorder %v4308_v51, %v6463_v39  ;;  %v581_v13 = vadd.s32 %v549_v48, %v389_v7  ;;  %v3322_v56 = vld [vmem:[%s6162_s1 + $0xb8] sm:$0xff]   ;;  %2998 = vmatprep.subr.bf16.mxu1 %v3321_v31 }
 0x269   :  { %vm1093_vm9 = vcmp.eq.s32.totalorder %v4308_v51, %v4367_v40  ;;  %vm1284_vm12 = vcmp.eq.s32.totalorder %v4308_v51, %v4909_v9  ;;  %v3324_v16 = vld [vmem:[%s6162_s1 + $0x138] sm:$0xff]   ;;  %vm1285_vm8 = vcmp.eq.s32.totalorder %v4308_v51, %v1205_v47  ;;  %2999 = vmatpush3.bf16.msra.mxu1 %v3322_v56  ;;  %v407_v9 = vsel %vm375_vm6, 1, %v6391_v52  ;;  %v3326_v56 = vld [vmem:[%s6162_s1 + $0xb0] sm:$0xff]  }
 0x26a   :  { %v773_v55 = vadd.s32 %v741_v12, %v581_v13  ;;  %v1125_v7 = vsel %vm1093_vm9, 1, %v6391_v52  ;;  %v1316_v44 = vsel %vm1284_vm12, 1, %v6391_v52  ;;  %vm1111_vm9 = vcmp.eq.s32.totalorder %v4308_v51, %v4435_v22  ;;  %v3328_v22 = vld [vmem:[%s6162_s1 + $0x130] sm:$0xff]  }
 0x26b   :  { %1219 = vperm.xlu1 %3292, %v4926_v34   ;;  %v1442_v58 = vpop.permute.xlu1 %1441 }
 0x26c   :  { %vm1492_vm14 = vcmp.eq.s32.totalorder %v4308_v51, %v1442_v58  ;;  %v932_v58 = vsel %vm900_vm4, 1, %v6391_v52 }
 0x26d   :  { %v1524_v49 = vsel %vm1492_vm14, 1, %v6391_v52  ;;  %vm165_vm14 = vcmp.eq.s32.totalorder %v4308_v51, %v6459_v25 }
 0x26f   :  { %3293 = vset.pattern.permute.xlu1 %v6340_v24  ;;  %v4933_v30 = vpop.permute.xlu1 %1393 }
 0x270   :  { %1459 = vperm.xlu1 %3293, %v6433_v57   ;;  %v1556_v57 = vadd.s32 %v1524_v49, %v1364_v27  ;;  %v772_v49 = vadd.s32 %v740_v6, %v580_v32  ;;  %vm1476_vm4 = vcmp.eq.s32.totalorder %v4308_v51, %v4933_v30  ;;  %v6467_v6 = vld [vmem:[#allocation95_spill] sm:$0xff]  ;;  %v5051_v32 = vld [vmem:[%s6161_s0 + $0xf0] sm:$0xff] }
 0x271   :  { %v1508_v25 = vsel %vm1476_vm4, 1, %v6391_v52 }
 0x272   :  { %v1748_v42 = vadd.s32 %v1716_v15, %v1556_v57  ;;  %v3323_v57 = vld [vmem:[%s6162_s1 + $0x178] sm:$0xff]   ;;  %v964_v11 = vadd.s32 %v932_v58, %v772_v49 }
 0x273   :  { %v4940_v3 = vpop.permute.xlu1 %1396  ;;  %3110 = vmatprep.subr.bf16.mxu0 %v3323_v57  ;;  %v3327_v57 = vld [vmem:[%s6162_s1 + $0x170] sm:$0xff]  }
 0x274   :  { %1411 = vperm.xlu1 %3293, %v4926_v34   ;;  %v1780_v27 = vcvt.s32.f32 %v1748_v42  ;;  %3111 = vmatpush3.bf16.msra.mxu0 %v3324_v16  ;;  %v1317_v42 = vsel %vm1285_vm8, 1, %v6391_v52  ;;  %v6469_v16 = vld [vmem:[#allocation6_spill] sm:$0xff] }
 0x275   :  { %3112 = vmatprep.subr.bf16.mxu0 %v3327_v57  ;;  %vm149_vm8 = vcmp.eq.s32.totalorder %v4308_v51, %v6469_v16  ;;  %v3335_v16 = vld [vmem:[%s6162_s1 + $0x160] sm:$0xff]  }
 0x278   :  { %1414 = vperm.xlu1 %3293, %v6442_v63   ;;  %v1637_v43 = vpop.permute.xlu1 %1636  ;;  %v6461_v63 = vld [vmem:[#allocation133_spill] sm:$0xff]  ;;  %3113 = vmatpush3.bf16.msra.mxu0 %v3328_v22  ;;  %v3333_v22 = vld [vmem:[%s6162_s1 + $0xe0] sm:$0xff]  }
 0x279   :  { %vm1685_vm13 = vcmp.eq.s32.totalorder %v4308_v51, %v1637_v43  ;;  %vm1092_vm1 = vcmp.eq.s32.totalorder %v4308_v51, %v6461_v63  ;;  %v6465_v43 = vmov 0  ;;  %v6468_v63 = vld [vmem:[#allocation124_spill] sm:$0xff] }
 0x27a   :  { %v1717_v8 = vsel %vm1685_vm13, 1, %v6391_v52  ;;  %v1124_v15 = vsel %vm1092_vm1, 1, %v6391_v52  ;;  %vm535_vm13 = vcmp.eq.s32.totalorder %v4308_v51, %v6464_v17  ;;  %vm1477_vm1 = vcmp.eq.s32.totalorder %v4308_v51, %v4940_v3  ;;  %v6470_v17 = vld [vmem:[#allocation7_spill] sm:$0xff] }
 0x27b   :  { %v1749_v61 = vadd.s32 %v1717_v8, %v1557_v46  ;;  %v1156_v40 = vadd.s32 %v1124_v15, %v964_v11  ;;  %v3325_v8 = vld [vmem:[%s6162_s1 + $0xf0] sm:$0xff]   ;;  %v567_v30 = vsel %vm535_vm13, 1, %v6391_v52  ;;  %vm919_vm6 = vcmp.eq.s32.totalorder %v4308_v51, %v6468_v63 }
 0x27c   :  { %3295 = vset.pattern.permute.xlu1 %v6346_v1  ;;  %3000 = vmatprep.subr.bf16.mxu1 %v3325_v8  ;;  %v599_v47 = vadd.s32 %v567_v30, %v407_v9  ;;  %v951_v3 = vsel %vm919_vm6, 1, %v6391_v52  ;;  %vm148_vm4 = vcmp.eq.s32.totalorder %v4308_v51, %v6470_v17  ;;  %v3329_v9 = vld [vmem:[%s6162_s1 + $0xe8] sm:$0xff]  }
 0x27d   :  { %v1781_v35 = vcvt.s32.f32 %v1749_v61  ;;  %1654 = vperm.xlu1 %3295, %v6450_v62   ;;  %v4984_v46 = vpop.permute.xlu1 %1063  ;;  %v933_v62 = vsel %vm901_vm0, 1, %v6391_v52  ;;  %vm5027_vm0 = vmpackc.low %vm165_vm14, %vm164_vm5  ;;  %vm727_vm14 = vcmp.eq.s32.totalorder %v4308_v51, %v6467_v6  ;;  %v1348_v2 = vadd.s32 %v1316_v44, %v1156_v40  ;;  %3001 = vmatpush3.bf16.msra.mxu1 %v3326_v56  ;;  %v3330_v6 = vld [vmem:[%s6162_s1 + $0xa8] sm:$0xff]  }
 0x27e   :  { %v6466_v43 = vsel %vm5027_vm0, 4294967295, %v6465_v43  ;;  %v965_v48 = vadd.s32 %v933_v62, %v773_v55  ;;  %v1509_v61 = vsel %vm1477_vm1, 1, %v6391_v52  ;;  %v759_v39 = vsel %vm727_vm14, 1, %v6391_v52  ;;  %3002 = vmatprep.subr.bf16.mxu1 %v3329_v9 }
 0x27f   :  { %v5009_v45 = vpack.c.bf16 %v1781_v35, %v1780_v27  ;;  %v1540_v49 = vadd.s32 %v1508_v25, %v1348_v2  ;;  %v791_v55 = vadd.s32 %v759_v39, %v599_v47  ;;  %v1143_v62 = vsel %vm1111_vm9, 1, %v6391_v52  ;;  %v6472_v25 = vld [vmem:[#allocation130_spill] sm:$0xff]  ;;  %vm5130_vm9 = vmpackc.low %vm149_vm8, %vm148_vm4 }
 0x280   :  { %v1157_v58 = vadd.s32 %v1125_v7, %v965_v48  ;;  %v3384_v48 = vld [vmem:[%s6161_s0 + $0x68] sm:$0xff]  ;;  %vm1495_vm1 = vcmp.eq.s32.totalorder %v4308_v51, %v6472_v25  ;;  %v6474_v2 = vld [vmem:[#allocation98_spill] sm:$0xff]  ;;  %vm1110_vm8 = vcmp.eq.s32.totalorder %v4308_v51, %v4984_v46  ;;  %v5175_v46 = vld [vmem:[%s6161_s0 + $0xf8] sm:$0xff] }
 0x281   :  { %3296 = vset.pattern.permute.xlu1 %v6342_v0  ;;  %2310 = vmatprep.mubr.bf16.mxu1 %v5009_v45  ;;  %vm726_vm6 = vcmp.eq.s32.totalorder %v4308_v51, %v6474_v2  ;;  %v6478_v2 = vld [vmem:[#allocation36_spill] sm:$0xff] }
 0x282   :  { %1081 = vperm.xlu1 %3296, %v5051_v32   ;;  %v1586_v12 = vpop.permute.xlu1 %1585  ;;  %2813 = vmatmul.mubr.msk.bf16.gmra.mxu1 %vm5027_vm0, %v6240_v37  ;;  %v1349_v13 = vadd.s32 %v1317_v42, %v1157_v58  ;;  %v6471_v42 = vld [vmem:[#allocation71_spill] sm:$0xff]  ;;  %v6473_v58 = vld [vmem:[#allocation48_spill] sm:$0xff] }
 0x283   :  { %vm1668_vm5 = vcmp.eq.s32.totalorder %v4308_v51, %v1586_v12  ;;  %vm534_vm13 = vcmp.eq.s32.totalorder %v4308_v51, %v6471_v42  ;;  %3003 = vmatpush3.bf16.msra.mxu1 %v3330_v6 }
 0x284   :  { %v1700_v33 = vsel %vm1668_vm5, 1, %v6391_v52  ;;  %v1541_v35 = vadd.s32 %v1509_v61, %v1349_v13  ;;  %vm374_vm5 = vcmp.eq.s32.totalorder %v4308_v51, %v6473_v58  ;;  %v3331_v61 = vld [vmem:[%s6162_s1 + $0x168] sm:$0xff]   ;;  %v566_v13 = vsel %vm534_vm13, 1, %v6391_v52  ;;  %3004 = vmatprep.subr.bf16.mxu1 %v3333_v22  ;;  %v3339_v58 = vld [vmem:[%s6162_s1 + $0x158] sm:$0xff]  }
 0x285   :  { %v1732_v31 = vadd.s32 %v1700_v33, %v1540_v49  ;;  %v3332_v33 = vld [vmem:[%s6162_s1 + $0x128] sm:$0xff]   ;;  %v1527_v49 = vsel %vm1495_vm1, 1, %v6391_v52  ;;  %3114 = vmatprep.subr.bf16.mxu0 %v3331_v61  ;;  %vm358_vm1 = vcmp.eq.s32.totalorder %v4308_v51, %v6478_v2 }
 0x286   :  { %3297 = vset.pattern.permute.xlu1 %v6346_v1  ;;  %v1589_v27 = vpop.permute.xlu1 %1588  ;;  %3115 = vmatpush3.bf16.msra.mxu0 %v3332_v33  ;;  %v6480_v61 = vld [vmem:[#allocation59_spill] sm:$0xff]  ;;  %v6481_v33 = vld [vmem:[#allocation62_spill] sm:$0xff] }
 0x287   :  { %vm1669_vm12 = vcmp.eq.s32.totalorder %v4308_v51, %v1589_v27  ;;  %1603 = vperm.xlu1 %3297, %v4926_v34   ;;  %v983_v34 = vadd.s32 %v951_v3, %v791_v55  ;;  %v1764_v7 = vcvt.s32.f32 %v1732_v31  ;;  %v6477_v27 = vld [vmem:[#allocation118_spill] sm:$0xff]  ;;  %v5145_v3 = vld [vmem:[%s6161_s0 + $0x78] sm:$0xff]  ;;  %v758_v31 = vsel %vm726_vm6, 1, %v6391_v52  ;;  %3116 = vmatprep.subr.bf16.mxu0 %v3335_v16  ;;  %v6484_v22 = vld [vmem:[#allocation83_spill] sm:$0xff] }
 0x288   :  { %v1701_v11 = vsel %vm1669_vm12, 1, %v6391_v52  ;;  %vm918_vm12 = vcmp.eq.s32.totalorder %v4308_v51, %v6477_v27  ;;  %v3334_v55 = vld [vmem:[%s6162_s1 + $0xa0] sm:$0xff]   ;;  %vm519_vm6 = vcmp.eq.s32.totalorder %v4308_v51, %v6481_v33 }
 0x289   :  { %v1733_v15 = vadd.s32 %v1701_v11, %v1541_v35  ;;  %v1175_v12 = vadd.s32 %v1143_v62, %v983_v34  ;;  %v950_v57 = vsel %vm918_vm12, 1, %v6391_v52  ;;  %v1256_v62 = vpop.permute.xlu0 %1255  ;;  %v1142_v34 = vsel %vm1110_vm8, 1, %v6391_v52  ;;  %3005 = vmatpush3.bf16.msra.mxu1 %v3334_v55  ;;  %v6483_v27 = vld [vmem:[#allocation86_spill] sm:$0xff] }
 0x28a   :  { %vm1302_vm4 = vcmp.eq.s32.totalorder %v4308_v51, %v1256_v62  ;;  %vm710_vm8 = vcmp.eq.s32.totalorder %v4308_v51, %v6483_v27  ;;  %v6489_v27 = vld [vmem:[#allocation25_spill] sm:$0xff] }
 0x28b   :  { %v1765_v44 = vcvt.s32.f32 %v1733_v15  ;;  %1606 = vperm.xlu1 %3297, %v3384_v48   ;;  %v1259_v40 = vpop.permute.xlu1 %1258  ;;  %v1334_v48 = vsel %vm1302_vm4, 1, %v6391_v52  ;;  %vm711_vm4 = vcmp.eq.s32.totalorder %v4308_v51, %v6484_v22  ;;  %v742_v62 = vsel %vm710_vm8, 1, %v6391_v52 }
 0x28c   :  { %vm1303_vm14 = vcmp.eq.s32.totalorder %v4308_v51, %v1259_v40  ;;  %v5192_v40 = vld [vmem:[%s6161_s0 + $0x70] sm:$0xff] }
 0x28d   :  { %v1335_v8 = vsel %vm1303_vm14, 1, %v6391_v52  ;;  %v5112_v30 = vpack.c.bf16 %v1765_v44, %v1764_v7  ;;  %v5195_v9 = vpop.permute.xlu0 %1210 }
 0x28e   :  { %v1367_v63 = vadd.s32 %v1335_v8, %v1175_v12  ;;  %v3337_v12 = vld [vmem:[%s6162_s1 + $0xd8] sm:$0xff]  }
 0x28f   :  { %3299 = vset.pattern.permute.xlu1 %v6342_v0  ;;  %v5137_v47 = vpop.permute.xlu1 %1207  ;;  %2246 = vmatprep.mubr.bf16.mxu0 %v5112_v30  ;;  %v406_v0 = vsel %vm374_vm5, 1, %v6391_v52  ;;  %v3338_v8 = vld [vmem:[%s6162_s1 + $0x98] sm:$0xff]   ;;  %vm518_vm5 = vcmp.eq.s32.totalorder %v4308_v51, %v6480_v61 }
 0x290   :  { %1036 = vperm.xlu1 %3299, %v5145_v3   ;;  %2797 = vmatmul.mubr.msk.bf16.gmra.mxu0 %vm5130_vm9, %v6240_v37  ;;  %v5151_v35 = vadd.s32 %v1527_v49, %v1367_v63  ;;  %v598_v56 = vadd.s32 %v566_v13, %v406_v0  ;;  %v6479_v63 = vld [vmem:[#allocation37_spill] sm:$0xff]  ;;  %v6482_v13 = vld [vmem:[#allocation142_spill] sm:$0xff]  ;;  %v390_v0 = vsel %vm358_vm1, 1, %v6391_v52  ;;  %vm1286_vm8 = vcmp.eq.s32.totalorder %v4308_v51, %v5137_v47 }
 0x291   :  { %vm359_vm14 = vcmp.eq.s32.totalorder %v4308_v51, %v6479_v63  ;;  %vm1686_vm12 = vcmp.eq.s32.totalorder %v4308_v51, %v6482_v13  ;;  %3006 = vmatprep.subr.bf16.mxu1 %v3337_v12  ;;  %v3342_v12 = vld [vmem:[%s6162_s1 + $0x90] sm:$0xff]  }
 0x292   :  { %v790_v11 = vadd.s32 %v758_v31, %v598_v56  ;;  %3007 = vmatpush3.bf16.msra.mxu1 %v3338_v8  ;;  %v550_v31 = vsel %vm518_vm5, 1, %v6391_v52  ;;  %v3340_v56 = vld [vmem:[%s6162_s1 + $0x118] sm:$0xff]   ;;  %v1718_v55 = vsel %vm1686_vm12, 1, %v6391_v52  ;;  %v3343_v8 = vld [vmem:[%s6162_s1 + $0x150] sm:$0xff]   ;;  %vm1095_vm12 = vcmp.eq.s32.totalorder %v4308_v51, %v4378_v5 }
 0x293   :  { %v582_v16 = vadd.s32 %v550_v31, %v390_v0  ;;  %v1127_v22 = vsel %vm1095_vm12, 1, %v6391_v52 }
 0x294   :  { %3300 = vset.pattern.permute.xlu1 %v6353_v20  ;;  %v1448_v15 = vpop.permute.xlu1 %1447  ;;  %v982_v17 = vadd.s32 %v950_v57, %v790_v11  ;;  %v3336_v20 = vld [vmem:[%s6162_s1 + $0x120] sm:$0xff]   ;;  %v391_v57 = vsel %vm359_vm14, 1, %v6391_v52 }
 0x295   :  { %1276 = vperm.xlu1 %3300, %v5175_v46   ;;  %vm1494_vm13 = vcmp.eq.s32.totalorder %v4308_v51, %v1448_v15  ;;  %3117 = vmatpush3.bf16.msra.mxu0 %v3336_v20  ;;  %v6485_v15 = vld [vmem:[#allocation106_spill] sm:$0xff]  ;;  %v743_v20 = vsel %vm711_vm4, 1, %v6391_v52  ;;  %v774_v63 = vadd.s32 %v742_v62, %v582_v16  ;;  %vm166_vm4 = vcmp.eq.s32.totalorder %v4308_v51, %v6489_v27 }
 0x296   :  { %v1174_v7 = vadd.s32 %v1142_v34, %v982_v17  ;;  %v1526_v6 = vsel %vm1494_vm13, 1, %v6391_v52  ;;  %3118 = vmatprep.subr.bf16.mxu0 %v3339_v58  ;;  %vm902_vm13 = vcmp.eq.s32.totalorder %v4308_v51, %v6485_v15  ;;  %v6488_v58 = vld [vmem:[#allocation24_spill] sm:$0xff] }
 0x298   :  { %v5186_v44 = vpop.permute.xlu1 %1399  ;;  %v1366_v42 = vadd.s32 %v1334_v48, %v1174_v7  ;;  %v6486_v7 = vld [vmem:[#allocation112_spill] sm:$0xff]  ;;  %v6487_v48 = vld [vmem:[#allocation134_spill] sm:$0xff] }
 0x299   :  { %1225 = vperm.xlu1 %3300, %v5192_v40   ;;  %3119 = vmatpush3.bf16.msra.mxu0 %v3340_v56  ;;  %vm903_vm14 = vcmp.eq.s32.totalorder %v4308_v51, %v6486_v7  ;;  %vm1094_vm5 = vcmp.eq.s32.totalorder %v4308_v51, %v6487_v48  ;;  %v3346_v48 = vld [vmem:[%s6162_s1 + $0x88] sm:$0xff]  }
 0x29a   :  { %v1558_v49 = vadd.s32 %v1526_v6, %v1366_v42  ;;  %v3341_v42 = vld [vmem:[%s6162_s1 + $0xd0] sm:$0xff]   ;;  %v935_v31 = vsel %vm903_vm14, 1, %v6391_v52  ;;  %v1126_v56 = vsel %vm1094_vm5, 1, %v6391_v52  ;;  %3120 = vmatprep.subr.bf16.mxu0 %v3343_v8 }
 0x29b   :  { %3008 = vmatprep.subr.bf16.mxu1 %v3341_v42  ;;  %v3348_v42 = vld [vmem:[%s6162_s1 + $0x108] sm:$0xff]  }
 0x29c   :  { %v5198_v25 = vpop.permute.xlu1 %1402  ;;  %v1750_v34 = vadd.s32 %v1718_v55, %v1558_v49  ;;  %3009 = vmatpush3.bf16.msra.mxu1 %v3342_v12  ;;  %v1318_v55 = vsel %vm1286_vm8, 1, %v6391_v52 }
 0x29d   :  { %3302 = vset.pattern.permute.xlu1 %v6340_v24  ;;  %v5225_v24 = vpop.permute.xlu0 %1261  ;;  %vm1479_vm5 = vcmp.eq.s32.totalorder %v4308_v51, %v5198_v25  ;;  %v3345_v25 = vld [vmem:[%s6162_s1 + $0xc8] sm:$0xff]  }
 0x29e   :  { %1465 = vperm.xlu1 %3302, %v5051_v32   ;;  %v551_v32 = vsel %vm519_vm6, 1, %v6391_v52  ;;  %vm167_vm6 = vcmp.eq.s32.totalorder %v4308_v51, %v6488_v58  ;;  %v1782_v33 = vcvt.s32.f32 %v1750_v34  ;;  %3010 = vmatprep.subr.bf16.mxu1 %v3345_v25  ;;  %v6499_v25 = vld [vmem:[#allocation51_spill] sm:$0xff] }
 0x29f   :  { %v583_v2 = vadd.s32 %v551_v32, %v391_v57  ;;  %v3344_v32 = vld [vmem:[%s6162_s1 + $0x110] sm:$0xff]   ;;  %vm5301_vm14 = vmpackc.low %vm167_vm6, %vm166_vm4 }
 0x2a0   :  { %3121 = vmatpush3.bf16.msra.mxu0 %v3344_v32  ;;  %3011 = vmatpush3.bf16.msra.mxu1 %v3346_v48  ;;  %v6494_v32 = vld [vmem:[#allocation73_spill] sm:$0xff] }
 0x2a1   :  { %v1643_v11 = vpop.permute.xlu1 %1642  ;;  %v5264_v61 = vpop.permute.xlu0 %1216  ;;  %v775_v0 = vadd.s32 %v743_v20, %v583_v2 }
 0x2a2   :  { %vm1687_vm1 = vcmp.eq.s32.totalorder %v4308_v51, %v1643_v11  ;;  %1417 = vperm.xlu1 %3302, %v5192_v40  }
 0x2a3   :  { %v1719_v17 = vsel %vm1687_vm1, 1, %v6391_v52  ;;  %vm1478_vm1 = vcmp.eq.s32.totalorder %v4308_v51, %v5186_v44  ;;  %v6490_v44 = vmov 0 }
 0x2a4   :  { %v1751_v6 = vadd.s32 %v1719_v17, %v5151_v35  ;;  %v934_v35 = vsel %vm902_vm13, 1, %v6391_v52  ;;  %vm1287_vm13 = vcmp.eq.s32.totalorder %v4308_v51, %v5195_v9  ;;  %v6491_v44 = vsel %vm5301_vm14, 4294967295, %v6490_v44 }
 0x2a5   :  { %v967_v9 = vadd.s32 %v935_v31, %v775_v0  ;;  %v5307_v62 = vpop.permute.xlu0 %1267  ;;  %v1319_v5 = vsel %vm1287_vm13, 1, %v6391_v52  ;;  %v1510_v47 = vsel %vm1478_vm1, 1, %v6391_v52  ;;  %v3352_v31 = vld [vmem:[%s6162_s1 + $0x100] sm:$0xff]   ;;  %vm536_vm13 = vcmp.eq.s32.totalorder %v4308_v51, %v6494_v32 }
 0x2a6   :  { %v1783_v13 = vcvt.s32.f32 %v1751_v6  ;;  %1420 = vperm.xlu1 %3302, %v5145_v3   ;;  %v5269_v49 = vpop.permute.xlu1 %1069  ;;  %v966_v3 = vadd.s32 %v934_v35, %v774_v63  ;;  %v3347_v6 = vld [vmem:[%s6162_s1 + $0x148] sm:$0xff]   ;;  %v3350_v63 = vld [vmem:[%s6162_s1 + $0x80] sm:$0xff]  }
 0x2a7   :  { %v1159_v34 = vadd.s32 %v1127_v22, %v967_v9  ;;  %3122 = vmatprep.subr.bf16.mxu0 %v3347_v6  ;;  %v6495_v9 = vld [vmem:[#allocation50_spill] sm:$0xff] }
 0x2a8   :  { %v5285_v57 = vpack.c.bf16 %v1783_v13, %v1782_v33  ;;  %v1158_v11 = vadd.s32 %v1126_v56, %v966_v3  ;;  %3123 = vmatpush3.bf16.msra.mxu0 %v3348_v42  ;;  %v3351_v33 = vld [vmem:[%s6162_s1 + $0x140] sm:$0xff]   ;;  %v6492_v56 = vld [vmem:[#allocation8_spill] sm:$0xff]  ;;  %v6493_v3 = vld [vmem:[#allocation9_spill] sm:$0xff]  ;;  %vm376_vm1 = vcmp.eq.s32.totalorder %v4308_v51, %v6495_v9 }
 0x2a9   :  { %v5333_v8 = vpop.permute.xlu0 %1222  ;;  %vm151_vm8 = vcmp.eq.s32.totalorder %v4308_v51, %v6492_v56  ;;  %vm150_vm4 = vcmp.eq.s32.totalorder %v4308_v51, %v6493_v3  ;;  %3124 = vmatprep.subr.bf16.mxu0 %v3351_v33 }
 0x2aa   :  { %3304 = vset.pattern.permute.xlu1 %v6346_v1  ;;  %2318 = vmatprep.mubr.bf16.mxu1 %v5285_v57  ;;  %v1350_v16 = vadd.s32 %v1318_v55, %v1158_v11  ;;  %v1511_v1 = vsel %vm1479_vm5, 1, %v6391_v52  ;;  %v6496_v11 = vld [vmem:[#allocation100_spill] sm:$0xff] }
 0x2ab   :  { %1660 = vperm.xlu1 %3304, %v5175_v46   ;;  %v1592_v15 = vpop.permute.xlu1 %1591  ;;  %2815 = vmatmul.mubr.msk.bf16.gmra.mxu1 %vm5301_vm14, %v6240_v37  ;;  %v1351_v46 = vadd.s32 %v1319_v5, %v1159_v34  ;;  %vm728_vm5 = vcmp.eq.s32.totalorder %v4308_v51, %v6496_v11  ;;  %v6500_v34 = vld [vmem:[#allocation76_spill] sm:$0xff] }
 0x2ac   :  { %vm1670_vm6 = vcmp.eq.s32.totalorder %v4308_v51, %v1592_v15  ;;  %v1542_v20 = vadd.s32 %v1510_v47, %v1350_v16  ;;  %3125 = vmatpush3.bf16.msra.mxu0 %v3352_v31  ;;  %v568_v47 = vsel %vm536_vm13, 1, %v6391_v52  ;;  %vm537_vm14 = vcmp.eq.s32.totalorder %v4308_v51, %v6500_v34  ;;  %v6501_v16 = vld [vmem:[#allocation119_spill] sm:$0xff] }
 0x2ad   :  { %v1702_v17 = vsel %vm1670_vm6, 1, %v6391_v52  ;;  %v1543_v12 = vadd.s32 %v1511_v1, %v1351_v46  ;;  %v5355_v22 = vpop.permute.xlu0 %1273  ;;  %vm5363_vm6 = vmpackc.low %vm151_vm8, %vm150_vm4  ;;  %vm920_vm0 = vcmp.eq.s32.totalorder %v4308_v51, %v6501_v16  ;;  %v408_v1 = vsel %vm376_vm1, 1, %v6391_v52  ;;  %v6505_v34 = vld [vmem:[#allocation39_spill] sm:$0xff]  ;;  %v6506_v16 = vld [vmem:[#allocation61_spill] sm:$0xff] }
 0x2ae   :  { %v1734_v58 = vadd.s32 %v1702_v17, %v1542_v20  ;;  %v760_v17 = vsel %vm728_vm5, 1, %v6391_v52  ;;  %v600_v46 = vadd.s32 %v568_v47, %v408_v1  ;;  %v6502_v20 = vld [vmem:[#allocation97_spill] sm:$0xff]  ;;  %vm1112_vm4 = vcmp.eq.s32.totalorder %v4308_v51, %v5269_v49  ;;  %v6507_v1 = vld [vmem:[#allocation64_spill] sm:$0xff] }
 0x2af   :  { %1609 = vperm.xlu1 %3304, %v5192_v40   ;;  %v1595_v7 = vpop.permute.xlu1 %1594  ;;  %v3349_v40 = vld [vmem:[%s6162_s1 + $0xc0] sm:$0xff]   ;;  %vm729_vm8 = vcmp.eq.s32.totalorder %v4308_v51, %v6502_v20  ;;  %v569_v48 = vsel %vm537_vm14, 1, %v6391_v52  ;;  %v952_v6 = vsel %vm920_vm0, 1, %v6391_v52  ;;  %vm1113_vm1 = vcmp.eq.s32.totalorder %v4308_v51, %v4457_v53 }
 0x2b0   :  { %vm1671_vm12 = vcmp.eq.s32.totalorder %v4308_v51, %v1595_v7  ;;  %3012 = vmatprep.subr.bf16.mxu1 %v3349_v40  ;;  %v1766_v13 = vcvt.s32.f32 %v1734_v58  ;;  %v6503_v58 = vld [vmem:[#allocation125_spill] sm:$0xff]  ;;  %vm1304_vm14 = vcmp.eq.s32.totalorder %v4308_v51, %v5225_v24  ;;  %v1145_v56 = vsel %vm1113_vm1, 1, %v6391_v52 }
 0x2b1   :  { %v1703_v2 = vsel %vm1671_vm12, 1, %v6391_v52  ;;  %3013 = vmatpush3.bf16.msra.mxu1 %v3350_v63  ;;  %vm377_vm12 = vcmp.eq.s32.totalorder %v4308_v51, %v6499_v25  ;;  %v5389_v42 = vpop.permute.xlu0 %1228  ;;  %vm921_vm13 = vcmp.eq.s32.totalorder %v4308_v51, %v6503_v58  ;;  %v1144_v63 = vsel %vm1112_vm4, 1, %v6391_v52 }
 0x2b2   :  { %v1735_v35 = vadd.s32 %v1703_v2, %v1543_v12  ;;  %v409_v7 = vsel %vm377_vm12, 1, %v6391_v52  ;;  %v792_v12 = vadd.s32 %v760_v17, %v600_v46  ;;  %v761_v2 = vsel %vm729_vm8, 1, %v6391_v52  ;;  %v6508_v17 = vld [vmem:[#allocation88_spill] sm:$0xff]  ;;  %v6509_v46 = vld [vmem:[#allocation143_spill] sm:$0xff] }
 0x2b3   :  { %v953_v49 = vsel %vm921_vm13, 1, %v6391_v52  ;;  %v1336_v3 = vsel %vm1304_vm14, 1, %v6391_v52  ;;  %vm361_vm4 = vcmp.eq.s32.totalorder %v4308_v51, %v6505_v34  ;;  %vm520_vm13 = vcmp.eq.s32.totalorder %v4308_v51, %v6506_v16 }
 0x2b4   :  { %v1767_v27 = vcvt.s32.f32 %v1735_v35  ;;  %v1265_v0 = vpop.permute.xlu1 %1264  ;;  %v601_v35 = vadd.s32 %v569_v48, %v409_v7  ;;  %v984_v33 = vadd.s32 %v952_v6, %v792_v12  ;;  %vm521_vm1 = vcmp.eq.s32.totalorder %v4308_v51, %v6507_v1 }
 0x2b5   :  { %vm1305_vm0 = vcmp.eq.s32.totalorder %v4308_v51, %v1265_v0  ;;  %v1457_v32 = vpop.permute.xlu0 %1456  ;;  %v6504_v0 = vld [vmem:[#allocation38_spill] sm:$0xff]  ;;  %vm712_vm14 = vcmp.eq.s32.totalorder %v4308_v51, %v6508_v17  ;;  %v393_v12 = vsel %vm361_vm4, 1, %v6391_v52  ;;  %v552_v58 = vsel %vm520_vm13, 1, %v6391_v52 }
 0x2b6   :  { %v5357_v55 = vpack.c.bf16 %v1767_v27, %v1766_v13  ;;  %v793_v13 = vadd.s32 %v761_v2, %v601_v35  ;;  %v1176_v27 = vadd.s32 %v1144_v63, %v984_v33  ;;  %v1337_v53 = vsel %vm1305_vm0, 1, %v6391_v52  ;;  %v6510_v2 = vld [vmem:[#allocation85_spill] sm:$0xff] }
 0x2b7   :  { %vm1497_vm12 = vcmp.eq.s32.totalorder %v4308_v51, %v1457_v32  ;;  %vm360_vm8 = vcmp.eq.s32.totalorder %v4308_v51, %v6504_v0  ;;  %vm1688_vm0 = vcmp.eq.s32.totalorder %v4308_v51, %v6509_v46  ;;  %v744_v63 = vsel %vm712_vm14, 1, %v6391_v52  ;;  %v6515_v46 = vld [vmem:[#allocation27_spill] sm:$0xff] }
 0x2b8   :  { %v5368_v15 = vpop.permute.xlu1 %1213  ;;  %2254 = vmatprep.mubr.bf16.mxu0 %v5357_v55  ;;  %v985_v9 = vadd.s32 %v953_v49, %v793_v13  ;;  %v1368_v47 = vadd.s32 %v1336_v3, %v1176_v27  ;;  %v1529_v48 = vsel %vm1497_vm12, 1, %v6391_v52  ;;  %v392_v6 = vsel %vm360_vm8, 1, %v6391_v52  ;;  %v6511_v49 = vld [vmem:[#allocation107_spill] sm:$0xff] }
 0x2b9   :  { %2799 = vmatmul.mubr.msk.bf16.gmra.mxu0 %vm5363_vm6, %v6240_v37  ;;  %v1720_v35 = vsel %vm1688_vm0, 1, %v6391_v52  ;;  %vm904_vm7 = vcmp.eq.s32.totalorder %v4308_v51, %v6511_v49  ;;  %vm1288_vm14 = vcmp.eq.s32.totalorder %v4308_v51, %v5368_v15  ;;  %vm168_vm0 = vcmp.eq.s32.totalorder %v4308_v51, %v6515_v46 }
 0x2ba   :  { %v1177_v11 = vadd.s32 %v1145_v56, %v985_v9  ;;  %v584_v56 = vadd.s32 %v552_v58, %v392_v6  ;;  %v6512_v9 = vld [vmem:[#allocation113_spill] sm:$0xff]  ;;  %v936_v34 = vsel %vm904_vm7, 1, %v6391_v52  ;;  %vm1289_vm7 = vcmp.eq.s32.totalorder %v4308_v51, %v5264_v61 }
 0x2bb   :  { %vm905_vm8 = vcmp.eq.s32.totalorder %v4308_v51, %v6512_v9  ;;  %v6516_v58 = vmov 0  ;;  %v1321_v61 = vsel %vm1289_vm7, 1, %v6391_v52 }
 0x2bc   :  { %v1369_v20 = vadd.s32 %v1337_v53, %v1177_v11  ;;  %v6513_v53 = vld [vmem:[#allocation136_spill] sm:$0xff]  ;;  %v6514_v11 = vld [vmem:[#allocation26_spill] sm:$0xff]  ;;  %v776_v0 = vadd.s32 %v744_v63, %v584_v56 }
 0x2bd   :  { %v1454_v40 = vpop.permute.xlu1 %1453  ;;  %vm1096_vm4 = vcmp.eq.s32.totalorder %v4308_v51, %v6513_v53  ;;  %vm169_vm13 = vcmp.eq.s32.totalorder %v4308_v51, %v6514_v11 }
 0x2be   :  { %vm1496_vm5 = vcmp.eq.s32.totalorder %v4308_v51, %v1454_v40  ;;  %v553_v40 = vsel %vm521_vm1, 1, %v6391_v52  ;;  %v1561_v13 = vadd.s32 %v1529_v48, %v1369_v20  ;;  %vm1097_vm1 = vcmp.eq.s32.totalorder %v4308_v51, %v4390_v36 }
 0x2bf   :  { %v1528_v24 = vsel %vm1496_vm5, 1, %v6391_v52  ;;  %vm713_vm5 = vcmp.eq.s32.totalorder %v4308_v51, %v6510_v2  ;;  %v1128_v48 = vsel %vm1096_vm4, 1, %v6391_v52  ;;  %v968_v6 = vadd.s32 %v936_v34, %v776_v0  ;;  %v6518_v0 = vld [vmem:[#allocation10_spill] sm:$0xff]  ;;  %v6519_v34 = vld [vmem:[#allocation11_spill] sm:$0xff] }
 0x2c0   :  { %v1560_v7 = vadd.s32 %v1528_v24, %v1368_v47  ;;  %v745_v32 = vsel %vm713_vm5, 1, %v6391_v52  ;;  %v585_v47 = vadd.s32 %v553_v40, %v393_v12  ;;  %v1129_v15 = vsel %vm1097_vm1, 1, %v6391_v52 }
 0x2c1   :  { %v5402_v31 = vpop.permute.xlu1 %1405  ;;  %v1320_v12 = vsel %vm1288_vm14, 1, %v6391_v52  ;;  %v1160_v2 = vadd.s32 %v1128_v48, %v968_v6  ;;  %vm153_vm1 = vcmp.eq.s32.totalorder %v4308_v51, %v6518_v0  ;;  %vm152_vm14 = vcmp.eq.s32.totalorder %v4308_v51, %v6519_v34  ;;  %v6524_v48 = vld [vmem:[#allocation102_spill] sm:$0xff] }
 0x2c2   :  { %v1752_v27 = vadd.s32 %v1720_v35, %v1560_v7  ;;  %v777_v20 = vadd.s32 %v745_v32, %v585_v47  ;;  %v937_v7 = vsel %vm905_vm8, 1, %v6391_v52  ;;  %vm1480_vm5 = vcmp.eq.s32.totalorder %v4308_v51, %v5402_v31 }
 0x2c3   :  { %v1512_v31 = vsel %vm1480_vm5, 1, %v6391_v52 }
 0x2c4   :  { %v1784_v16 = vcvt.s32.f32 %v1752_v27  ;;  %v969_v40 = vadd.s32 %v937_v7, %v777_v20  ;;  %v6522_v20 = vld [vmem:[#allocation75_spill] sm:$0xff]  ;;  %v6523_v7 = vld [vmem:[#allocation52_spill] sm:$0xff] }
 0x2c5   :  { %v1409_v25 = vpop.permute.xlu1 %1408  ;;  %vm538_vm7 = vcmp.eq.s32.totalorder %v4308_v51, %v6522_v20  ;;  %vm378_vm5 = vcmp.eq.s32.totalorder %v4308_v51, %v6523_v7  ;;  %v1463_v7 = vpop.permute.xlu0 %1462 }
 0x2c6   :  { %vm1481_vm8 = vcmp.eq.s32.totalorder %v4308_v51, %v1409_v25  ;;  %v1161_v35 = vadd.s32 %v1129_v15, %v969_v40  ;;  %v570_v6 = vsel %vm538_vm7, 1, %v6391_v52  ;;  %v6526_v40 = vld [vmem:[#allocation78_spill] sm:$0xff] }
 0x2c7   :  { %v1513_v49 = vsel %vm1481_vm8, 1, %v6391_v52  ;;  %vm730_vm8 = vcmp.eq.s32.totalorder %v4308_v51, %v6524_v48 }
 0x2c8   :  { %v1353_v25 = vadd.s32 %v1321_v61, %v1161_v35  ;;  %v410_v61 = vsel %vm378_vm5, 1, %v6391_v52  ;;  %v6528_v35 = vld [vmem:[#allocation99_spill] sm:$0xff]  ;;  %vm1115_vm5 = vcmp.eq.s32.totalorder %v4308_v51, %v4483_v23 }
 0x2c9   :  { %v1147_v34 = vsel %vm1115_vm5, 1, %v6391_v52 }
 0x2ca   :  { %v1649_v33 = vpop.permute.xlu1 %1648 }
 0x2cb   :  { %vm1689_vm12 = vcmp.eq.s32.totalorder %v4308_v51, %v1649_v33  ;;  %v1352_v33 = vadd.s32 %v1320_v12, %v1160_v2  ;;  %v6525_v12 = vld [vmem:[#allocation53_spill] sm:$0xff] }
 0x2cc   :  { %v1721_v3 = vsel %vm1689_vm12, 1, %v6391_v52  ;;  %vm5463_vm12 = vmpackc.low %vm169_vm13, %vm168_vm0  ;;  %v6527_v2 = vld [vmem:[#allocation121_spill] sm:$0xff] }
 0x2cd   :  { %v1753_v24 = vadd.s32 %v1721_v3, %v1561_v13  ;;  %v6517_v58 = vsel %vm5463_vm12, 4294967295, %v6516_v58  ;;  %v1544_v27 = vadd.s32 %v1512_v31, %v1352_v33  ;;  %v1545_v3 = vadd.s32 %v1513_v49, %v1353_v25  ;;  %vm5487_vm0 = vmpackc.low %vm153_vm1, %vm152_vm14 }
 0x2ce   :  { %vm922_vm1 = vcmp.eq.s32.totalorder %v4308_v51, %v6527_v2  ;;  %v762_v31 = vsel %vm730_vm8, 1, %v6391_v52  ;;  %vm731_vm14 = vcmp.eq.s32.totalorder %v4308_v51, %v6528_v35  ;;  %vm1306_vm8 = vcmp.eq.s32.totalorder %v4308_v51, %v5307_v62  ;;  %v6531_v2 = vld [vmem:[#allocation63_spill] sm:$0xff] }
 0x2cf   :  { %v1785_v1 = vcvt.s32.f32 %v1753_v24  ;;  %v5446_v17 = vpop.permute.xlu1 %1075  ;;  %v1338_v20 = vsel %vm1306_vm8, 1, %v6391_v52 }
 0x2d0   :  { %vm1114_vm7 = vcmp.eq.s32.totalorder %v4308_v51, %v5446_v17 }
 0x2d1   :  { %v5456_v36 = vpack.c.bf16 %v1785_v1, %v1784_v16 }
 0x2d3   :  { %2326 = vmatprep.mubr.bf16.mxu1 %v5456_v36 }
 0x2d4   :  { %v1598_v63 = vpop.permute.xlu1 %1597  ;;  %2817 = vmatmul.mubr.msk.bf16.gmra.mxu1 %vm5463_vm12, %v6240_v37 }
 0x2d5   :  { %vm1672_vm4 = vcmp.eq.s32.totalorder %v4308_v51, %v1598_v63  ;;  %v602_v63 = vadd.s32 %v570_v6, %v410_v61  ;;  %v6532_v61 = vld [vmem:[#allocation66_spill] sm:$0xff] }
 0x2d6   :  { %v1704_v13 = vsel %vm1672_vm4, 1, %v6391_v52  ;;  %vm379_vm4 = vcmp.eq.s32.totalorder %v4308_v51, %v6525_v12 }
 0x2d7   :  { %v1736_v32 = vadd.s32 %v1704_v13, %v1544_v27  ;;  %v411_v33 = vsel %vm379_vm4, 1, %v6391_v52  ;;  %v954_v13 = vsel %vm922_vm1, 1, %v6391_v52  ;;  %v794_v25 = vadd.s32 %v762_v31, %v602_v63  ;;  %v6529_v27 = vld [vmem:[#allocation126_spill] sm:$0xff]  ;;  %v6533_v31 = vld [vmem:[#allocation87_spill] sm:$0xff]  ;;  %v6534_v63 = vld [vmem:[#allocation144_spill] sm:$0xff] }
 0x2d8   :  { %v1601_v56 = vpop.permute.xlu1 %1600  ;;  %vm923_vm12 = vcmp.eq.s32.totalorder %v4308_v51, %v6529_v27  ;;  %vm715_vm5 = vcmp.eq.s32.totalorder %v4308_v51, %v6533_v31  ;;  %vm1690_vm8 = vcmp.eq.s32.totalorder %v4308_v51, %v6534_v63 }
 0x2d9   :  { %vm1673_vm13 = vcmp.eq.s32.totalorder %v4308_v51, %v1601_v56  ;;  %v1768_v24 = vcvt.s32.f32 %v1736_v32  ;;  %v1146_v32 = vsel %vm1114_vm7, 1, %v6391_v52  ;;  %v955_v17 = vsel %vm923_vm12, 1, %v6391_v52 }
 0x2da   :  { %v1705_v9 = vsel %vm1673_vm13, 1, %v6391_v52  ;;  %vm539_vm13 = vcmp.eq.s32.totalorder %v4308_v51, %v6526_v40  ;;  %vm1499_vm12 = vcmp.eq.s32.totalorder %v4308_v51, %v1463_v7  ;;  %vm523_vm7 = vcmp.eq.s32.totalorder %v4308_v51, %v6532_v61 }
 0x2db   :  { %v1737_v53 = vadd.s32 %v1705_v9, %v1545_v3  ;;  %v571_v49 = vsel %vm539_vm13, 1, %v6391_v52  ;;  %v763_v3 = vsel %vm731_vm14, 1, %v6391_v52  ;;  %vm522_vm14 = vcmp.eq.s32.totalorder %v4308_v51, %v6531_v2 }
 0x2dc   :  { %v603_v9 = vadd.s32 %v571_v49, %v411_v33  ;;  %v1531_v49 = vsel %vm1499_vm12, 1, %v6391_v52  ;;  %v555_v27 = vsel %vm523_vm7, 1, %v6391_v52 }
 0x2dd   :  { %v1769_v11 = vcvt.s32.f32 %v1737_v53  ;;  %v5479_v47 = vpop.permute.xlu1 %1030  ;;  %v986_v53 = vadd.s32 %v954_v13, %v794_v25  ;;  %v6535_v13 = vld [vmem:[#allocation40_spill] sm:$0xff] }
 0x2de   :  { %vm1099_vm7 = vcmp.eq.s32.totalorder %v4308_v51, %v5479_v47  ;;  %v6540_v47 = vld [vmem:[#allocation29_spill] sm:$0xff] }
 0x2df   :  { %v5485_v16 = vpack.c.bf16 %v1769_v11, %v1768_v24  ;;  %v795_v24 = vadd.s32 %v763_v3, %v603_v9  ;;  %v1178_v11 = vadd.s32 %v1146_v32, %v986_v53  ;;  %v554_v3 = vsel %vm522_vm14, 1, %v6391_v52  ;;  %v6537_v9 = vld [vmem:[#allocation109_spill] sm:$0xff] }
 0x2e0   :  { %v747_v32 = vsel %vm715_vm5, 1, %v6391_v52  ;;  %vm906_vm11 = vcmp.eq.s32.totalorder %v4308_v51, %v6537_v9  ;;  %v1722_v53 = vsel %vm1690_vm8, 1, %v6391_v52  ;;  %vm1098_vm14 = vcmp.eq.s32.totalorder %v4308_v51, %v4507_v38  ;;  %v6539_v38 = vld [vmem:[#allocation28_spill] sm:$0xff] }
 0x2e1   :  { %2262 = vmatprep.mubr.bf16.mxu0 %v5485_v16  ;;  %v987_v48 = vadd.s32 %v955_v17, %v795_v24  ;;  %v1370_v12 = vadd.s32 %v1338_v20, %v1178_v11  ;;  %v6538_v24 = vld [vmem:[#allocation114_spill] sm:$0xff]  ;;  %vm171_vm8 = vcmp.eq.s32.totalorder %v4308_v51, %v6539_v38 }
 0x2e2   :  { %v1271_v46 = vpop.permute.xlu1 %1270  ;;  %2801 = vmatmul.mubr.msk.bf16.gmra.mxu0 %vm5487_vm0, %v6240_v37  ;;  %vm907_vm12 = vcmp.eq.s32.totalorder %v4308_v51, %v6538_v24 }
 0x2e3   :  { %vm1307_vm4 = vcmp.eq.s32.totalorder %v4308_v51, %v1271_v46  ;;  %v1179_v6 = vadd.s32 %v1147_v34, %v987_v48  ;;  %v6530_v46 = vld [vmem:[#allocation41_spill] sm:$0xff]  ;;  %v939_v2 = vsel %vm907_vm12, 1, %v6391_v52  ;;  %vm1291_vm12 = vcmp.eq.s32.totalorder %v4308_v51, %v5333_v8 }
 0x2e4   :  { %v1339_v23 = vsel %vm1307_vm4, 1, %v6391_v52  ;;  %vm363_vm1 = vcmp.eq.s32.totalorder %v4308_v51, %v6530_v46  ;;  %vm362_vm4 = vcmp.eq.s32.totalorder %v4308_v51, %v6535_v13  ;;  %v938_v46 = vsel %vm906_vm11, 1, %v6391_v52 }
 0x2e5   :  { %v1371_v35 = vadd.s32 %v1339_v23, %v1179_v6  ;;  %v395_v25 = vsel %vm363_vm1, 1, %v6391_v52  ;;  %v394_v20 = vsel %vm362_vm4, 1, %v6391_v52  ;;  %vm170_vm4 = vcmp.eq.s32.totalorder %v4308_v51, %v6540_v47 }
 0x2e6   :  { %v5502_v15 = vpop.permute.xlu1 %1219  ;;  %v587_v7 = vadd.s32 %v555_v27, %v395_v25 }
 0x2e7   :  { %v1563_v11 = vadd.s32 %v1531_v49, %v1371_v35  ;;  %vm1290_vm5 = vcmp.eq.s32.totalorder %v4308_v51, %v5502_v15  ;;  %v1131_v49 = vsel %vm1099_vm7, 1, %v6391_v52 }
 0x2eb   :  { %v1460_v56 = vpop.permute.xlu1 %1459 }
 0x2ec   :  { %vm1498_vm13 = vcmp.eq.s32.totalorder %v4308_v51, %v1460_v56  ;;  %v6536_v56 = vld [vmem:[#allocation90_spill] sm:$0xff] }
 0x2ed   :  { %v1530_v62 = vsel %vm1498_vm13, 1, %v6391_v52  ;;  %vm714_vm13 = vcmp.eq.s32.totalorder %v4308_v51, %v6536_v56  ;;  %v1322_v56 = vsel %vm1290_vm5, 1, %v6391_v52 }
 0x2ee   :  { %v1562_v33 = vadd.s32 %v1530_v62, %v1370_v12  ;;  %v746_v48 = vsel %vm714_vm13, 1, %v6391_v52  ;;  %v586_v62 = vadd.s32 %v554_v3, %v394_v20  ;;  %v779_v12 = vadd.s32 %v747_v32, %v587_v7  ;;  %vm5591_vm13 = vmpackc.low %vm171_vm8, %vm170_vm4 }
 0x2ef   :  { %v5530_v0 = vpop.permute.xlu1 %1411  ;;  %v6541_v3 = vmov 0 }
 0x2f0   :  { %v1754_v34 = vadd.s32 %v1722_v53, %v1562_v33  ;;  %v778_v61 = vadd.s32 %v746_v48, %v586_v62  ;;  %v1130_v33 = vsel %vm1098_vm14, 1, %v6391_v52  ;;  %v971_v25 = vadd.s32 %v939_v2, %v779_v12 }
 0x2f1   :  { %vm1482_vm11 = vcmp.eq.s32.totalorder %v4308_v51, %v5530_v0  ;;  %v6542_v3 = vsel %vm5591_vm13, 4294967295, %v6541_v3 }
 0x2f2   :  { %v1786_v31 = vcvt.s32.f32 %v1754_v34  ;;  %v970_v13 = vadd.s32 %v938_v46, %v778_v61  ;;  %v1163_v9 = vadd.s32 %v1131_v49, %v971_v25  ;;  %v1514_v0 = vsel %vm1482_vm11, 1, %v6391_v52  ;;  %v6544_v25 = vld [vmem:[#allocation13_spill] sm:$0xff] }
 0x2f3   :  { %v5537_v40 = vpop.permute.xlu1 %1414  ;;  %v1323_v34 = vsel %vm1291_vm12, 1, %v6391_v52  ;;  %vm154_vm8 = vcmp.eq.s32.totalorder %v4308_v51, %v6544_v25  ;;  %v6557_v25 = vld [vmem:[#allocation42_spill] sm:$0xff] }
 0x2f4   :  { %v1162_v32 = vadd.s32 %v1130_v33, %v970_v13  ;;  %v1355_v48 = vadd.s32 %v1323_v34, %v1163_v9  ;;  %v6543_v13 = vld [vmem:[#allocation12_spill] sm:$0xff]  ;;  %v6550_v34 = vld [vmem:[#allocation55_spill] sm:$0xff] }
 0x2f5   :  { %vm155_vm5 = vcmp.eq.s32.totalorder %v4308_v51, %v6543_v13 }
 0x2f6   :  { %vm5624_vm4 = vmpackc.low %vm155_vm5, %vm154_vm8 }
 0x2f8   :  { %v1655_v17 = vpop.permute.xlu1 %1654 }
 0x2f9   :  { %vm1691_vm1 = vcmp.eq.s32.totalorder %v4308_v51, %v1655_v17 }
 0x2fa   :  { %v1723_v23 = vsel %vm1691_vm1, 1, %v6391_v52  ;;  %vm1483_vm1 = vcmp.eq.s32.totalorder %v4308_v51, %v5537_v40 }
 0x2fb   :  { %v1755_v6 = vadd.s32 %v1723_v23, %v1563_v11  ;;  %v1354_v11 = vadd.s32 %v1322_v56, %v1162_v32  ;;  %v1515_v40 = vsel %vm1483_vm1, 1, %v6391_v52 }
 0x2fc   :  { %v1547_v12 = vadd.s32 %v1515_v40, %v1355_v48  ;;  %v6551_v40 = vld [vmem:[#allocation103_spill] sm:$0xff] }
 0x2fd   :  { %v1787_v63 = vcvt.s32.f32 %v1755_v6  ;;  %v5578_v35 = vpop.permute.xlu1 %1081  ;;  %v1546_v7 = vadd.s32 %v1514_v0, %v1354_v11  ;;  %v6547_v0 = vld [vmem:[#allocation77_spill] sm:$0xff]  ;;  %v6548_v11 = vld [vmem:[#allocation43_spill] sm:$0xff] }
 0x2fe   :  { %vm540_vm11 = vcmp.eq.s32.totalorder %v4308_v51, %v6547_v0  ;;  %vm365_vm12 = vcmp.eq.s32.totalorder %v4308_v51, %v6548_v11  ;;  %v6553_v48 = vld [vmem:[#allocation79_spill] sm:$0xff] }
 0x2ff   :  { %v2950_v15 = vpop.f32.mrf.mxu1  ;;  %v5588_v27 = vpack.c.bf16 %v1787_v63, %v1786_v31  ;;  %vm541_vm8 = vcmp.eq.s32.totalorder %v4308_v51, %v6553_v48  ;;  %v6559_v0 = vld [vmem:[#allocation127_spill] sm:$0xff] }
 0x300   :  { %v573_v13 = vsel %vm541_vm8, 1, %v6391_v52  ;;  %vm925_vm3 = vcmp.eq.s32.totalorder %v4308_v51, %v6559_v0 }
 0x301   :  { %v2951_v53 = vpop.f32.mrf.mxu1  ;;  %2334 = vmatprep.mubr.bf16.mxu1 %v5588_v27 }
 0x302   :  { %v5601_v17 = vadd.f32 %v2951_v53, %v2950_v15  ;;  %v1604_v24 = vpop.permute.xlu1 %1603  ;;  %2819 = vmatmul.mubr.msk.bf16.gmra.mxu1 %vm5591_vm13, %v6240_v37 }
 0x303   :  { %vm1674_vm14 = vcmp.eq.s32.totalorder %v4308_v51, %v1604_v24  ;;  %v2953_v8 = vpop.f32.mrf.mxu1 }
 0x304   :  { %v1706_v20 = vsel %vm1674_vm14, 1, %v6391_v52  ;;  %vm381_vm14 = vcmp.eq.s32.totalorder %v4308_v51, %v6550_v34  ;;  %v6560_v34 = vld [vmem:[#allocation116_spill] sm:$0xff] }
 0x305   :  { %v2954_v23 = vpop.f32.mrf.mxu1  ;;  %v1738_v46 = vadd.s32 %v1706_v20, %v1546_v7  ;;  %v6552_v20 = vld [vmem:[#allocation67_spill] sm:$0xff]  ;;  %v572_v7 = vsel %vm540_vm11, 1, %v6391_v52 }
 0x306   :  { %v5610_v62 = vadd.f32 %v2954_v23, %v2953_v8  ;;  %v1607_v6 = vpop.permute.xlu1 %1606  ;;  %v6549_v8 = vld [vmem:[#allocation54_spill] sm:$0xff]  ;;  %vm525_vm5 = vcmp.eq.s32.totalorder %v4308_v51, %v6552_v20  ;;  %v397_v23 = vsel %vm365_vm12, 1, %v6391_v52  ;;  %vm1116_vm12 = vcmp.eq.s32.totalorder %v4308_v51, %v5578_v35  ;;  %v1469_v35 = vpop.permute.xlu0 %1468 }
 0x307   :  { %vm1675_vm7 = vcmp.eq.s32.totalorder %v4308_v51, %v1607_v6  ;;  %v2956_v2 = vpop.f32.mrf.mxu1  ;;  %v1770_v47 = vcvt.s32.f32 %v1738_v46  ;;  %vm380_vm1 = vcmp.eq.s32.totalorder %v4308_v51, %v6549_v8  ;;  %v1148_v48 = vsel %vm1116_vm12, 1, %v6391_v52 }
 0x308   :  { %v1707_v61 = vsel %vm1675_vm7, 1, %v6391_v52  ;;  %vm732_vm7 = vcmp.eq.s32.totalorder %v4308_v51, %v6551_v40  ;;  %v412_v6 = vsel %vm380_vm1, 1, %v6391_v52  ;;  %vm364_vm1 = vcmp.eq.s32.totalorder %v4308_v51, %v6557_v25 }
 0x309   :  { %v1739_v31 = vadd.s32 %v1707_v61, %v1547_v12  ;;  %v2957_v63 = vpop.f32.mrf.mxu1  ;;  %v6554_v12 = vld [vmem:[#allocation123_spill] sm:$0xff]  ;;  %v6555_v61 = vld [vmem:[#allocation65_spill] sm:$0xff]  ;;  %vm1308_vm12 = vcmp.eq.s32.totalorder %v4308_v51, %v5355_v22 }
 0x30a   :  { %v5614_v38 = vadd.f32 %v2957_v63, %v2956_v2  ;;  %vm924_vm13 = vcmp.eq.s32.totalorder %v4308_v51, %v6554_v12  ;;  %v413_v2 = vsel %vm381_vm14, 1, %v6391_v52  ;;  %v764_v63 = vsel %vm732_vm7, 1, %v6391_v52 }
 0x30b   :  { %v1771_v33 = vcvt.s32.f32 %v1739_v31  ;;  %v5616_v49 = vpop.permute.xlu1 %1036  ;;  %v2959_v15 = vpop.f32.mrf.mxu1  ;;  %v6556_v31 = vld [vmem:[#allocation101_spill] sm:$0xff]  ;;  %vm909_vm7 = vcmp.eq.s32.totalorder %v4308_v51, %v6560_v34  ;;  %vm6561_vm8 = vcmp.eq.s32.totalorder %v4308_v51, %v6555_v61 }
 0x30c   :  { %vm733_vm11 = vcmp.eq.s32.totalorder %v4308_v51, %v6556_v31  ;;  %v556_v40 = vsel %vm6561_vm8, 1, %v6391_v52  ;;  %v941_v0 = vsel %vm909_vm7, 1, %v6391_v52  ;;  %vm1293_vm8 = vcmp.eq.s32.totalorder %v4308_v51, %v5389_v42 }
 0x30d   :  { %v5622_v56 = vpack.c.bf16 %v1771_v33, %v1770_v47  ;;  %v2960_v32 = vpop.f32.mrf.mxu1  ;;  %v557_v47 = vsel %vm525_vm5, 1, %v6391_v52  ;;  %v604_v33 = vadd.s32 %v572_v7, %v412_v6  ;;  %v765_v11 = vsel %vm733_vm11, 1, %v6391_v52 }
 0x30e   :  { %v5628_v53 = vadd.f32 %v2960_v32, %v2959_v15  ;;  %v6558_v15 = vld [vmem:[#allocation89_spill] sm:$0xff]  ;;  %v956_v32 = vsel %vm924_vm13, 1, %v6391_v52  ;;  %vm1117_vm5 = vcmp.eq.s32.totalorder %v4308_v51, %v4527_v21  ;;  %v589_v20 = vadd.s32 %v557_v47, %v397_v23 }
 0x30f   :  { %2270 = vmatprep.mubr.bf16.mxu0 %v5622_v56  ;;  %vm717_vm14 = vcmp.eq.s32.totalorder %v4308_v51, %v6558_v15  ;;  %v796_v8 = vadd.s32 %v764_v63, %v604_v33  ;;  %v605_v7 = vadd.s32 %v573_v13, %v413_v2  ;;  %v6562_v63 = vld [vmem:[#allocation91_spill] sm:$0xff]  ;;  %v957_v21 = vsel %vm925_vm3, 1, %v6391_v52  ;;  %v1658_v13 = vpop.permute.xlu0 %1657 }
 0x310   :  { %v5633_v24 = vpop.permute.xlu1 %1276  ;;  %2803 = vmatmul.mubr.msk.bf16.gmra.mxu0 %vm5624_vm4, %v6240_v37  ;;  %v749_v31 = vsel %vm717_vm14, 1, %v6391_v52  ;;  %vm716_vm13 = vcmp.eq.s32.totalorder %v4308_v51, %v6562_v63  ;;  %v1149_v61 = vsel %vm1117_vm5, 1, %v6391_v52  ;;  %vm1101_vm11 = vcmp.eq.s32.totalorder %v4308_v51, %v5616_v49 }
 0x311   :  { %v988_v33 = vadd.s32 %v956_v32, %v796_v8  ;;  %v797_v15 = vadd.s32 %v765_v11, %v605_v7  ;;  %v396_v32 = vsel %vm364_vm1, 1, %v6391_v52  ;;  %v781_v11 = vadd.s32 %v749_v31, %v589_v20 }
 0x312   :  { %vm1309_vm3 = vcmp.eq.s32.totalorder %v4308_v51, %v5633_v24  ;;  %v588_v37 = vadd.s32 %v556_v40, %v396_v32  ;;  %v1133_v25 = vsel %vm1101_vm11, 1, %v6391_v52  ;;  %v1340_v24 = vsel %vm1308_vm12, 1, %v6391_v52 }
 0x313   :  { %v1180_v2 = vadd.s32 %v1148_v48, %v988_v33  ;;  %v989_v8 = vadd.s32 %v957_v21, %v797_v15  ;;  %v748_v48 = vsel %vm716_vm13, 1, %v6391_v52  ;;  %v973_v20 = vadd.s32 %v941_v0, %v781_v11 }
 0x314   :  { %v5655_v46 = vpop.permute.xlu1 %1225  ;;  %v1341_v33 = vsel %vm1309_vm3, 1, %v6391_v52  ;;  %vm1692_vm1 = vcmp.eq.s32.totalorder %v4308_v51, %v1658_v13  ;;  %vm1100_vm5 = vcmp.eq.s32.totalorder %v4308_v51, %v4552_v50  ;;  %vm1501_vm13 = vcmp.eq.s32.totalorder %v4308_v51, %v1469_v35 }
 0x315   :  { %v1181_v31 = vadd.s32 %v1149_v61, %v989_v8  ;;  %v1372_v21 = vadd.s32 %v1340_v24, %v1180_v2  ;;  %v1165_v22 = vadd.s32 %v1133_v25, %v973_v20  ;;  %v1613_v61 = vpop.permute.xlu0 %1612  ;;  %vm1292_vm12 = vcmp.eq.s32.totalorder %v4308_v51, %v5655_v46 }
 0x316   :  { %v1724_v50 = vsel %vm1692_vm1, 1, %v6391_v52  ;;  %v1132_v42 = vsel %vm1100_vm5, 1, %v6391_v52  ;;  %v1325_v35 = vsel %vm1293_vm8, 1, %v6391_v52  ;;  %v1533_v13 = vsel %vm1501_vm13, 1, %v6391_v52 }
 0x317   :  { %v1373_v2 = vadd.s32 %v1341_v33, %v1181_v31  ;;  %v1357_v8 = vadd.s32 %v1325_v35, %v1165_v22  ;;  %vm1677_vm3 = vcmp.eq.s32.totalorder %v4308_v51, %v1613_v61 }
 0x318   :  { %v1709_v31 = vsel %vm1677_vm3, 1, %v6391_v52  ;;  %vm2673_vm3 = vcmask 261120  }
 0x319   :  { %v1466_v6 = vpop.permute.xlu1 %1465  ;;  %v2962_v12 = vpop.f32.mrf.mxu1 }
 0x31a   :  { %vm1500_vm14 = vcmp.eq.s32.totalorder %v4308_v51, %v1466_v6 }
 0x31b   :  { %v2963_v23 = vpop.f32.mrf.mxu1  ;;  %v1532_v40 = vsel %vm1500_vm14, 1, %v6391_v52 }
 0x31c   :  { %v5695_v47 = vadd.f32 %v2963_v23, %v2962_v12  ;;  %v6563_v12 = vld [vmem:[#allocation111_spill] sm:$0xff]  ;;  %v1564_v0 = vadd.s32 %v1532_v40, %v1372_v21  ;;  %v780_v23 = vadd.s32 %v748_v48, %v588_v37  ;;  %v1324_v37 = vsel %vm1292_vm12, 1, %v6391_v52 }
 0x31d   :  { %v1418_v34 = vpop.permute.xlu1 %1417  ;;  %v2965_v7 = vpop.f32.mrf.mxu1  ;;  %vm908_vm7 = vcmp.eq.s32.totalorder %v4308_v51, %v6563_v12  ;;  %v1565_v12 = vadd.s32 %v1533_v13, %v1373_v2  ;;  %v6568_v13 = vld [vmem:[#allocation14_spill] sm:$0xff] }
 0x31e   :  { %v940_v6 = vsel %vm908_vm7, 1, %v6391_v52  ;;  %vm1484_vm14 = vcmp.eq.s32.totalorder %v4308_v51, %v1418_v34 }
 0x31f   :  { %v2966_v63 = vpop.f32.mrf.mxu1  ;;  %v972_v11 = vadd.s32 %v940_v6, %v780_v23  ;;  %v1516_v20 = vsel %vm1484_vm14, 1, %v6391_v52  ;;  %v6564_v6 = vld [vmem:[#allocation30_spill] sm:$0xff] }
 0x320   :  { %v5722_v15 = vadd.f32 %v2966_v63, %v2965_v7  ;;  %v1756_v7 = vadd.s32 %v1724_v50, %v1564_v0  ;;  %vm173_vm5 = vcmp.eq.s32.totalorder %v4308_v51, %v6564_v6  ;;  %v6565_v0 = vld [vmem:[#allocation31_spill] sm:$0xff] }
 0x321   :  { %v1421_v49 = vpop.permute.xlu1 %1420  ;;  %v1164_v48 = vadd.s32 %v1132_v42, %v972_v11  ;;  %vm172_vm8 = vcmp.eq.s32.totalorder %v4308_v51, %v6565_v0  ;;  %v6570_v11 = vmov 1.0|1.0  }
 0x322   :  { %vm1485_vm11 = vcmp.eq.s32.totalorder %v4308_v51, %v1421_v49  ;;  %v1788_v63 = vcvt.s32.f32 %v1756_v7  ;;  %vm5756_vm13 = vmpackc.low %vm173_vm5, %vm172_vm8 }
 0x323   :  { %v1517_v32 = vsel %vm1485_vm11, 1, %v6391_v52  ;;  %v1356_v40 = vadd.s32 %v1324_v37, %v1164_v48  ;;  %vm157_vm11 = vcmp.eq.s32.totalorder %v4308_v51, %v6568_v13 }
 0x324   :  { %v1549_v25 = vadd.s32 %v1517_v32, %v1357_v8  ;;  %v6569_v32 = vld [vmem:[#allocation15_spill] sm:$0xff] }
 0x325   :  { %v1548_v21 = vadd.s32 %v1516_v20, %v1356_v40  ;;  %vm156_vm12 = vcmp.eq.s32.totalorder %v4308_v51, %v6569_v32 }
 0x326   :  { %v1661_v46 = vpop.permute.xlu1 %1660  ;;  %v1741_v22 = vadd.s32 %v1709_v31, %v1549_v25  ;;  %vm5769_vm14 = vmpackc.low %vm157_vm11, %vm156_vm12 }
 0x327   :  { %vm1693_vm7 = vcmp.eq.s32.totalorder %v4308_v51, %v1661_v46 }
 0x328   :  { %v1725_v24 = vsel %vm1693_vm7, 1, %v6391_v52  ;;  %v1773_v42 = vcvt.s32.f32 %v1741_v22 }
 0x329   :  { %v1757_v34 = vadd.s32 %v1725_v24, %v1565_v12 }
 0x32a   :  { %v1610_v33 = vpop.permute.xlu1 %1609 }
 0x32b   :  { %v1789_v49 = vcvt.s32.f32 %v1757_v34  ;;  %vm1676_vm1 = vcmp.eq.s32.totalorder %v4308_v51, %v1610_v33 }
 0x32c   :  { %v1708_v61 = vsel %vm1676_vm1, 1, %v6391_v52 }
 0x32d   :  { %v1740_v23 = vadd.s32 %v1708_v61, %v1548_v21  ;;  %v5754_v2 = vpack.c.bf16 %v1789_v49, %v1788_v63 }
 0x32f   :  { %v1772_v35 = vcvt.s32.f32 %v1740_v23  ;;  %2342 = vmatprep.mubr.bf16.mxu1 %v5754_v2 }
 0x330   :  { %2821 = vmatmul.mubr.msk.bf16.gmra.mxu1 %vm5756_vm13, %v6570_v11 }
 0x331   :  { %2383 = vmatprep.mubr.bf16.mxu1 %v4414_v60  ;;  %v1797_v52 = vpack.c.bf16 %v1773_v42, %v1772_v35 }
 0x333   :  { %2278 = vmatprep.mubr.bf16.mxu0 %v1797_v52 }
 0x334   :  { %2805 = vmatmul.mubr.msk.bf16.gmra.mxu0 %vm5769_vm14, %v6570_v11 }
 0x335   :  { %2544 = vmatprep.mubr.bf16.mxu0 %v4414_v60 }
 0x338   :  { %2823 = vmatmul.mubr.msk.bf16.vlgmr.msra.gmra.mxu1 %vm4416_vm2, %v6570_v11 }
 0x339   :  { %2391 = vmatprep.mubr.bf16.mxu1 %v4728_v29 }
 0x33c   :  { %2855 = vmatmul.mubr.msk.bf16.vlgmr.msra.gmra.mxu0 %vm4416_vm2, %v6570_v11  ;;  %vm6573_vm2 = vnez %v6408_v4 }
 0x33d   :  { %2552 = vmatprep.mubr.bf16.mxu0 %v4728_v29 }
 0x340   :  { %2825 = vmatmul.mubr.msk.bf16.gmra.mxu1 %vm4736_vm10, %v6570_v11 }
 0x341   :  { %2399 = vmatprep.mubr.bf16.mxu1 %v4893_v59 }
 0x342   :  { %v2968_v51 = vpop.f32.mrf.mxu1 }
 0x344   :  { %v2969_v60 = vpop.f32.mrf.mxu1  ;;  %2857 = vmatmul.mubr.msk.bf16.gmra.mxu0 %vm4736_vm10, %v6570_v11  ;;  %vm6574_vm10 = vnez %v6418_v26 }
 0x345   :  { %v5792_v37 = vadd.f32 %v2969_v60, %v2968_v51  ;;  %2560 = vmatprep.mubr.bf16.mxu0 %v4893_v59 }
 0x346   :  { %v2971_v10 = vpop.f32.mrf.mxu1 }
 0x348   :  { %v2972_v7 = vpop.f32.mrf.mxu1  ;;  %2827 = vmatmul.mubr.msk.bf16.gmra.mxu1 %vm4902_vm15, %v6570_v11 }
 0x349   :  { %v5798_v29 = vadd.f32 %v2972_v7, %v2971_v10  ;;  %2407 = vmatprep.mubr.bf16.mxu1 %v5112_v30 }
 0x34c   :  { %2859 = vmatmul.mubr.msk.bf16.gmra.mxu0 %vm4902_vm15, %v6570_v11  ;;  %vm6575_vm15 = vnez %v6437_v41 }
 0x34d   :  { %2568 = vmatprep.mubr.bf16.mxu0 %v5112_v30 }
 0x350   :  { %2829 = vmatmul.mubr.msk.bf16.gmra.mxu1 %vm5130_vm9, %v6570_v11 }
 0x351   :  { %2415 = vmatprep.mubr.bf16.mxu1 %v5357_v55 }
 0x354   :  { %2861 = vmatmul.mubr.msk.bf16.gmra.mxu0 %vm5130_vm9, %v6570_v11  ;;  %vm6576_vm9 = vnez %v6466_v43 }
 0x355   :  { %2576 = vmatprep.mubr.bf16.mxu0 %v5357_v55 }
 0x358   :  { %2831 = vmatmul.mubr.msk.bf16.gmra.mxu1 %vm5363_vm6, %v6570_v11 }
 0x359   :  { %2423 = vmatprep.mubr.bf16.mxu1 %v5485_v16 }
 0x35c   :  { %2863 = vmatmul.mubr.msk.bf16.gmra.mxu0 %vm5363_vm6, %v6570_v11  ;;  %vm6577_vm6 = vnez %v6491_v44 }
 0x35d   :  { %2584 = vmatprep.mubr.bf16.mxu0 %v5485_v16 }
 0x360   :  { %2833 = vmatmul.mubr.msk.bf16.gmra.mxu1 %vm5487_vm0, %v6570_v11 }
 0x361   :  { %2431 = vmatprep.mubr.bf16.mxu1 %v5622_v56 }
 0x364   :  { %2865 = vmatmul.mubr.msk.bf16.gmra.mxu0 %vm5487_vm0, %v6570_v11  ;;  %vm6578_vm0 = vnez %v6517_v58 }
 0x365   :  { %2592 = vmatprep.mubr.bf16.mxu0 %v5622_v56 }
 0x368   :  { %2835 = vmatmul.mubr.msk.bf16.gmra.mxu1 %vm5624_vm4, %v6570_v11 }
 0x369   :  { %2439 = vmatprep.mubr.bf16.mxu1 %v1797_v52 }
 0x36b   :  { %v2974_v28 = vpop.f32.mrf.mxu1 }
 0x36c   :  { %2867 = vmatmul.mubr.msk.bf16.gmra.mxu0 %vm5624_vm4, %v6570_v11  ;;  %vm6579_vm4 = vnez %v6542_v3 }
 0x36d   :  { %v2975_v59 = vpop.f32.mrf.mxu1  ;;  %2600 = vmatprep.mubr.bf16.mxu0 %v1797_v52 }
 0x36e   :  { %v5835_v18 = vadd.f32 %v2975_v59, %v2974_v28 }
 0x36f   :  { %v2977_v30 = vpop.f32.mrf.mxu1 }
 0x370   :  { %2837 = vmatmul.mubr.msk.bf16.gmra.mxu1 %vm5769_vm14, %v6570_v11 }
 0x371   :  { %v2978_v39 = vpop.f32.mrf.mxu1  ;;  %2447 = vmatprep.mubr.bf16.mxu1 %v4645_v14 }
 0x372   :  { %v5841_v55 = vadd.f32 %v2978_v39, %v2977_v30 }
 0x374   :  { %2869 = vmatmul.mubr.msk.bf16.gmra.mxu0 %vm5769_vm14, %v6570_v11 }
 0x375   :  { %2608 = vmatprep.mubr.bf16.mxu0 %v4645_v14  ;;  %v5875_v14 = vpop.f32.mrf.mxu0 }
 0x378   :  { %2839 = vmatmul.mubr.msk.bf16.gmra.mxu1 %vm6573_vm2, %v6570_v11 }
 0x379   :  { %2455 = vmatprep.mubr.bf16.mxu1 %v4698_v54 }
 0x37c   :  { %2871 = vmatmul.mubr.msk.bf16.gmra.mxu0 %vm6573_vm2, %v6570_v11 }
 0x37d   :  { %2616 = vmatprep.mubr.bf16.mxu0 %v4698_v54  ;;  %v5881_v54 = vpop.f32.mrf.mxu0 }
 0x380   :  { %2841 = vmatmul.mubr.msk.bf16.gmra.mxu1 %vm6574_vm10, %v6570_v11 }
 0x381   :  { %2463 = vmatprep.mubr.bf16.mxu1 %v4832_v19 }
 0x384   :  { %2873 = vmatmul.mubr.msk.bf16.gmra.mxu0 %vm6574_vm10, %v6570_v11 }
 0x385   :  { %2624 = vmatprep.mubr.bf16.mxu0 %v4832_v19 }
 0x388   :  { %2843 = vmatmul.mubr.msk.bf16.gmra.mxu1 %vm6575_vm15, %v6570_v11 }
 0x389   :  { %2471 = vmatprep.mubr.bf16.mxu1 %v5009_v45 }
 0x38c   :  { %2875 = vmatmul.mubr.msk.bf16.gmra.mxu0 %vm6575_vm15, %v6570_v11 }
 0x38d   :  { %2632 = vmatprep.mubr.bf16.mxu0 %v5009_v45  ;;  %v5889_v45 = vpop.f32.mrf.mxu0 }
 0x38f   :  { %v5897_v43 = vpop.f32.mrf.mxu0 }
 0x390   :  { %2845 = vmatmul.mubr.msk.bf16.gmra.mxu1 %vm6576_vm9, %v6570_v11 }
 0x391   :  { %2479 = vmatprep.mubr.bf16.mxu1 %v5285_v57 }
 0x394   :  { %v2980_v4 = vpop.f32.mrf.mxu1  ;;  %2877 = vmatmul.mubr.msk.bf16.gmra.mxu0 %vm6576_vm9, %v6570_v11 }
 0x395   :  { %2640 = vmatprep.mubr.bf16.mxu0 %v5285_v57  ;;  %v5899_v57 = vpop.f32.mrf.mxu0 }
 0x396   :  { %v2981_v26 = vpop.f32.mrf.mxu1 }
 0x397   :  { %v5883_v19 = vadd.f32 %v2981_v26, %v2980_v4  ;;  %v5905_v1 = vpop.f32.mrf.mxu0  ;;  %v2904_v26 = vadd.f32 %v5881_v54, %v5875_v14 }
 0x398   :  { %v2983_v41 = vpop.f32.mrf.mxu1  ;;  %2847 = vmatmul.mubr.msk.bf16.gmra.mxu1 %vm6577_vm6, %v6570_v11 }
 0x399   :  { %2487 = vmatprep.mubr.bf16.mxu1 %v5456_v36  ;;  %v5911_v44 = vpop.f32.mrf.mxu0 }
 0x39a   :  { %v2984_v5 = vpop.f32.mrf.mxu1 }
 0x39b   :  { %v5891_v16 = vadd.f32 %v2984_v5, %v2983_v41 }
 0x39c   :  { %2879 = vmatmul.mubr.msk.bf16.gmra.mxu0 %vm6577_vm6, %v6570_v11 }
 0x39d   :  { %2648 = vmatprep.mubr.bf16.mxu0 %v5456_v36  ;;  %v5917_v36 = vpop.f32.mrf.mxu0 }
 0x39f   :  { %v5923_v58 = vpop.f32.mrf.mxu0 }
 0x3a0   :  { %2849 = vmatmul.mubr.msk.bf16.gmra.mxu1 %vm6578_vm0, %v6570_v11 }
 0x3a1   :  { %2495 = vmatprep.mubr.bf16.mxu1 %v5588_v27 }
 0x3a4   :  { %2881 = vmatmul.mubr.msk.bf16.gmra.mxu0 %vm6578_vm0, %v6570_v11 }
 0x3a5   :  { %2656 = vmatprep.mubr.bf16.mxu0 %v5588_v27  ;;  %v5928_v27 = vpop.f32.mrf.mxu0 }
 0x3a7   :  { %v5933_v56 = vpop.f32.mrf.mxu0 }
 0x3a8   :  { %2851 = vmatmul.mubr.msk.bf16.gmra.mxu1 %vm6579_vm4, %v6570_v11 }
 0x3a9   :  { %2503 = vmatprep.mubr.bf16.mxu1 %v5754_v2  ;;  %v5935_v9 = vpop.f32.mrf.mxu0 }
 0x3ab   :  { %v5937_v3 = vpop.f32.mrf.mxu0 }
 0x3ac   :  { %2883 = vmatmul.mubr.msk.bf16.gmra.mxu0 %vm6579_vm4, %v6570_v11 }
 0x3ad   :  { %2664 = vmatprep.mubr.bf16.mxu0 %v5754_v2  ;;  %v5939_v46 = vpop.f32.mrf.mxu0 }
 0x3af   :  { %v5941_v12 = vpop.f32.mrf.mxu0 }
 0x3b0   :  { %2853 = vmatmul.mubr.msk.bf16.gmra.mxu1 %vm5756_vm13, %v6570_v11 }
 0x3b1   :  { %v5945_v24 = vpop.f32.mrf.mxu0 }
 0x3b3   :  { %v5949_v63 = vpop.f32.mrf.mxu0 }
 0x3b4   :  { %2885 = vmatmul.mubr.msk.bf16.gmra.mxu0 %vm5756_vm13, %v6570_v11 }
 0x3b5   :  { %v5951_v33 = vpop.f32.mrf.mxu0 }
 0x3b7   :  { %v5953_v21 = vpop.f32.mrf.mxu0 }
 0x3b9   :  { %v5955_v22 = vpop.f32.mrf.mxu0 }
 0x3bb   :  { %v5957_v49 = vpop.f32.mrf.mxu0 }
 0x3bd   :  { %v5959_v6 = vpop.f32.mrf.mxu0 }
 0x3bf   :  { %v5961_v0 = vpop.f32.mrf.mxu0 }
 0x3c1   :  { %v5963_v61 = vpop.f32.mrf.mxu0 }
 0x3c2   :  { %v2986_v48 = vpop.f32.mrf.mxu1 }
 0x3c4   :  { %v2987_v25 = vpop.f32.mrf.mxu1 }
 0x3c5   :  { %v5943_v20 = vadd.f32 %v2987_v25, %v2986_v48 }
 0x3c6   :  { %v2989_v31 = vpop.f32.mrf.mxu1 }
 0x3c8   :  { %v2990_v40 = vpop.f32.mrf.mxu1 }
 0x3c9   :  { %v5947_v34 = vadd.f32 %v2990_v40, %v2989_v31 }
 0x3d0   :  { %v5965_v23 = vpop.f32.mrf.mxu0 }
 0x3d2   :  { %v5967_v2 = vpop.f32.mrf.mxu0 }
 0x3d4   :  { %v5969_v50 = vpop.f32.mrf.mxu0 }
 0x3d6   :  { %v5971_v35 = vpop.f32.mrf.mxu0 }
 0x3f0   :  { %v2992_v42 = vpop.f32.mrf.mxu1 }
 0x3f2   :  { %v2993_v13 = vpop.f32.mrf.mxu1 }
 0x3f3   :  { %v5973_v32 = vadd.f32 %v2993_v13, %v2992_v42  ;;  %v2907_v13 = vadd.f32 %v5897_v43, %v5889_v45 }
 0x3f4   :  { %v5975_v11 = vpop.f32.mrf.mxu0  ;;  %v2995_v52 = vpop.f32.mrf.mxu1 }
 0x3f6   :  { %v5977_v8 = vpop.f32.mrf.mxu0  ;;  %v2996_v51 = vpop.f32.mrf.mxu1 }
 0x3f7   :  { %v5979_v60 = vadd.f32 %v2996_v51, %v2995_v52 }
 0x3f8   :  { %v5981_v10 = vpop.f32.mrf.mxu0  ;;  %v3014_v7 = vpop.f32.mrf.mxu1 }
 0x3f9   :  { %6580 = vst [vmem:[#allocation132_spill] sm:$0xff] %v5979_v60 }
 0x3fa   :  { %v5983_v28 = vpop.f32.mrf.mxu0  ;;  %v3015_v59 = vpop.f32.mrf.mxu1 }
 0x3fb   :  { %v3016_v30 = vadd.f32 %v3015_v59, %v3014_v7 }
 0x3fc   :  { %v3017_v39 = vpop.f32.mrf.mxu1  ;;  %v3126_v4 = vpop.f32.mrf.mxu0 }
 0x3fd   :  { %v2386_v48 = vadd.f32 %v3016_v30, %v2904_v26 }
 0x3fe   :  { %v3018_v41 = vpop.f32.mrf.mxu1  ;;  %v3127_v5 = vpop.f32.mrf.mxu0 }
 0x3ff   :  { %v3019_v25 = vadd.f32 %v3018_v41, %v3017_v39  ;;  %v3128_v31 = vadd.f32 %v3127_v5, %v3126_v4  ;;  %v2910_v39 = vadd.f32 %v5905_v1, %v5899_v57 }
 0x400   :  { %v3020_v40 = vpop.f32.mrf.mxu1  ;;  %v3129_v42 = vpop.f32.mrf.mxu0 }
 0x401   :  { %v2547_v52 = vadd.f32 %v3128_v31, %v2386_v48  ;;  %v2389_v7 = vadd.f32 %v3019_v25, %v2907_v13 }
 0x402   :  { %v3021_v51 = vpop.f32.mrf.mxu1  ;;  %v3130_v60 = vpop.f32.mrf.mxu0 }
 0x403   :  { %2674 = vst.msk [vmem:[%s6163_s2] sm:$0xff] %vm2673_vm3, %v2547_v52  ;;  %v3022_v14 = vadd.f32 %v3021_v51, %v3020_v40  ;;  %v3131_v54 = vadd.f32 %v3130_v60, %v3129_v42  ;;  %v2913_v60 = vadd.f32 %v5917_v36, %v5911_v44 }
 0x404   :  { %v3023_v59 = vpop.f32.mrf.mxu1  ;;  %v3132_v30 = vpop.f32.mrf.mxu0 }
 0x405   :  { %v2550_v4 = vadd.f32 %v3131_v54, %v2389_v7  ;;  %v2394_v45 = vadd.f32 %v3022_v14, %v2910_v39  ;;  %v2916_v7 = vadd.f32 %v5928_v27, %v5923_v58 }
 0x406   :  { %v3024_v26 = vpop.f32.mrf.mxu1  ;;  %v3133_v41 = vpop.f32.mrf.mxu0 }
 0x407   :  { %2675 = vst.msk [vmem:[%s6163_s2 + $0x8] sm:$0xff] %vm2673_vm3, %v2550_v4  ;;  %v3025_v43 = vadd.f32 %v3024_v26, %v3023_v59  ;;  %v3134_v5 = vadd.f32 %v3133_v41, %v3132_v30  ;;  %v2919_v26 = vadd.f32 %v5935_v9, %v5933_v56 }
 0x408   :  { %v3026_v48 = vpop.f32.mrf.mxu1  ;;  %v3135_v25 = vpop.f32.mrf.mxu0 }
 0x409   :  { %v2555_v31 = vadd.f32 %v3134_v5, %v2394_v45  ;;  %v2397_v57 = vadd.f32 %v3025_v43, %v2913_v60  ;;  %v2922_v60 = vadd.f32 %v5939_v46, %v5937_v3 }
 0x40a   :  { %v3027_v40 = vpop.f32.mrf.mxu1  ;;  %v3136_v42 = vpop.f32.mrf.mxu0 }
 0x40b   :  { %2676 = vst.msk [vmem:[%s6163_s2 + $0x10] sm:$0xff] %vm2673_vm3, %v2555_v31  ;;  %v3028_v1 = vadd.f32 %v3027_v40, %v3026_v48  ;;  %v3137_v13 = vadd.f32 %v3136_v42, %v3135_v25 }
 0x40c   :  { %v3029_v52 = vpop.f32.mrf.mxu1  ;;  %v3138_v51 = vpop.f32.mrf.mxu0 }
 0x40d   :  { %v2558_v14 = vadd.f32 %v3137_v13, %v2397_v57  ;;  %v2402_v44 = vadd.f32 %v3028_v1, %v2916_v7 }
 0x40e   :  { %v3030_v54 = vpop.f32.mrf.mxu1  ;;  %v3139_v59 = vpop.f32.mrf.mxu0 }
 0x40f   :  { %2677 = vst.msk [vmem:[%s6163_s2 + $0x18] sm:$0xff] %vm2673_vm3, %v2558_v14  ;;  %v3031_v36 = vadd.f32 %v3030_v54, %v3029_v52  ;;  %v3140_v30 = vadd.f32 %v3139_v59, %v3138_v51  ;;  %v2925_v52 = vadd.f32 %v5945_v24, %v5941_v12 }
 0x410   :  { %v3032_v39 = vpop.f32.mrf.mxu1  ;;  %v3141_v4 = vpop.f32.mrf.mxu0 }
 0x411   :  { %v2563_v41 = vadd.f32 %v3140_v30, %v2402_v44  ;;  %v2405_v58 = vadd.f32 %v3031_v36, %v2919_v26  ;;  %v2928_v36 = vadd.f32 %v5951_v33, %v5949_v63 }
 0x412   :  { %v3033_v45 = vpop.f32.mrf.mxu1  ;;  %v3142_v43 = vpop.f32.mrf.mxu0 }
 0x413   :  { %2678 = vst.msk [vmem:[%s6163_s2 + $0x20] sm:$0xff] %vm2673_vm3, %v2563_v41  ;;  %v3034_v27 = vadd.f32 %v3033_v45, %v3032_v39  ;;  %v3143_v5 = vadd.f32 %v3142_v43, %v3141_v4  ;;  %v2931_v43 = vadd.f32 %v5955_v22, %v5953_v21 }
 0x414   :  { %v3035_v48 = vpop.f32.mrf.mxu1  ;;  %v3144_v25 = vpop.f32.mrf.mxu0 }
 0x415   :  { %v2566_v31 = vadd.f32 %v3143_v5, %v2405_v58  ;;  %v2410_v56 = vadd.f32 %v3034_v27, %v2922_v60 }
 0x416   :  { %v3036_v40 = vpop.f32.mrf.mxu1  ;;  %v3145_v42 = vpop.f32.mrf.mxu0 }
 0x417   :  { %2679 = vst.msk [vmem:[%s6163_s2 + $0x28] sm:$0xff] %vm2673_vm3, %v2566_v31  ;;  %v3037_v9 = vadd.f32 %v3036_v40, %v3035_v48  ;;  %v3146_v57 = vadd.f32 %v3145_v42, %v3144_v25  ;;  %v2934_v31 = vadd.f32 %v5959_v6, %v5957_v49 }
 0x418   :  { %v3038_v1 = vpop.f32.mrf.mxu1  ;;  %v3147_v13 = vpop.f32.mrf.mxu0 }
 0x419   :  { %v2571_v51 = vadd.f32 %v3146_v57, %v2410_v56  ;;  %v2413_v3 = vadd.f32 %v3037_v9, %v2925_v52 }
 0x41a   :  { %v3039_v7 = vpop.f32.mrf.mxu1  ;;  %v3148_v14 = vpop.f32.mrf.mxu0 }
 0x41b   :  { %2680 = vst.msk [vmem:[%s6163_s2 + $0x30] sm:$0xff] %vm2673_vm3, %v2571_v51  ;;  %v3040_v46 = vadd.f32 %v3039_v7, %v3038_v1  ;;  %v3149_v54 = vadd.f32 %v3148_v14, %v3147_v13  ;;  %v2937_v13 = vadd.f32 %v5963_v61, %v5961_v0 }
 0x41c   :  { %v3041_v59 = vpop.f32.mrf.mxu1  ;;  %v3150_v44 = vpop.f32.mrf.mxu0 }
 0x41d   :  { %v2574_v30 = vadd.f32 %v3149_v54, %v2413_v3  ;;  %v2418_v12 = vadd.f32 %v3040_v46, %v2928_v36  ;;  %v2940_v54 = vadd.f32 %v5967_v2, %v5965_v23 }
 0x41e   :  { %v3042_v39 = vpop.f32.mrf.mxu1  ;;  %v3151_v4 = vpop.f32.mrf.mxu0 }
 0x41f   :  { %2681 = vst.msk [vmem:[%s6163_s2 + $0x38] sm:$0xff] %vm2673_vm3, %v2574_v30  ;;  %v3043_v24 = vadd.f32 %v3042_v39, %v3041_v59  ;;  %v3152_v26 = vadd.f32 %v3151_v4, %v3150_v44 }
 0x420   :  { %v3044_v41 = vpop.f32.mrf.mxu1  ;;  %v3153_v45 = vpop.f32.mrf.mxu0 }
 0x421   :  { %v2579_v58 = vadd.f32 %v3152_v26, %v2418_v12  ;;  %v2421_v63 = vadd.f32 %v3043_v24, %v2931_v43  ;;  %v2943_v12 = vadd.f32 %v5971_v35, %v5969_v50 }
 0x422   :  { %v3045_v27 = vpop.f32.mrf.mxu1  ;;  %v3154_v5 = vpop.f32.mrf.mxu0 }
 0x423   :  { %2682 = vst.msk [vmem:[%s6163_s2 + $0x40] sm:$0xff] %vm2673_vm3, %v2579_v58  ;;  %v3046_v33 = vadd.f32 %v3045_v27, %v3044_v41  ;;  %v3155_v48 = vadd.f32 %v3154_v5, %v3153_v45  ;;  %v2946_v27 = vadd.f32 %v5977_v8, %v5975_v11 }
 0x424   :  { %v3047_v25 = vpop.f32.mrf.mxu1  ;;  %v3156_v60 = vpop.f32.mrf.mxu0 }
 0x425   :  { %v2582_v40 = vadd.f32 %v3155_v48, %v2421_v63  ;;  %v2426_v21 = vadd.f32 %v3046_v33, %v2934_v31  ;;  %v2949_v31 = vadd.f32 %v5983_v28, %v5981_v10 }
 0x426   :  { %v3048_v42 = vpop.f32.mrf.mxu1  ;;  %v3157_v56 = vpop.f32.mrf.mxu0 }
 0x427   :  { %2683 = vst.msk [vmem:[%s6163_s2 + $0x48] sm:$0xff] %vm2673_vm3, %v2582_v40  ;;  %v3049_v22 = vadd.f32 %v3048_v42, %v3047_v25  ;;  %v3158_v9 = vadd.f32 %v3157_v56, %v3156_v60 }
 0x428   :  { %v3050_v57 = vpop.f32.mrf.mxu1  ;;  %v3159_v1 = vpop.f32.mrf.mxu0 }
 0x429   :  { %v2587_v52 = vadd.f32 %v3158_v9, %v2426_v21  ;;  %v2429_v49 = vadd.f32 %v3049_v22, %v2937_v13 }
 0x42a   :  { %v3051_v51 = vpop.f32.mrf.mxu1  ;;  %v3160_v7 = vpop.f32.mrf.mxu0 }
 0x42b   :  { %2684 = vst.msk [vmem:[%s6163_s2 + $0x50] sm:$0xff] %vm2673_vm3, %v2587_v52  ;;  %v3052_v6 = vadd.f32 %v3051_v51, %v3050_v57  ;;  %v3161_v14 = vadd.f32 %v3160_v7, %v3159_v1 }
 0x42c   :  { %v3053_v3 = vpop.f32.mrf.mxu1  ;;  %v3162_v46 = vpop.f32.mrf.mxu0 }
 0x42d   :  { %v2590_v59 = vadd.f32 %v3161_v14, %v2429_v49  ;;  %v2434_v0 = vadd.f32 %v3052_v6, %v2940_v54 }
 0x42e   :  { %v3054_v44 = vpop.f32.mrf.mxu1  ;;  %v3163_v36 = vpop.f32.mrf.mxu0 }
 0x42f   :  { %2685 = vst.msk [vmem:[%s6163_s2 + $0x58] sm:$0xff] %vm2673_vm3, %v2590_v59  ;;  %v3055_v61 = vadd.f32 %v3054_v44, %v3053_v3  ;;  %v3164_v30 = vadd.f32 %v3163_v36, %v3162_v46 }
 0x430   :  { %v3056_v39 = vpop.f32.mrf.mxu1  ;;  %v3165_v4 = vpop.f32.mrf.mxu0 }
 0x431   :  { %v2595_v24 = vadd.f32 %v3164_v30, %v2434_v0  ;;  %v2437_v23 = vadd.f32 %v3055_v61, %v2943_v12 }
 0x432   :  { %v3057_v26 = vpop.f32.mrf.mxu1  ;;  %v3166_v41 = vpop.f32.mrf.mxu0 }
 0x433   :  { %2686 = vst.msk [vmem:[%s6163_s2 + $0x60] sm:$0xff] %vm2673_vm3, %v2595_v24  ;;  %v3058_v2 = vadd.f32 %v3057_v26, %v3056_v39  ;;  %v3167_v45 = vadd.f32 %v3166_v41, %v3165_v4 }
 0x434   :  { %v3059_v43 = vpop.f32.mrf.mxu1  ;;  %v3168_v58 = vpop.f32.mrf.mxu0 }
 0x435   :  { %v2598_v5 = vadd.f32 %v3167_v45, %v2437_v23  ;;  %v2442_v50 = vadd.f32 %v3058_v2, %v2946_v27 }
 0x436   :  { %v3060_v63 = vpop.f32.mrf.mxu1  ;;  %v3169_v33 = vpop.f32.mrf.mxu0 }
 0x437   :  { %2687 = vst.msk [vmem:[%s6163_s2 + $0x68] sm:$0xff] %vm2673_vm3, %v2598_v5  ;;  %v3061_v35 = vadd.f32 %v3060_v63, %v3059_v43  ;;  %v3170_v48 = vadd.f32 %v3169_v33, %v3168_v58 }
 0x438   :  { %v3062_v25 = vpop.f32.mrf.mxu1  ;;  %v3171_v60 = vpop.f32.mrf.mxu0 }
 0x439   :  { %v2603_v40 = vadd.f32 %v3170_v48, %v2442_v50  ;;  %v2445_v11 = vadd.f32 %v3061_v35, %v2949_v31 }
 0x43a   :  { %v3063_v42 = vpop.f32.mrf.mxu1  ;;  %v3172_v56 = vpop.f32.mrf.mxu0 }
 0x43b   :  { %2688 = vst.msk [vmem:[%s6163_s2 + $0x70] sm:$0xff] %vm2673_vm3, %v2603_v40  ;;  %v3064_v8 = vadd.f32 %v3063_v42, %v3062_v25  ;;  %v3173_v21 = vadd.f32 %v3172_v56, %v3171_v60 }
 0x43c   :  { %v3065_v22 = vpop.f32.mrf.mxu1  ;;  %v3174_v9 = vpop.f32.mrf.mxu0 }
 0x43d   :  { %v2606_v57 = vadd.f32 %v3173_v21, %v2445_v11  ;;  %v2450_v52 = vadd.f32 %v3064_v8, %v5601_v17 }
 0x43e   :  { %v3066_v1 = vpop.f32.mrf.mxu1  ;;  %v3175_v13 = vpop.f32.mrf.mxu0 }
 0x43f   :  { %2689 = vst.msk [vmem:[%s6163_s2 + $0x78] sm:$0xff] %vm2673_vm3, %v2606_v57  ;;  %v3067_v10 = vadd.f32 %v3066_v1, %v3065_v22  ;;  %v3176_v28 = vadd.f32 %v3175_v13, %v3174_v9 }
 0x440   :  { %v3068_v51 = vpop.f32.mrf.mxu1  ;;  %v3177_v7 = vpop.f32.mrf.mxu0 }
 0x441   :  { %v2611_v49 = vadd.f32 %v3176_v28, %v2450_v52  ;;  %v2453_v3 = vadd.f32 %v3067_v10, %v5610_v62 }
 0x442   :  { %v3069_v6 = vpop.f32.mrf.mxu1  ;;  %v3178_v14 = vpop.f32.mrf.mxu0 }
 0x443   :  { %2690 = vst.msk [vmem:[%s6163_s2 + $0x80] sm:$0xff] %vm2673_vm3, %v2611_v49  ;;  %v3070_v17 = vadd.f32 %v3069_v6, %v3068_v51  ;;  %v3179_v46 = vadd.f32 %v3178_v14, %v3177_v7 }
 0x444   :  { %v3071_v54 = vpop.f32.mrf.mxu1  ;;  %v3180_v59 = vpop.f32.mrf.mxu0 }
 0x445   :  { %v2614_v44 = vadd.f32 %v3179_v46, %v2453_v3  ;;  %v2458_v61 = vadd.f32 %v3070_v17, %v5614_v38 }
 0x446   :  { %v3072_v36 = vpop.f32.mrf.mxu1  ;;  %v3181_v0 = vpop.f32.mrf.mxu0 }
 0x447   :  { %2691 = vst.msk [vmem:[%s6163_s2 + $0x88] sm:$0xff] %vm2673_vm3, %v2614_v44  ;;  %v3073_v62 = vadd.f32 %v3072_v36, %v3071_v54  ;;  %v3182_v30 = vadd.f32 %v3181_v0, %v3180_v59 }
 0x448   :  { %v3074_v39 = vpop.f32.mrf.mxu1  ;;  %v3183_v4 = vpop.f32.mrf.mxu0 }
 0x449   :  { %v2619_v12 = vadd.f32 %v3182_v30, %v2458_v61  ;;  %v2461_v41 = vadd.f32 %v3073_v62, %v5628_v53 }
 0x44a   :  { %v3075_v24 = vpop.f32.mrf.mxu1  ;;  %v3184_v26 = vpop.f32.mrf.mxu0 }
 0x44b   :  { %2692 = vst.msk [vmem:[%s6163_s2 + $0x90] sm:$0xff] %vm2673_vm3, %v2619_v12  ;;  %v3076_v38 = vadd.f32 %v3075_v24, %v3074_v39  ;;  %v3185_v23 = vadd.f32 %v3184_v26, %v3183_v4 }
 0x44c   :  { %v3077_v2 = vpop.f32.mrf.mxu1  ;;  %v3186_v45 = vpop.f32.mrf.mxu0 }
 0x44d   :  { %v2622_v43 = vadd.f32 %v3185_v23, %v2461_v41  ;;  %v2466_v5 = vadd.f32 %v3076_v38, %v5695_v47 }
 0x44e   :  { %v3078_v58 = vpop.f32.mrf.mxu1  ;;  %v3187_v27 = vpop.f32.mrf.mxu0 }
 0x44f   :  { %2693 = vst.msk [vmem:[%s6163_s2 + $0x98] sm:$0xff] %vm2673_vm3, %v2622_v43  ;;  %v3079_v53 = vadd.f32 %v3078_v58, %v3077_v2  ;;  %v3188_v63 = vadd.f32 %v3187_v27, %v3186_v45 }
 0x450   :  { %v3080_v33 = vpop.f32.mrf.mxu1  ;;  %v3189_v50 = vpop.f32.mrf.mxu0 }
 0x451   :  { %v2627_v35 = vadd.f32 %v3188_v63, %v2466_v5  ;;  %v2469_v60 = vadd.f32 %v3079_v53, %v5722_v15 }
 0x452   :  { %v3081_v48 = vpop.f32.mrf.mxu1  ;;  %v3190_v25 = vpop.f32.mrf.mxu0 }
 0x453   :  { %2694 = vst.msk [vmem:[%s6163_s2 + $0xa0] sm:$0xff] %vm2673_vm3, %v2627_v35  ;;  %v3082_v47 = vadd.f32 %v3081_v48, %v3080_v33  ;;  %v3191_v31 = vadd.f32 %v3190_v25, %v3189_v50 }
 0x454   :  { %v3083_v40 = vpop.f32.mrf.mxu1  ;;  %v3192_v42 = vpop.f32.mrf.mxu0 }
 0x455   :  { %v2630_v56 = vadd.f32 %v3191_v31, %v2469_v60  ;;  %v2474_v21 = vadd.f32 %v3082_v47, %v5792_v37 }
 0x456   :  { %v3084_v11 = vpop.f32.mrf.mxu1  ;;  %v3193_v8 = vpop.f32.mrf.mxu0 }
 0x457   :  { %2695 = vst.msk [vmem:[%s6163_s2 + $0xa8] sm:$0xff] %vm2673_vm3, %v2630_v56  ;;  %v3085_v15 = vadd.f32 %v3084_v11, %v3083_v40  ;;  %v3194_v22 = vadd.f32 %v3193_v8, %v3192_v42 }
 0x458   :  { %v3086_v9 = vpop.f32.mrf.mxu1  ;;  %v3195_v57 = vpop.f32.mrf.mxu0 }
 0x459   :  { %v2635_v1 = vadd.f32 %v3194_v22, %v2474_v21  ;;  %v2477_v10 = vadd.f32 %v3085_v15, %v5798_v29 }
 0x45a   :  { %v3087_v13 = vpop.f32.mrf.mxu1  ;;  %v3196_v52 = vpop.f32.mrf.mxu0 }
 0x45b   :  { %2696 = vst.msk [vmem:[%s6163_s2 + $0xb0] sm:$0xff] %vm2673_vm3, %v2635_v1  ;;  %v3088_v37 = vadd.f32 %v3087_v13, %v3086_v9  ;;  %v3197_v28 = vadd.f32 %v3196_v52, %v3195_v57  ;;  %v6581_v52 = vld [vmem:[#allocation132_spill] sm:$0xff] }
 0x45c   :  { %v3089_v51 = vpop.f32.mrf.mxu1  ;;  %v3198_v7 = vpop.f32.mrf.mxu0 }
 0x45d   :  { %v2638_v49 = vadd.f32 %v3197_v28, %v2477_v10  ;;  %v2482_v3 = vadd.f32 %v3088_v37, %v5835_v18 }
 0x45e   :  { %v3090_v6 = vpop.f32.mrf.mxu1  ;;  %v3199_v14 = vpop.f32.mrf.mxu0 }
 0x45f   :  { %2697 = vst.msk [vmem:[%s6163_s2 + $0xb8] sm:$0xff] %vm2673_vm3, %v2638_v49  ;;  %v3091_v29 = vadd.f32 %v3090_v6, %v3089_v51  ;;  %v3200_v17 = vadd.f32 %v3199_v14, %v3198_v7 }
 0x460   :  { %v3092_v46 = vpop.f32.mrf.mxu1  ;;  %v3201_v54 = vpop.f32.mrf.mxu0 }
 0x461   :  { %v2643_v59 = vadd.f32 %v3200_v17, %v2482_v3  ;;  %v2485_v0 = vadd.f32 %v3091_v29, %v5841_v55 }
 0x462   :  { %v3093_v44 = vpop.f32.mrf.mxu1  ;;  %v3202_v36 = vpop.f32.mrf.mxu0 }
 0x463   :  { %2698 = vst.msk [vmem:[%s6163_s2 + $0xc0] sm:$0xff] %vm2673_vm3, %v2643_v59  ;;  %v3094_v18 = vadd.f32 %v3093_v44, %v3092_v46  ;;  %v3203_v61 = vadd.f32 %v3202_v36, %v3201_v54 }
 0x464   :  { %v3095_v62 = vpop.f32.mrf.mxu1  ;;  %v3204_v30 = vpop.f32.mrf.mxu0 }
 0x465   :  { %v2646_v39 = vadd.f32 %v3203_v61, %v2485_v0  ;;  %v2490_v24 = vadd.f32 %v3094_v18, %v5883_v19 }
 0x466   :  { %v3096_v4 = vpop.f32.mrf.mxu1  ;;  %v3205_v12 = vpop.f32.mrf.mxu0 }
 0x467   :  { %2699 = vst.msk [vmem:[%s6163_s2 + $0xc8] sm:$0xff] %vm2673_vm3, %v2646_v39  ;;  %v3097_v55 = vadd.f32 %v3096_v4, %v3095_v62  ;;  %v3206_v26 = vadd.f32 %v3205_v12, %v3204_v30 }
 0x468   :  { %v3098_v41 = vpop.f32.mrf.mxu1  ;;  %v3207_v38 = vpop.f32.mrf.mxu0 }
 0x469   :  { %v2651_v23 = vadd.f32 %v3206_v26, %v2490_v24  ;;  %v2493_v43 = vadd.f32 %v3097_v55, %v5891_v16 }
 0x46a   :  { %v3099_v2 = vpop.f32.mrf.mxu1  ;;  %v3208_v45 = vpop.f32.mrf.mxu0 }
 0x46b   :  { %2700 = vst.msk [vmem:[%s6163_s2 + $0xd0] sm:$0xff] %vm2673_vm3, %v2651_v23  ;;  %v3100_v19 = vadd.f32 %v3099_v2, %v3098_v41  ;;  %v3209_v58 = vadd.f32 %v3208_v45, %v3207_v38 }
 0x46c   :  { %v3101_v27 = vpop.f32.mrf.mxu1  ;;  %v3210_v5 = vpop.f32.mrf.mxu0 }
 0x46d   :  { %v2654_v53 = vadd.f32 %v3209_v58, %v2493_v43  ;;  %v2498_v50 = vadd.f32 %v3100_v19, %v5943_v20 }
 0x46e   :  { %v3102_v63 = vpop.f32.mrf.mxu1  ;;  %v3211_v33 = vpop.f32.mrf.mxu0 }
 0x46f   :  { %2701 = vst.msk [vmem:[%s6163_s2 + $0xd8] sm:$0xff] %vm2673_vm3, %v2654_v53  ;;  %v3103_v16 = vadd.f32 %v3102_v63, %v3101_v27  ;;  %v3212_v35 = vadd.f32 %v3211_v33, %v3210_v5 }
 0x470   :  { %v3104_v48 = vpop.f32.mrf.mxu1  ;;  %v3213_v25 = vpop.f32.mrf.mxu0 }
 0x471   :  { %v2659_v60 = vadd.f32 %v3212_v35, %v2498_v50  ;;  %v2501_v40 = vadd.f32 %v3103_v16, %v5947_v34 }
 0x472   :  { %v3105_v47 = vpop.f32.mrf.mxu1  ;;  %v3214_v31 = vpop.f32.mrf.mxu0 }
 0x473   :  { %2702 = vst.msk [vmem:[%s6163_s2 + $0xe0] sm:$0xff] %vm2673_vm3, %v2659_v60  ;;  %v3106_v20 = vadd.f32 %v3105_v47, %v3104_v48  ;;  %v3215_v42 = vadd.f32 %v3214_v31, %v3213_v25 }
 0x474   :  { %v3107_v56 = vpop.f32.mrf.mxu1  ;;  %v3216_v11 = vpop.f32.mrf.mxu0 }
 0x475   :  { %v2662_v8 = vadd.f32 %v3215_v42, %v2501_v40  ;;  %v2506_v22 = vadd.f32 %v3106_v20, %v5973_v32 }
 0x476   :  { %v3108_v21 = vpop.f32.mrf.mxu1  ;;  %v3217_v15 = vpop.f32.mrf.mxu0 }
 0x477   :  { %2703 = vst.msk [vmem:[%s6163_s2 + $0xe8] sm:$0xff] %vm2673_vm3, %v2662_v8  ;;  %v3109_v34 = vadd.f32 %v3108_v21, %v3107_v56  ;;  %v3218_v9 = vadd.f32 %v3217_v15, %v3216_v11 }
 0x478   :  { %v3219_v57 = vpop.f32.mrf.mxu0 }
 0x479   :  { %v2667_v1 = vadd.f32 %v3218_v9, %v2506_v22  ;;  %v2509_v10 = vadd.f32 %v3109_v34, %v6581_v52 }
 0x47a   :  { %v3220_v13 = vpop.f32.mrf.mxu0 }
 0x47b   :  { %2704 = vst.msk [vmem:[%s6163_s2 + $0xf0] sm:$0xff] %vm2673_vm3, %v2667_v1  ;;  %v3221_v37 = vadd.f32 %v3220_v13, %v3219_v57 }
 0x47d   :  { %v2670_v28 = vadd.f32 %v3221_v37, %v2509_v10 }
 0x47f   :  { %2705 = vst.msk [vmem:[%s6163_s2 + $0xf8] sm:$0xff] %vm2673_vm3, %v2670_v28 }

</bundles_post_ra>
